<compile_context>
chip_gen: v5e
topology: v5e:2x2
jax: 0.10.0
libtpu: 0.0.40
codegen_flags: <defaults>
</compile_context>

<pallas_src>
import functools

import jax
import jax.numpy as jnp
from jax.experimental import pallas as pl
from jax.experimental.pallas import tpu as pltpu

EPS = 1e-5
LANE = 128
VMEM_LIMIT = 48 * 1024 * 1024  # explicit scoped-VMEM budget (headroom under v7x 64 MiB)


def _round_up(x, m):
    return (x + m - 1) // m * m


def _apply_act(y, act):
    if act == "leaky":
        return jnp.where(y > 0, y, 0.2 * y)
    if act == "relu":
        return jnp.maximum(y, 0.0)
    if act == "tanh":
        return jnp.tanh(y)
    return y


# ----------------------------- Pallas kernels ------------------------------ #

def _mm_act_kernel(a_ref, b_ref, o_ref, acc_ref, *, act):
    """K-tiled bf16 matmul with f32 accumulation and fused activation (no BN)."""
    k = pl.program_id(1)

    @pl.when(k == 0)
    def _():
        acc_ref[...] = jnp.zeros_like(acc_ref)

    acc_ref[...] += jnp.dot(a_ref[...], b_ref[...],
                            preferred_element_type=jnp.float32)

    @pl.when(k == pl.num_programs(1) - 1)
    def _():
        o_ref[...] = _apply_act(acc_ref[...], act).astype(o_ref.dtype)


def _mm_stats_kernel(a_ref, b_ref, o_ref, psum_ref, psq_ref, acc_ref):
    """K-tiled matmul emitting pre-activation output plus fused per-channel
    partial sum / sum-of-squares (for BatchNorm) as extra outputs."""
    k = pl.program_id(1)

    @pl.when(k == 0)
    def _():
        acc_ref[...] = jnp.zeros_like(acc_ref)

    acc_ref[...] += jnp.dot(a_ref[...], b_ref[...],
                            preferred_element_type=jnp.float32)

    @pl.when(k == pl.num_programs(1) - 1)
    def _():
        y = acc_ref[...]
        o_ref[...] = y.astype(o_ref.dtype)
        cs = jnp.sum(y, axis=0, keepdims=True)        # (1, Cp) channel sum (f32)
        cq = jnp.sum(y * y, axis=0, keepdims=True)    # (1, Cp) channel sum of squares
        # write sublane-broadcast so the stats output block is a full (8, Cp) tile
        psum_ref[...] = jnp.broadcast_to(cs, psum_ref.shape)
        psq_ref[...] = jnp.broadcast_to(cq, psq_ref.shape)


def _affine_act_kernel(x_ref, s_ref, t_ref, o_ref, *, act):
    y = x_ref[...].astype(jnp.float32) * s_ref[...] + t_ref[...]
    o_ref[...] = _apply_act(y, act).astype(o_ref.dtype)


# ---------------------------- pallas_call glue ------------------------------ #

def _pick_tiles(M, K):
    m8 = _round_up(max(M, 8), 8)
    if m8 <= 256:
        tm = m8
    elif M >= 4096:
        tm = 512
    else:
        tm = 256
    Mp = _round_up(M, tm)
    if K > 2048:                      # K-tile only when the B panel gets big (v7x VMEM)
        tk = 512
        Kp = _round_up(K, tk)
    else:
        tk = Kp = K                   # full-K block (exempt from the 128-lane rule)
    return tm, Mp, tk, Kp


def _pad2d(x, rows, cols):
    r, c = x.shape
    if r == rows and c == cols:
        return x
    return jnp.pad(x, ((0, rows - r), (0, cols - c)))


def matmul_act(A, B, act, out_dtype, tm, tk):
    Mp, Kp = A.shape
    Cp = B.shape[1]
    nm, nk = Mp // tm, Kp // tk
    cost = pl.CostEstimate(
        flops=2 * Mp * Kp * Cp,
        transcendentals=Mp * Cp if act == "tanh" else 0,
        bytes_accessed=A.size * 2 + B.size * 2
                       + Mp * Cp * jnp.dtype(out_dtype).itemsize)
    return pl.pallas_call(
        functools.partial(_mm_act_kernel, act=act),
        out_shape=jax.ShapeDtypeStruct((Mp, Cp), out_dtype),
        grid_spec=pltpu.PrefetchScalarGridSpec(
            num_scalar_prefetch=0,
            grid=(nm, nk),
            in_specs=[
                pl.BlockSpec((tm, tk), lambda i, k: (i, k)),
                pl.BlockSpec((tk, Cp), lambda i, k: (k, 0)),
            ],
            out_specs=pl.BlockSpec((tm, Cp), lambda i, k: (i, 0)),
            scratch_shapes=[pltpu.VMEM((tm, Cp), jnp.float32)],
        ),
        compiler_params=pltpu.CompilerParams(
            dimension_semantics=("parallel", "arbitrary"),
            vmem_limit_bytes=VMEM_LIMIT),
        cost_estimate=cost,
    )(A, B)


def matmul_stats(A, B, tm, tk):
    Mp, Kp = A.shape
    Cp = B.shape[1]
    nm, nk = Mp // tm, Kp // tk
    cost = pl.CostEstimate(
        flops=2 * Mp * Kp * Cp + 3 * Mp * Cp,
        transcendentals=0,
        bytes_accessed=A.size * 2 + B.size * 2 + Mp * Cp * 2 + 2 * nm * 8 * Cp * 4)
    return pl.pallas_call(
        _mm_stats_kernel,
        out_shape=(jax.ShapeDtypeStruct((Mp, Cp), jnp.bfloat16),
                   jax.ShapeDtypeStruct((nm * 8, Cp), jnp.float32),
                   jax.ShapeDtypeStruct((nm * 8, Cp), jnp.float32)),
        grid_spec=pltpu.PrefetchScalarGridSpec(
            num_scalar_prefetch=0,
            grid=(nm, nk),
            in_specs=[
                pl.BlockSpec((tm, tk), lambda i, k: (i, k)),
                pl.BlockSpec((tk, Cp), lambda i, k: (k, 0)),
            ],
            out_specs=(pl.BlockSpec((tm, Cp), lambda i, k: (i, 0)),
                       pl.BlockSpec((8, Cp), lambda i, k: (i, 0)),
                       pl.BlockSpec((8, Cp), lambda i, k: (i, 0))),
            scratch_shapes=[pltpu.VMEM((tm, Cp), jnp.float32)],
        ),
        compiler_params=pltpu.CompilerParams(
            dimension_semantics=("parallel", "arbitrary"),
            vmem_limit_bytes=VMEM_LIMIT),
        cost_estimate=cost,
    )(A, B)


def affine_act(X, scale, shift, act, out_dtype, tm):
    Mp, Cp = X.shape
    nm = Mp // tm
    cost = pl.CostEstimate(
        flops=2 * Mp * Cp,
        transcendentals=Mp * Cp if act == "tanh" else 0,
        bytes_accessed=Mp * Cp * 2 + 2 * Cp * 4
                       + Mp * Cp * jnp.dtype(out_dtype).itemsize)
    return pl.pallas_call(
        functools.partial(_affine_act_kernel, act=act),
        out_shape=jax.ShapeDtypeStruct((Mp, Cp), out_dtype),
        grid_spec=pltpu.PrefetchScalarGridSpec(
            num_scalar_prefetch=0,
            grid=(nm,),
            in_specs=[
                pl.BlockSpec((tm, Cp), lambda i: (i, 0)),
                pl.BlockSpec((1, Cp), lambda i: (0, 0)),
                pl.BlockSpec((1, Cp), lambda i: (0, 0)),
            ],
            out_specs=pl.BlockSpec((tm, Cp), lambda i: (i, 0)),
        ),
        compiler_params=pltpu.CompilerParams(
            dimension_semantics=("parallel",),
            vmem_limit_bytes=VMEM_LIMIT),
        cost_estimate=cost,
    )(X, scale, shift)


# ------------------------------ layer glue --------------------------------- #

def run_layer(A, Wmat, gamma, beta, act, use_bn, groups, out_dtype):
    """A: (M, K) patches, Wmat: (K, groups*C).  BatchNorm (training-mode batch
    stats) is computed per real channel C, summed over the `groups` parity copies."""
    M, K = A.shape
    GC = Wmat.shape[1]
    Cp = max(LANE, _round_up(GC, LANE))
    tm, Mp, tk, Kp = _pick_tiles(M, K)

    Ap = _pad2d(A, Mp, Kp).astype(jnp.bfloat16)
    Bp = _pad2d(Wmat, Kp, Cp).astype(jnp.bfloat16)

    if not use_bn:
        out = matmul_act(Ap, Bp, act, out_dtype, tm, tk)
        return out[:M, :GC]

    pre, psum, psq = matmul_stats(Ap, Bp, tm, tk)
    C = GC // groups
    # rows [i*8, i*8+8) of psum/psq are identical per tile -> take one per tile.
    s = jnp.sum(psum[0::8], axis=0)[:GC].reshape(groups, C).sum(axis=0)
    sq = jnp.sum(psq[0::8], axis=0)[:GC].reshape(groups, C).sum(axis=0)
    cnt = float(M * groups)
    mean = s / cnt
    var = jnp.maximum(sq / cnt - mean * mean, 0.0)   # clamp f32 cancellation
    inv = gamma / jnp.sqrt(var + EPS)
    shift = beta - mean * inv
    scale_v = jnp.tile(inv, groups)                  # per-channel affine, per parity copy
    shift_v = jnp.tile(shift, groups)
    scale_p = _pad2d(scale_v.reshape(1, GC), 1, Cp)
    shift_p = _pad2d(shift_v.reshape(1, GC), 1, Cp)
    out = affine_act(pre, scale_p, shift_p, act, out_dtype, tm)
    return out[:M, :GC]


def im2col_conv(x):
    """Patches for Conv2d(k=4, s=2, p=1). x: (N,H,W,C) -> (N*OH*OW, 16*C)."""
    N, H, W, C = x.shape
    OH, OW = H // 2, W // 2
    xp = jnp.pad(x, ((0, 0), (1, 1), (1, 1), (0, 0)))
    cols = [xp[:, kh:kh + 2 * OH - 1:2, kw:kw + 2 * OW - 1:2, :]
            for kh in range(4) for kw in range(4)]
    A = jnp.concatenate(cols, axis=-1)
    return A.reshape(N * OH * OW, 16 * C), (N, OH, OW)


def im2col_3x3(x):
    """Stride-1 3x3 patches (pad 1). x: (N,H,W,C) -> (N*H*W, 9*C)."""
    N, H, W, C = x.shape
    xp = jnp.pad(x, ((0, 0), (1, 1), (1, 1), (0, 0)))
    cols = [xp[:, r:r + H, s:s + W, :] for r in range(3) for s in range(3)]
    A = jnp.concatenate(cols, axis=-1)
    return A.reshape(N * H * W, 9 * C), (N, H, W)


def deconv_parity_weight(w_t):
    """ConvTranspose2d(k=4,s=2,p=1) weight (Cin,Cout,4,4) -> combined (9*Cin, 4*Cout)
    weight: the 4 output parities share a single 3x3 im2col of the undilated input.
    out[n, 2i+po, 2j+pw, c] = sum_{dh,dw} xpad[n, i+po+dh, j+pw+dw] * w[:, c, 3-po-2dh, 3-pw-2dw]."""
    Cin, Cout = w_t.shape[0], w_t.shape[1]
    parts = []
    for po in (0, 1):
        for pw in (0, 1):
            kh_idx = jnp.array([3 - po, 1 - po])            # dh = 0, 1
            kw_idx = jnp.array([3 - pw, 1 - pw])            # dw = 0, 1
            s = w_t[:, :, kh_idx, :][:, :, :, kw_idx]       # (Cin, Cout, 2, 2)
            s = jnp.transpose(s, (2, 3, 0, 1))              # (2, 2, Cin, Cout)
            s = jnp.pad(s, ((po, 1 - po), (pw, 1 - pw), (0, 0), (0, 0)))
            parts.append(s)                                 # (3, 3, Cin, Cout)
    Wc = jnp.stack(parts, axis=3)                           # (3, 3, Cin, 4, Cout)
    return Wc.reshape(9 * Cin, 4 * Cout)


def conv_block(h, w, gamma, beta, act, use_bn, out_dtype=jnp.bfloat16):
    # w: (Cout, Cin, 4, 4), PyTorch Conv2d layout
    A, (N, OH, OW) = im2col_conv(h.astype(jnp.bfloat16))
    Cout, Cin = w.shape[0], w.shape[1]
    Wmat = jnp.transpose(w, (2, 3, 1, 0)).reshape(16 * Cin, Cout)
    out = run_layer(A, Wmat, gamma, beta, act, use_bn, 1, out_dtype)
    return out.reshape(N, OH, OW, Cout)


def deconv_block(h, w_t, gamma, beta, act, use_bn, out_dtype=jnp.bfloat16):
    # w_t: (Cin, Cout, 4, 4), PyTorch ConvTranspose2d layout
    A, (N, H, W) = im2col_3x3(h.astype(jnp.bfloat16))
    Cin, Cout = w_t.shape[0], w_t.shape[1]
    Wmat = deconv_parity_weight(w_t)                        # (9*Cin, 4*Cout)
    out = run_layer(A, Wmat, gamma, beta, act, use_bn, 4, out_dtype)
    # depth-to-space: (N*H*W, 4*Cout) -> (N, 2H, 2W, Cout)
    out = out.reshape(N, H, W, 2, 2, Cout)
    out = jnp.transpose(out, (0, 1, 3, 2, 4, 5)).reshape(N, 2 * H, 2 * W, Cout)
    return out


# ------------------------------ model setup -------------------------------- #

def init_params(key, input_nc, output_nc, ngf):
    ks = jax.random.split(key, 8)

    def w(k, shape):
        return 0.05 * jax.random.normal(k, shape, jnp.float32)

    p = {
        "w1": w(ks[0], (ngf, input_nc, 4, 4)),
        "w2": w(ks[1], (ngf * 2, ngf, 4, 4)),
        "w3": w(ks[2], (ngf * 4, ngf * 2, 4, 4)),
        "w4": w(ks[3], (ngf * 8, ngf * 4, 4, 4)),
        "dw1": w(ks[4], (ngf * 8, ngf * 4, 4, 4)),
        "dw2": w(ks[5], (ngf * 4, ngf * 2, 4, 4)),
        "dw3": w(ks[6], (ngf * 2, ngf, 4, 4)),
        "dw4": w(ks[7], (ngf, output_nc, 4, 4)),
    }
    # BatchNorm affine params (PyTorch defaults: gamma=1, beta=0)
    for name, c in [("bn2", ngf * 2), ("bn3", ngf * 4), ("bn4", ngf * 8),
                    ("dbn1", ngf * 4), ("dbn2", ngf * 2), ("dbn3", ngf)]:
        p[name + "_g"] = jnp.ones((c,), jnp.float32)
        p[name + "_b"] = jnp.zeros((c,), jnp.float32)
    return p


def generator_forward(x_nchw, p):
    h = jnp.transpose(x_nchw, (0, 2, 3, 1))   # NCHW -> NHWC
    h = conv_block(h, p["w1"], None, None, "leaky", False)
    h = conv_block(h, p["w2"], p["bn2_g"], p["bn2_b"], "leaky", True)
    h = conv_block(h, p["w3"], p["bn3_g"], p["bn3_b"], "leaky", True)
    h = conv_block(h, p["w4"], p["bn4_g"], p["bn4_b"], "leaky", True)
    h = deconv_block(h, p["dw1"], p["dbn1_g"], p["dbn1_b"], "relu", True)
    h = deconv_block(h, p["dw2"], p["dbn2_g"], p["dbn2_b"], "relu", True)
    h = deconv_block(h, p["dw3"], p["dbn3_g"], p["dbn3_b"], "relu", True)
    h = deconv_block(h, p["dw4"], None, None, "tanh", False, out_dtype=jnp.float32)
    return jnp.transpose(h, (0, 3, 1, 2))     # NHWC -> NCHW


if __name__ == "__main__":
    key = jax.random.PRNGKey(0)
    kx, kp = jax.random.split(key)

    N, input_nc, output_nc, ngf, H = 2, 3, 3, 8, 32
    x = jax.random.normal(kx, (N, input_nc, H, H), jnp.float32)
    params = init_params(kp, input_nc, output_nc, ngf)

    out = jax.jit(generator_forward)(x, params)
    out = jax.block_until_ready(out)
    assert out.shape == (N, output_nc, H, H), out.shape
    assert bool(jnp.all(jnp.isfinite(out)))
    print("KERNEL_OK")
</pallas_src>

<mosaic_0001>
module attributes {stable_mosaic.version = 11 : i64} {
  func.func @_mm_act_kernel(%arg0: i32, %arg1: i32, %arg2: memref<256x48xbf16, #tpu.memory_space<vmem>>, %arg3: memref<48x128xbf16, #tpu.memory_space<vmem>>, %arg4: memref<256x128xbf16, #tpu.memory_space<vmem>>, %arg5: memref<256x128xf32, #tpu.memory_space<vmem>>) attributes {dimension_semantics = [#tpu.dimension_semantics<parallel>, #tpu.dimension_semantics<arbitrary>], iteration_bounds = array<i64: 2, 1>, scalar_prefetch = 0 : i64, scratch_operands = 1 : i64, tpu.core_type = #tpu.core_type<tc>, window_params = [{transform_indices = @transform_0, window_bounds = array<i64: 256, 48>}, {transform_indices = @transform_1, window_bounds = array<i64: 48, 128>}, {transform_indices = @transform_2, window_bounds = array<i64: 256, 128>}]} {
    %c0_i32 = arith.constant 0 : i32
    %0 = arith.cmpi eq, %arg1, %c0_i32 : i32
    %1 = arith.extui %0 : i1 to i32
    %c0_i32_0 = arith.constant 0 : i32
    %2 = arith.cmpi ne, %1, %c0_i32_0 : i32
    scf.if %2 {
      %cst_10 = arith.constant 0.000000e+00 : f32
      %12 = vector.broadcast %cst_10 : f32 to vector<256x128xf32>
      %c0_11 = arith.constant 0 : index
      %c0_12 = arith.constant 0 : index
      %13 = vector.load %arg5[%c0_11, %c0_12] : memref<256x128xf32, #tpu.memory_space<vmem>>, vector<256x128xf32>
      tpu.vector_store %arg5[%c0_11, %c0_12], %12 {strides = array<i32>} : memref<256x128xf32, #tpu.memory_space<vmem>>, vector<256x128xf32>,
    } else {
    }
    %c0 = arith.constant 0 : index
    %c0_1 = arith.constant 0 : index
    %3 = vector.load %arg5[%c0, %c0_1] : memref<256x128xf32, #tpu.memory_space<vmem>>, vector<256x128xf32>
    %c0_2 = arith.constant 0 : index
    %c0_3 = arith.constant 0 : index
    %4 = vector.load %arg2[%c0_2, %c0_3] : memref<256x48xbf16, #tpu.memory_space<vmem>>, vector<256x48xbf16>
    %c0_4 = arith.constant 0 : index
    %c0_5 = arith.constant 0 : index
    %5 = vector.load %arg3[%c0_4, %c0_5] : memref<48x128xbf16, #tpu.memory_space<vmem>>, vector<48x128xbf16>
    %cst = arith.constant dense<0.000000e+00> : vector<256x128xf32>
    %6 = tpu.matmul %4, %5, %cst {dimension_numbers = #tpu.dot_dimension_numbers<[1], [0], [0], [1], [0, 0, 1, 1], [], []>} : vector<256x48xbf16>, vector<48x128xbf16>, vector<256x128xf32> -> vector<256x128xf32>
    %7 = arith.addf %3, %6 : vector<256x128xf32>
    %c0_6 = arith.constant 0 : index
    %c0_7 = arith.constant 0 : index
    %8 = vector.load %arg5[%c0_6, %c0_7] : memref<256x128xf32, #tpu.memory_space<vmem>>, vector<256x128xf32>
    tpu.vector_store %arg5[%c0_6, %c0_7], %7 {strides = array<i32>} : memref<256x128xf32, #tpu.memory_space<vmem>>, vector<256x128xf32>,
    %c0_i32_8 = arith.constant 0 : i32
    %9 = arith.cmpi eq, %arg1, %c0_i32_8 : i32
    %10 = arith.extui %9 : i1 to i32
    %c0_i32_9 = arith.constant 0 : i32
    %11 = arith.cmpi ne, %10, %c0_i32_9 : i32
    scf.if %11 {
      %c0_10 = arith.constant 0 : index
      %c0_11 = arith.constant 0 : index
      %12 = vector.load %arg5[%c0_10, %c0_11] : memref<256x128xf32, #tpu.memory_space<vmem>>, vector<256x128xf32>
      %cst_12 = arith.constant 0.000000e+00 : f32
      %13 = vector.broadcast %cst_12 : f32 to vector<256x128xf32>
      %14 = arith.cmpf ogt, %12, %13 : vector<256x128xf32>
      %cst_13 = arith.constant 2.000000e-01 : f32
      %15 = vector.broadcast %cst_13 : f32 to vector<256x128xf32>
      %16 = arith.mulf %15, %12 : vector<256x128xf32>
      %17 = arith.select %14, %12, %16 : vector<256x128xi1>, vector<256x128xf32>
      %18 = arith.truncf %17 : vector<256x128xf32> to vector<256x128xbf16>
      %c0_14 = arith.constant 0 : index
      %c0_15 = arith.constant 0 : index
      %19 = vector.load %arg4[%c0_14, %c0_15] : memref<256x128xbf16, #tpu.memory_space<vmem>>, vector<256x128xbf16>
      tpu.vector_store %arg4[%c0_14, %c0_15], %18 {strides = array<i32>} : memref<256x128xbf16, #tpu.memory_space<vmem>>, vector<256x128xbf16>,
    } else {
    }
    return
  }
  func.func @transform_0(%arg0: i32, %arg1: i32) -> (i32, i32) {
    %c0_i32 = arith.constant 0 : i32
    return %arg0, %arg1 : i32, i32
  }
  func.func @transform_1(%arg0: i32, %arg1: i32) -> (i32, i32) {
    %c0_i32 = arith.constant 0 : i32
    %c0_i32_0 = arith.constant 0 : i32
    return %arg1, %c0_i32 : i32, i32
  }
  func.func @transform_2(%arg0: i32, %arg1: i32) -> (i32, i32) {
    %c0_i32 = arith.constant 0 : i32
    %c0_i32_0 = arith.constant 0 : i32
    return %arg0, %c0_i32 : i32, i32
  }
}

module attributes {stable_mosaic.version = 11 : i64} {
  func.func @_mm_stats_kernel(%arg0: i32, %arg1: i32, %arg2: memref<128x128xbf16, #tpu.memory_space<vmem>>, %arg3: memref<128x128xbf16, #tpu.memory_space<vmem>>, %arg4: memref<128x128xbf16, #tpu.memory_space<vmem>>, %arg5: memref<8x128xf32, #tpu.memory_space<vmem>>, %arg6: memref<8x128xf32, #tpu.memory_space<vmem>>, %arg7: memref<128x128xf32, #tpu.memory_space<vmem>>) attributes {dimension_semantics = [#tpu.dimension_semantics<parallel>, #tpu.dimension_semantics<arbitrary>], iteration_bounds = array<i64: 1, 1>, scalar_prefetch = 0 : i64, scratch_operands = 1 : i64, tpu.core_type = #tpu.core_type<tc>, window_params = [{transform_indices = @transform_0, window_bounds = array<i64: 128, 128>}, {transform_indices = @transform_1, window_bounds = array<i64: 128, 128>}, {transform_indices = @transform_2, window_bounds = array<i64: 128, 128>}, {transform_indices = @transform_3, window_bounds = array<i64: 8, 128>}, {transform_indices = @transform_4, window_bounds = array<i64: 8, 128>}]} {
    %c0_i32 = arith.constant 0 : i32
    %0 = arith.cmpi eq, %arg1, %c0_i32 : i32
    %1 = arith.extui %0 : i1 to i32
    %c0_i32_0 = arith.constant 0 : i32
    %2 = arith.cmpi ne, %1, %c0_i32_0 : i32
    scf.if %2 {
      %cst_10 = arith.constant 0.000000e+00 : f32
      %12 = vector.broadcast %cst_10 : f32 to vector<128x128xf32>
      %c0_11 = arith.constant 0 : index
      %c0_12 = arith.constant 0 : index
      %13 = vector.load %arg7[%c0_11, %c0_12] : memref<128x128xf32, #tpu.memory_space<vmem>>, vector<128x128xf32>
      tpu.vector_store %arg7[%c0_11, %c0_12], %12 {strides = array<i32>} : memref<128x128xf32, #tpu.memory_space<vmem>>, vector<128x128xf32>,
    } else {
    }
    %c0 = arith.constant 0 : index
    %c0_1 = arith.constant 0 : index
    %3 = vector.load %arg7[%c0, %c0_1] : memref<128x128xf32, #tpu.memory_space<vmem>>, vector<128x128xf32>
    %c0_2 = arith.constant 0 : index
    %c0_3 = arith.constant 0 : index
    %4 = vector.load %arg2[%c0_2, %c0_3] : memref<128x128xbf16, #tpu.memory_space<vmem>>, vector<128x128xbf16>
    %c0_4 = arith.constant 0 : index
    %c0_5 = arith.constant 0 : index
    %5 = vector.load %arg3[%c0_4, %c0_5] : memref<128x128xbf16, #tpu.memory_space<vmem>>, vector<128x128xbf16>
    %cst = arith.constant dense<0.000000e+00> : vector<128x128xf32>
    %6 = tpu.matmul %4, %5, %cst {dimension_numbers = #tpu.dot_dimension_numbers<[1], [0], [0], [1], [0, 0, 1, 1], [], []>} : vector<128x128xbf16>, vector<128x128xbf16>, vector<128x128xf32> -> vector<128x128xf32>
    %7 = arith.addf %3, %6 : vector<128x128xf32>
    %c0_6 = arith.constant 0 : index
    %c0_7 = arith.constant 0 : index
    %8 = vector.load %arg7[%c0_6, %c0_7] : memref<128x128xf32, #tpu.memory_space<vmem>>, vector<128x128xf32>
    tpu.vector_store %arg7[%c0_6, %c0_7], %7 {strides = array<i32>} : memref<128x128xf32, #tpu.memory_space<vmem>>, vector<128x128xf32>,
    %c0_i32_8 = arith.constant 0 : i32
    %9 = arith.cmpi eq, %arg1, %c0_i32_8 : i32
    %10 = arith.extui %9 : i1 to i32
    %c0_i32_9 = arith.constant 0 : i32
    %11 = arith.cmpi ne, %10, %c0_i32_9 : i32
    scf.if %11 {
      %c0_10 = arith.constant 0 : index
      %c0_11 = arith.constant 0 : index
      %12 = vector.load %arg7[%c0_10, %c0_11] : memref<128x128xf32, #tpu.memory_space<vmem>>, vector<128x128xf32>
      %13 = arith.truncf %12 : vector<128x128xf32> to vector<128x128xbf16>
      %c0_12 = arith.constant 0 : index
      %c0_13 = arith.constant 0 : index
      %14 = vector.load %arg4[%c0_12, %c0_13] : memref<128x128xbf16, #tpu.memory_space<vmem>>, vector<128x128xbf16>
      tpu.vector_store %arg4[%c0_12, %c0_13], %13 {strides = array<i32>} : memref<128x128xbf16, #tpu.memory_space<vmem>>, vector<128x128xbf16>,
      %cst_14 = arith.constant dense<0.000000e+00> : vector<128xf32>
      %15 = vector.multi_reduction <add>, %12, %cst_14 [0] : vector<128x128xf32> to vector<128xf32>
      %16 = vector.shape_cast %15 : vector<128xf32> to vector<1x128xf32>
      %17 = arith.mulf %12, %12 : vector<128x128xf32>
      %cst_15 = arith.constant dense<0.000000e+00> : vector<128xf32>
      %18 = vector.multi_reduction <add>, %17, %cst_15 [0] : vector<128x128xf32> to vector<128xf32>
      %19 = vector.shape_cast %18 : vector<128xf32> to vector<1x128xf32>
      %20 = vector.shape_cast %16 : vector<1x128xf32> to vector<1x128xf32>
      %21 = vector.broadcast %20 : vector<1x128xf32> to vector<8x128xf32>
      %c0_16 = arith.constant 0 : index
      %c0_17 = arith.constant 0 : index
      %22 = vector.load %arg5[%c0_16, %c0_17] : memref<8x128xf32, #tpu.memory_space<vmem>>, vector<8x128xf32>
      tpu.vector_store %arg5[%c0_16, %c0_17], %21 {strides = array<i32>} : memref<8x128xf32, #tpu.memory_space<vmem>>, vector<8x128xf32>,
      %23 = vector.shape_cast %19 : vector<1x128xf32> to vector<1x128xf32>
      %24 = vector.broadcast %23 : vector<1x128xf32> to vector<8x128xf32>
      %c0_18 = arith.constant 0 : index
      %c0_19 = arith.constant 0 : index
      %25 = vector.load %arg6[%c0_18, %c0_19] : memref<8x128xf32, #tpu.memory_space<vmem>>, vector<8x128xf32>
      tpu.vector_store %arg6[%c0_18, %c0_19], %24 {strides = array<i32>} : memref<8x128xf32, #tpu.memory_space<vmem>>, vector<8x128xf32>,
    } else {
    }
    return
  }
  func.func @transform_0(%arg0: i32, %arg1: i32) -> (i32, i32) {
    %c0_i32 = arith.constant 0 : i32
    return %arg0, %arg1 : i32, i32
  }
  func.func @transform_1(%arg0: i32, %arg1: i32) -> (i32, i32) {
    %c0_i32 = arith.constant 0 : i32
    %c0_i32_0 = arith.constant 0 : i32
    return %arg1, %c0_i32 : i32, i32
  }
  func.func @transform_2(%arg0: i32, %arg1: i32) -> (i32, i32) {
    %c0_i32 = arith.constant 0 : i32
    %c0_i32_0 = arith.constant 0 : i32
    return %arg0, %c0_i32 : i32, i32
  }
  func.func @transform_3(%arg0: i32, %arg1: i32) -> (i32, i32) {
    %c0_i32 = arith.constant 0 : i32
    %c0_i32_0 = arith.constant 0 : i32
    return %arg0, %c0_i32 : i32, i32
  }
  func.func @transform_4(%arg0: i32, %arg1: i32) -> (i32, i32) {
    %c0_i32 = arith.constant 0 : i32
    %c0_i32_0 = arith.constant 0 : i32
    return %arg0, %c0_i32 : i32, i32
  }
}

module attributes {stable_mosaic.version = 11 : i64} {
  func.func @_affine_act_kernel(%arg0: i32, %arg1: memref<128x128xbf16, #tpu.memory_space<vmem>>, %arg2: memref<1x128xf32, #tpu.memory_space<vmem>>, %arg3: memref<1x128xf32, #tpu.memory_space<vmem>>, %arg4: memref<128x128xbf16, #tpu.memory_space<vmem>>) attributes {dimension_semantics = [#tpu.dimension_semantics<parallel>], iteration_bounds = array<i64: 1>, scalar_prefetch = 0 : i64, scratch_operands = 0 : i64, tpu.core_type = #tpu.core_type<tc>, window_params = [{transform_indices = @transform_0, window_bounds = array<i64: 128, 128>}, {pipeline_mode = #tpu.pipeline_mode<synchronous>, transform_indices = @transform_1, window_bounds = array<i64: 1, 128>}, {pipeline_mode = #tpu.pipeline_mode<synchronous>, transform_indices = @transform_2, window_bounds = array<i64: 1, 128>}, {transform_indices = @transform_3, window_bounds = array<i64: 128, 128>}]} {
    %c0 = arith.constant 0 : index
    %c0_0 = arith.constant 0 : index
    %0 = vector.load %arg1[%c0, %c0_0] : memref<128x128xbf16, #tpu.memory_space<vmem>>, vector<128x128xbf16>
    %1 = arith.extf %0 : vector<128x128xbf16> to vector<128x128xf32>
    %c0_1 = arith.constant 0 : index
    %c0_2 = arith.constant 0 : index
    %2 = vector.load %arg2[%c0_1, %c0_2] : memref<1x128xf32, #tpu.memory_space<vmem>>, vector<1x128xf32>
    %3 = vector.broadcast %2 : vector<1x128xf32> to vector<128x128xf32>
    %4 = arith.mulf %1, %3 : vector<128x128xf32>
    %c0_3 = arith.constant 0 : index
    %c0_4 = arith.constant 0 : index
    %5 = vector.load %arg3[%c0_3, %c0_4] : memref<1x128xf32, #tpu.memory_space<vmem>>, vector<1x128xf32>
    %6 = vector.broadcast %5 : vector<1x128xf32> to vector<128x128xf32>
    %7 = arith.addf %4, %6 : vector<128x128xf32>
    %cst = arith.constant 0.000000e+00 : f32
    %8 = vector.broadcast %cst : f32 to vector<128x128xf32>
    %9 = arith.cmpf ogt, %7, %8 : vector<128x128xf32>
    %cst_5 = arith.constant 2.000000e-01 : f32
    %10 = vector.broadcast %cst_5 : f32 to vector<128x128xf32>
    %11 = arith.mulf %10, %7 : vector<128x128xf32>
    %12 = arith.select %9, %7, %11 : vector<128x128xi1>, vector<128x128xf32>
    %13 = arith.truncf %12 : vector<128x128xf32> to vector<128x128xbf16>
    %c0_6 = arith.constant 0 : index
    %c0_7 = arith.constant 0 : index
    %14 = vector.load %arg4[%c0_6, %c0_7] : memref<128x128xbf16, #tpu.memory_space<vmem>>, vector<128x128xbf16>
    tpu.vector_store %arg4[%c0_6, %c0_7], %13 {strides = array<i32>} : memref<128x128xbf16, #tpu.memory_space<vmem>>, vector<128x128xbf16>,
    return
  }
  func.func @transform_0(%arg0: i32) -> (i32, i32) {
    %c0_i32 = arith.constant 0 : i32
    %c0_i32_0 = arith.constant 0 : i32
    return %arg0, %c0_i32 : i32, i32
  }
  func.func @transform_1(%arg0: i32) -> (i32, i32) {
    %c0_i32 = arith.constant 0 : i32
    %c0_i32_0 = arith.constant 0 : i32
    %c0_i32_1 = arith.constant 0 : i32
    return %c0_i32, %c0_i32_0 : i32, i32
  }
  func.func @transform_2(%arg0: i32) -> (i32, i32) {
    %c0_i32 = arith.constant 0 : i32
    %c0_i32_0 = arith.constant 0 : i32
    %c0_i32_1 = arith.constant 0 : i32
    return %c0_i32, %c0_i32_0 : i32, i32
  }
  func.func @transform_3(%arg0: i32) -> (i32, i32) {
    %c0_i32 = arith.constant 0 : i32
    %c0_i32_0 = arith.constant 0 : i32
    return %arg0, %c0_i32 : i32, i32
  }
}

module attributes {stable_mosaic.version = 11 : i64} {
  func.func @_affine_act_kernel(%arg0: i32, %arg1: memref<32x128xbf16, #tpu.memory_space<vmem>>, %arg2: memref<1x128xf32, #tpu.memory_space<vmem>>, %arg3: memref<1x128xf32, #tpu.memory_space<vmem>>, %arg4: memref<32x128xbf16, #tpu.memory_space<vmem>>) attributes {dimension_semantics = [#tpu.dimension_semantics<parallel>], iteration_bounds = array<i64: 1>, scalar_prefetch = 0 : i64, scratch_operands = 0 : i64, tpu.core_type = #tpu.core_type<tc>, window_params = [{transform_indices = @transform_0, window_bounds = array<i64: 32, 128>}, {pipeline_mode = #tpu.pipeline_mode<synchronous>, transform_indices = @transform_1, window_bounds = array<i64: 1, 128>}, {pipeline_mode = #tpu.pipeline_mode<synchronous>, transform_indices = @transform_2, window_bounds = array<i64: 1, 128>}, {transform_indices = @transform_3, window_bounds = array<i64: 32, 128>}]} {
    %c0 = arith.constant 0 : index
    %c0_0 = arith.constant 0 : index
    %0 = vector.load %arg1[%c0, %c0_0] : memref<32x128xbf16, #tpu.memory_space<vmem>>, vector<32x128xbf16>
    %1 = arith.extf %0 : vector<32x128xbf16> to vector<32x128xf32>
    %c0_1 = arith.constant 0 : index
    %c0_2 = arith.constant 0 : index
    %2 = vector.load %arg2[%c0_1, %c0_2] : memref<1x128xf32, #tpu.memory_space<vmem>>, vector<1x128xf32>
    %3 = vector.broadcast %2 : vector<1x128xf32> to vector<32x128xf32>
    %4 = arith.mulf %1, %3 : vector<32x128xf32>
    %c0_3 = arith.constant 0 : index
    %c0_4 = arith.constant 0 : index
    %5 = vector.load %arg3[%c0_3, %c0_4] : memref<1x128xf32, #tpu.memory_space<vmem>>, vector<1x128xf32>
    %6 = vector.broadcast %5 : vector<1x128xf32> to vector<32x128xf32>
    %7 = arith.addf %4, %6 : vector<32x128xf32>
    %cst = arith.constant 0.000000e+00 : f32
    %8 = vector.broadcast %cst : f32 to vector<32x128xf32>
    %9 = arith.cmpf ogt, %7, %8 : vector<32x128xf32>
    %cst_5 = arith.constant 2.000000e-01 : f32
    %10 = vector.broadcast %cst_5 : f32 to vector<32x128xf32>
    %11 = arith.mulf %10, %7 : vector<32x128xf32>
    %12 = arith.select %9, %7, %11 : vector<32x128xi1>, vector<32x128xf32>
    %13 = arith.truncf %12 : vector<32x128xf32> to vector<32x128xbf16>
    %c0_6 = arith.constant 0 : index
    %c0_7 = arith.constant 0 : index
    %14 = vector.load %arg4[%c0_6, %c0_7] : memref<32x128xbf16, #tpu.memory_space<vmem>>, vector<32x128xbf16>
    tpu.vector_store %arg4[%c0_6, %c0_7], %13 {strides = array<i32>} : memref<32x128xbf16, #tpu.memory_space<vmem>>, vector<32x128xbf16>,
    return
  }
  func.func @transform_0(%arg0: i32) -> (i32, i32) {
    %c0_i32 = arith.constant 0 : i32
    %c0_i32_0 = arith.constant 0 : i32
    return %arg0, %c0_i32 : i32, i32
  }
  func.func @transform_1(%arg0: i32) -> (i32, i32) {
    %c0_i32 = arith.constant 0 : i32
    %c0_i32_0 = arith.constant 0 : i32
    %c0_i32_1 = arith.constant 0 : i32
    return %c0_i32, %c0_i32_0 : i32, i32
  }
  func.func @transform_2(%arg0: i32) -> (i32, i32) {
    %c0_i32 = arith.constant 0 : i32
    %c0_i32_0 = arith.constant 0 : i32
    %c0_i32_1 = arith.constant 0 : i32
    return %c0_i32, %c0_i32_0 : i32, i32
  }
  func.func @transform_3(%arg0: i32) -> (i32, i32) {
    %c0_i32 = arith.constant 0 : i32
    %c0_i32_0 = arith.constant 0 : i32
    return %arg0, %c0_i32 : i32, i32
  }
}

module attributes {stable_mosaic.version = 11 : i64} {
  func.func @_mm_stats_kernel(%arg0: i32, %arg1: i32, %arg2: memref<32x256xbf16, #tpu.memory_space<vmem>>, %arg3: memref<256x128xbf16, #tpu.memory_space<vmem>>, %arg4: memref<32x128xbf16, #tpu.memory_space<vmem>>, %arg5: memref<8x128xf32, #tpu.memory_space<vmem>>, %arg6: memref<8x128xf32, #tpu.memory_space<vmem>>, %arg7: memref<32x128xf32, #tpu.memory_space<vmem>>) attributes {dimension_semantics = [#tpu.dimension_semantics<parallel>, #tpu.dimension_semantics<arbitrary>], iteration_bounds = array<i64: 1, 1>, scalar_prefetch = 0 : i64, scratch_operands = 1 : i64, tpu.core_type = #tpu.core_type<tc>, window_params = [{transform_indices = @transform_0, window_bounds = array<i64: 32, 256>}, {transform_indices = @transform_1, window_bounds = array<i64: 256, 128>}, {transform_indices = @transform_2, window_bounds = array<i64: 32, 128>}, {transform_indices = @transform_3, window_bounds = array<i64: 8, 128>}, {transform_indices = @transform_4, window_bounds = array<i64: 8, 128>}]} {
    %c0_i32 = arith.constant 0 : i32
    %0 = arith.cmpi eq, %arg1, %c0_i32 : i32
    %1 = arith.extui %0 : i1 to i32
    %c0_i32_0 = arith.constant 0 : i32
    %2 = arith.cmpi ne, %1, %c0_i32_0 : i32
    scf.if %2 {
      %cst_10 = arith.constant 0.000000e+00 : f32
      %12 = vector.broadcast %cst_10 : f32 to vector<32x128xf32>
      %c0_11 = arith.constant 0 : index
      %c0_12 = arith.constant 0 : index
      %13 = vector.load %arg7[%c0_11, %c0_12] : memref<32x128xf32, #tpu.memory_space<vmem>>, vector<32x128xf32>
      tpu.vector_store %arg7[%c0_11, %c0_12], %12 {strides = array<i32>} : memref<32x128xf32, #tpu.memory_space<vmem>>, vector<32x128xf32>,
    } else {
    }
    %c0 = arith.constant 0 : index
    %c0_1 = arith.constant 0 : index
    %3 = vector.load %arg7[%c0, %c0_1] : memref<32x128xf32, #tpu.memory_space<vmem>>, vector<32x128xf32>
    %c0_2 = arith.constant 0 : index
    %c0_3 = arith.constant 0 : index
    %4 = vector.load %arg2[%c0_2, %c0_3] : memref<32x256xbf16, #tpu.memory_space<vmem>>, vector<32x256xbf16>
    %c0_4 = arith.constant 0 : index
    %c0_5 = arith.constant 0 : index
    %5 = vector.load %arg3[%c0_4, %c0_5] : memref<256x128xbf16, #tpu.memory_space<vmem>>, vector<256x128xbf16>
    %cst = arith.constant dense<0.000000e+00> : vector<32x128xf32>
    %6 = tpu.matmul %4, %5, %cst {dimension_numbers = #tpu.dot_dimension_numbers<[1], [0], [0], [1], [0, 0, 1, 1], [], []>} : vector<32x256xbf16>, vector<256x128xbf16>, vector<32x128xf32> -> vector<32x128xf32>
    %7 = arith.addf %3, %6 : vector<32x128xf32>
    %c0_6 = arith.constant 0 : index
    %c0_7 = arith.constant 0 : index
    %8 = vector.load %arg7[%c0_6, %c0_7] : memref<32x128xf32, #tpu.memory_space<vmem>>, vector<32x128xf32>
    tpu.vector_store %arg7[%c0_6, %c0_7], %7 {strides = array<i32>} : memref<32x128xf32, #tpu.memory_space<vmem>>, vector<32x128xf32>,
    %c0_i32_8 = arith.constant 0 : i32
    %9 = arith.cmpi eq, %arg1, %c0_i32_8 : i32
    %10 = arith.extui %9 : i1 to i32
    %c0_i32_9 = arith.constant 0 : i32
    %11 = arith.cmpi ne, %10, %c0_i32_9 : i32
    scf.if %11 {
      %c0_10 = arith.constant 0 : index
      %c0_11 = arith.constant 0 : index
      %12 = vector.load %arg7[%c0_10, %c0_11] : memref<32x128xf32, #tpu.memory_space<vmem>>, vector<32x128xf32>
      %13 = arith.truncf %12 : vector<32x128xf32> to vector<32x128xbf16>
      %c0_12 = arith.constant 0 : index
      %c0_13 = arith.constant 0 : index
      %14 = vector.load %arg4[%c0_12, %c0_13] : memref<32x128xbf16, #tpu.memory_space<vmem>>, vector<32x128xbf16>
      tpu.vector_store %arg4[%c0_12, %c0_13], %13 {strides = array<i32>} : memref<32x128xbf16, #tpu.memory_space<vmem>>, vector<32x128xbf16>,
      %cst_14 = arith.constant dense<0.000000e+00> : vector<128xf32>
      %15 = vector.multi_reduction <add>, %12, %cst_14 [0] : vector<32x128xf32> to vector<128xf32>
      %16 = vector.shape_cast %15 : vector<128xf32> to vector<1x128xf32>
      %17 = arith.mulf %12, %12 : vector<32x128xf32>
      %cst_15 = arith.constant dense<0.000000e+00> : vector<128xf32>
      %18 = vector.multi_reduction <add>, %17, %cst_15 [0] : vector<32x128xf32> to vector<128xf32>
      %19 = vector.shape_cast %18 : vector<128xf32> to vector<1x128xf32>
      %20 = vector.shape_cast %16 : vector<1x128xf32> to vector<1x128xf32>
      %21 = vector.broadcast %20 : vector<1x128xf32> to vector<8x128xf32>
      %c0_16 = arith.constant 0 : index
      %c0_17 = arith.constant 0 : index
      %22 = vector.load %arg5[%c0_16, %c0_17] : memref<8x128xf32, #tpu.memory_space<vmem>>, vector<8x128xf32>
      tpu.vector_store %arg5[%c0_16, %c0_17], %21 {strides = array<i32>} : memref<8x128xf32, #tpu.memory_space<vmem>>, vector<8x128xf32>,
      %23 = vector.shape_cast %19 : vector<1x128xf32> to vector<1x128xf32>
      %24 = vector.broadcast %23 : vector<1x128xf32> to vector<8x128xf32>
      %c0_18 = arith.constant 0 : index
      %c0_19 = arith.constant 0 : index
      %25 = vector.load %arg6[%c0_18, %c0_19] : memref<8x128xf32, #tpu.memory_space<vmem>>, vector<8x128xf32>
      tpu.vector_store %arg6[%c0_18, %c0_19], %24 {strides = array<i32>} : memref<8x128xf32, #tpu.memory_space<vmem>>, vector<8x128xf32>,
    } else {
    }
    return
  }
  func.func @transform_0(%arg0: i32, %arg1: i32) -> (i32, i32) {
    %c0_i32 = arith.constant 0 : i32
    return %arg0, %arg1 : i32, i32
  }
  func.func @transform_1(%arg0: i32, %arg1: i32) -> (i32, i32) {
    %c0_i32 = arith.constant 0 : i32
    %c0_i32_0 = arith.constant 0 : i32
    return %arg1, %c0_i32 : i32, i32
  }
  func.func @transform_2(%arg0: i32, %arg1: i32) -> (i32, i32) {
    %c0_i32 = arith.constant 0 : i32
    %c0_i32_0 = arith.constant 0 : i32
    return %arg0, %c0_i32 : i32, i32
  }
  func.func @transform_3(%arg0: i32, %arg1: i32) -> (i32, i32) {
    %c0_i32 = arith.constant 0 : i32
    %c0_i32_0 = arith.constant 0 : i32
    return %arg0, %c0_i32 : i32, i32
  }
  func.func @transform_4(%arg0: i32, %arg1: i32) -> (i32, i32) {
    %c0_i32 = arith.constant 0 : i32
    %c0_i32_0 = arith.constant 0 : i32
    return %arg0, %c0_i32 : i32, i32
  }
}

module attributes {stable_mosaic.version = 11 : i64} {
  func.func @_mm_stats_kernel(%arg0: i32, %arg1: i32, %arg2: memref<8x512xbf16, #tpu.memory_space<vmem>>, %arg3: memref<512x128xbf16, #tpu.memory_space<vmem>>, %arg4: memref<8x128xbf16, #tpu.memory_space<vmem>>, %arg5: memref<8x128xf32, #tpu.memory_space<vmem>>, %arg6: memref<8x128xf32, #tpu.memory_space<vmem>>, %arg7: memref<8x128xf32, #tpu.memory_space<vmem>>) attributes {dimension_semantics = [#tpu.dimension_semantics<parallel>, #tpu.dimension_semantics<arbitrary>], iteration_bounds = array<i64: 1, 1>, scalar_prefetch = 0 : i64, scratch_operands = 1 : i64, tpu.core_type = #tpu.core_type<tc>, window_params = [{transform_indices = @transform_0, window_bounds = array<i64: 8, 512>}, {transform_indices = @transform_1, window_bounds = array<i64: 512, 128>}, {transform_indices = @transform_2, window_bounds = array<i64: 8, 128>}, {transform_indices = @transform_3, window_bounds = array<i64: 8, 128>}, {transform_indices = @transform_4, window_bounds = array<i64: 8, 128>}]} {
    %c0_i32 = arith.constant 0 : i32
    %0 = arith.cmpi eq, %arg1, %c0_i32 : i32
    %1 = arith.extui %0 : i1 to i32
    %c0_i32_0 = arith.constant 0 : i32
    %2 = arith.cmpi ne, %1, %c0_i32_0 : i32
    scf.if %2 {
      %cst_10 = arith.constant 0.000000e+00 : f32
      %12 = vector.broadcast %cst_10 : f32 to vector<8x128xf32>
      %c0_11 = arith.constant 0 : index
      %c0_12 = arith.constant 0 : index
      %13 = vector.load %arg7[%c0_11, %c0_12] : memref<8x128xf32, #tpu.memory_space<vmem>>, vector<8x128xf32>
      tpu.vector_store %arg7[%c0_11, %c0_12], %12 {strides = array<i32>} : memref<8x128xf32, #tpu.memory_space<vmem>>, vector<8x128xf32>,
    } else {
    }
    %c0 = arith.constant 0 : index
    %c0_1 = arith.constant 0 : index
    %3 = vector.load %arg7[%c0, %c0_1] : memref<8x128xf32, #tpu.memory_space<vmem>>, vector<8x128xf32>
    %c0_2 = arith.constant 0 : index
    %c0_3 = arith.constant 0 : index
    %4 = vector.load %arg2[%c0_2, %c0_3] : memref<8x512xbf16, #tpu.memory_space<vmem>>, vector<8x512xbf16>
    %c0_4 = arith.constant 0 : index
    %c0_5 = arith.constant 0 : index
    %5 = vector.load %arg3[%c0_4, %c0_5] : memref<512x128xbf16, #tpu.memory_space<vmem>>, vector<512x128xbf16>
    %cst = arith.constant dense<0.000000e+00> : vector<8x128xf32>
    %6 = tpu.matmul %4, %5, %cst {dimension_numbers = #tpu.dot_dimension_numbers<[1], [0], [0], [1], [0, 0, 1, 1], [], []>} : vector<8x512xbf16>, vector<512x128xbf16>, vector<8x128xf32> -> vector<8x128xf32>
    %7 = arith.addf %3, %6 : vector<8x128xf32>
    %c0_6 = arith.constant 0 : index
    %c0_7 = arith.constant 0 : index
    %8 = vector.load %arg7[%c0_6, %c0_7] : memref<8x128xf32, #tpu.memory_space<vmem>>, vector<8x128xf32>
    tpu.vector_store %arg7[%c0_6, %c0_7], %7 {strides = array<i32>} : memref<8x128xf32, #tpu.memory_space<vmem>>, vector<8x128xf32>,
    %c0_i32_8 = arith.constant 0 : i32
    %9 = arith.cmpi eq, %arg1, %c0_i32_8 : i32
    %10 = arith.extui %9 : i1 to i32
    %c0_i32_9 = arith.constant 0 : i32
    %11 = arith.cmpi ne, %10, %c0_i32_9 : i32
    scf.if %11 {
      %c0_10 = arith.constant 0 : index
      %c0_11 = arith.constant 0 : index
      %12 = vector.load %arg7[%c0_10, %c0_11] : memref<8x128xf32, #tpu.memory_space<vmem>>, vector<8x128xf32>
      %13 = arith.truncf %12 : vector<8x128xf32> to vector<8x128xbf16>
      %c0_12 = arith.constant 0 : index
      %c0_13 = arith.constant 0 : index
      %14 = vector.load %arg4[%c0_12, %c0_13] : memref<8x128xbf16, #tpu.memory_space<vmem>>, vector<8x128xbf16>
      tpu.vector_store %arg4[%c0_12, %c0_13], %13 {strides = array<i32>} : memref<8x128xbf16, #tpu.memory_space<vmem>>, vector<8x128xbf16>,
      %cst_14 = arith.constant dense<0.000000e+00> : vector<128xf32>
      %15 = vector.multi_reduction <add>, %12, %cst_14 [0] : vector<8x128xf32> to vector<128xf32>
      %16 = vector.shape_cast %15 : vector<128xf32> to vector<1x128xf32>
      %17 = arith.mulf %12, %12 : vector<8x128xf32>
      %cst_15 = arith.constant dense<0.000000e+00> : vector<128xf32>
      %18 = vector.multi_reduction <add>, %17, %cst_15 [0] : vector<8x128xf32> to vector<128xf32>
      %19 = vector.shape_cast %18 : vector<128xf32> to vector<1x128xf32>
      %20 = vector.shape_cast %16 : vector<1x128xf32> to vector<1x128xf32>
      %21 = vector.broadcast %20 : vector<1x128xf32> to vector<8x128xf32>
      %c0_16 = arith.constant 0 : index
      %c0_17 = arith.constant 0 : index
      %22 = vector.load %arg5[%c0_16, %c0_17] : memref<8x128xf32, #tpu.memory_space<vmem>>, vector<8x128xf32>
      tpu.vector_store %arg5[%c0_16, %c0_17], %21 {strides = array<i32>} : memref<8x128xf32, #tpu.memory_space<vmem>>, vector<8x128xf32>,
      %23 = vector.shape_cast %19 : vector<1x128xf32> to vector<1x128xf32>
      %24 = vector.broadcast %23 : vector<1x128xf32> to vector<8x128xf32>
      %c0_18 = arith.constant 0 : index
      %c0_19 = arith.constant 0 : index
      %25 = vector.load %arg6[%c0_18, %c0_19] : memref<8x128xf32, #tpu.memory_space<vmem>>, vector<8x128xf32>
      tpu.vector_store %arg6[%c0_18, %c0_19], %24 {strides = array<i32>} : memref<8x128xf32, #tpu.memory_space<vmem>>, vector<8x128xf32>,
    } else {
    }
    return
  }
  func.func @transform_0(%arg0: i32, %arg1: i32) -> (i32, i32) {
    %c0_i32 = arith.constant 0 : i32
    return %arg0, %arg1 : i32, i32
  }
  func.func @transform_1(%arg0: i32, %arg1: i32) -> (i32, i32) {
    %c0_i32 = arith.constant 0 : i32
    %c0_i32_0 = arith.constant 0 : i32
    return %arg1, %c0_i32 : i32, i32
  }
  func.func @transform_2(%arg0: i32, %arg1: i32) -> (i32, i32) {
    %c0_i32 = arith.constant 0 : i32
    %c0_i32_0 = arith.constant 0 : i32
    return %arg0, %c0_i32 : i32, i32
  }
  func.func @transform_3(%arg0: i32, %arg1: i32) -> (i32, i32) {
    %c0_i32 = arith.constant 0 : i32
    %c0_i32_0 = arith.constant 0 : i32
    return %arg0, %c0_i32 : i32, i32
  }
  func.func @transform_4(%arg0: i32, %arg1: i32) -> (i32, i32) {
    %c0_i32 = arith.constant 0 : i32
    %c0_i32_0 = arith.constant 0 : i32
    return %arg0, %c0_i32 : i32, i32
  }
}

module attributes {stable_mosaic.version = 11 : i64} {
  func.func @_affine_act_kernel(%arg0: i32, %arg1: memref<8x128xbf16, #tpu.memory_space<vmem>>, %arg2: memref<1x128xf32, #tpu.memory_space<vmem>>, %arg3: memref<1x128xf32, #tpu.memory_space<vmem>>, %arg4: memref<8x128xbf16, #tpu.memory_space<vmem>>) attributes {dimension_semantics = [#tpu.dimension_semantics<parallel>], iteration_bounds = array<i64: 1>, scalar_prefetch = 0 : i64, scratch_operands = 0 : i64, tpu.core_type = #tpu.core_type<tc>, window_params = [{transform_indices = @transform_0, window_bounds = array<i64: 8, 128>}, {pipeline_mode = #tpu.pipeline_mode<synchronous>, transform_indices = @transform_1, window_bounds = array<i64: 1, 128>}, {pipeline_mode = #tpu.pipeline_mode<synchronous>, transform_indices = @transform_2, window_bounds = array<i64: 1, 128>}, {transform_indices = @transform_3, window_bounds = array<i64: 8, 128>}]} {
    %c0 = arith.constant 0 : index
    %c0_0 = arith.constant 0 : index
    %0 = vector.load %arg1[%c0, %c0_0] : memref<8x128xbf16, #tpu.memory_space<vmem>>, vector<8x128xbf16>
    %1 = arith.extf %0 : vector<8x128xbf16> to vector<8x128xf32>
    %c0_1 = arith.constant 0 : index
    %c0_2 = arith.constant 0 : index
    %2 = vector.load %arg2[%c0_1, %c0_2] : memref<1x128xf32, #tpu.memory_space<vmem>>, vector<1x128xf32>
    %3 = vector.broadcast %2 : vector<1x128xf32> to vector<8x128xf32>
    %4 = arith.mulf %1, %3 : vector<8x128xf32>
    %c0_3 = arith.constant 0 : index
    %c0_4 = arith.constant 0 : index
    %5 = vector.load %arg3[%c0_3, %c0_4] : memref<1x128xf32, #tpu.memory_space<vmem>>, vector<1x128xf32>
    %6 = vector.broadcast %5 : vector<1x128xf32> to vector<8x128xf32>
    %7 = arith.addf %4, %6 : vector<8x128xf32>
    %cst = arith.constant 0.000000e+00 : f32
    %8 = vector.broadcast %cst : f32 to vector<8x128xf32>
    %9 = arith.cmpf ogt, %7, %8 : vector<8x128xf32>
    %cst_5 = arith.constant 2.000000e-01 : f32
    %10 = vector.broadcast %cst_5 : f32 to vector<8x128xf32>
    %11 = arith.mulf %10, %7 : vector<8x128xf32>
    %12 = arith.select %9, %7, %11 : vector<8x128xi1>, vector<8x128xf32>
    %13 = arith.truncf %12 : vector<8x128xf32> to vector<8x128xbf16>
    %c0_6 = arith.constant 0 : index
    %c0_7 = arith.constant 0 : index
    %14 = vector.load %arg4[%c0_6, %c0_7] : memref<8x128xbf16, #tpu.memory_space<vmem>>, vector<8x128xbf16>
    tpu.vector_store %arg4[%c0_6, %c0_7], %13 {strides = array<i32>} : memref<8x128xbf16, #tpu.memory_space<vmem>>, vector<8x128xbf16>,
    return
  }
  func.func @transform_0(%arg0: i32) -> (i32, i32) {
    %c0_i32 = arith.constant 0 : i32
    %c0_i32_0 = arith.constant 0 : i32
    return %arg0, %c0_i32 : i32, i32
  }
  func.func @transform_1(%arg0: i32) -> (i32, i32) {
    %c0_i32 = arith.constant 0 : i32
    %c0_i32_0 = arith.constant 0 : i32
    %c0_i32_1 = arith.constant 0 : i32
    return %c0_i32, %c0_i32_0 : i32, i32
  }
  func.func @transform_2(%arg0: i32) -> (i32, i32) {
    %c0_i32 = arith.constant 0 : i32
    %c0_i32_0 = arith.constant 0 : i32
    %c0_i32_1 = arith.constant 0 : i32
    return %c0_i32, %c0_i32_0 : i32, i32
  }
  func.func @transform_3(%arg0: i32) -> (i32, i32) {
    %c0_i32 = arith.constant 0 : i32
    %c0_i32_0 = arith.constant 0 : i32
    return %arg0, %c0_i32 : i32, i32
  }
}

module attributes {stable_mosaic.version = 11 : i64} {
  func.func @_mm_stats_kernel(%arg0: i32, %arg1: i32, %arg2: memref<8x576xbf16, #tpu.memory_space<vmem>>, %arg3: memref<576x128xbf16, #tpu.memory_space<vmem>>, %arg4: memref<8x128xbf16, #tpu.memory_space<vmem>>, %arg5: memref<8x128xf32, #tpu.memory_space<vmem>>, %arg6: memref<8x128xf32, #tpu.memory_space<vmem>>, %arg7: memref<8x128xf32, #tpu.memory_space<vmem>>) attributes {dimension_semantics = [#tpu.dimension_semantics<parallel>, #tpu.dimension_semantics<arbitrary>], iteration_bounds = array<i64: 1, 1>, scalar_prefetch = 0 : i64, scratch_operands = 1 : i64, tpu.core_type = #tpu.core_type<tc>, window_params = [{transform_indices = @transform_0, window_bounds = array<i64: 8, 576>}, {transform_indices = @transform_1, window_bounds = array<i64: 576, 128>}, {transform_indices = @transform_2, window_bounds = array<i64: 8, 128>}, {transform_indices = @transform_3, window_bounds = array<i64: 8, 128>}, {transform_indices = @transform_4, window_bounds = array<i64: 8, 128>}]} {
    %c0_i32 = arith.constant 0 : i32
    %0 = arith.cmpi eq, %arg1, %c0_i32 : i32
    %1 = arith.extui %0 : i1 to i32
    %c0_i32_0 = arith.constant 0 : i32
    %2 = arith.cmpi ne, %1, %c0_i32_0 : i32
    scf.if %2 {
      %cst_10 = arith.constant 0.000000e+00 : f32
      %12 = vector.broadcast %cst_10 : f32 to vector<8x128xf32>
      %c0_11 = arith.constant 0 : index
      %c0_12 = arith.constant 0 : index
      %13 = vector.load %arg7[%c0_11, %c0_12] : memref<8x128xf32, #tpu.memory_space<vmem>>, vector<8x128xf32>
      tpu.vector_store %arg7[%c0_11, %c0_12], %12 {strides = array<i32>} : memref<8x128xf32, #tpu.memory_space<vmem>>, vector<8x128xf32>,
    } else {
    }
    %c0 = arith.constant 0 : index
    %c0_1 = arith.constant 0 : index
    %3 = vector.load %arg7[%c0, %c0_1] : memref<8x128xf32, #tpu.memory_space<vmem>>, vector<8x128xf32>
    %c0_2 = arith.constant 0 : index
    %c0_3 = arith.constant 0 : index
    %4 = vector.load %arg2[%c0_2, %c0_3] : memref<8x576xbf16, #tpu.memory_space<vmem>>, vector<8x576xbf16>
    %c0_4 = arith.constant 0 : index
    %c0_5 = arith.constant 0 : index
    %5 = vector.load %arg3[%c0_4, %c0_5] : memref<576x128xbf16, #tpu.memory_space<vmem>>, vector<576x128xbf16>
    %cst = arith.constant dense<0.000000e+00> : vector<8x128xf32>
    %6 = tpu.matmul %4, %5, %cst {dimension_numbers = #tpu.dot_dimension_numbers<[1], [0], [0], [1], [0, 0, 1, 1], [], []>} : vector<8x576xbf16>, vector<576x128xbf16>, vector<8x128xf32> -> vector<8x128xf32>
    %7 = arith.addf %3, %6 : vector<8x128xf32>
    %c0_6 = arith.constant 0 : index
    %c0_7 = arith.constant 0 : index
    %8 = vector.load %arg7[%c0_6, %c0_7] : memref<8x128xf32, #tpu.memory_space<vmem>>, vector<8x128xf32>
    tpu.vector_store %arg7[%c0_6, %c0_7], %7 {strides = array<i32>} : memref<8x128xf32, #tpu.memory_space<vmem>>, vector<8x128xf32>,
    %c0_i32_8 = arith.constant 0 : i32
    %9 = arith.cmpi eq, %arg1, %c0_i32_8 : i32
    %10 = arith.extui %9 : i1 to i32
    %c0_i32_9 = arith.constant 0 : i32
    %11 = arith.cmpi ne, %10, %c0_i32_9 : i32
    scf.if %11 {
      %c0_10 = arith.constant 0 : index
      %c0_11 = arith.constant 0 : index
      %12 = vector.load %arg7[%c0_10, %c0_11] : memref<8x128xf32, #tpu.memory_space<vmem>>, vector<8x128xf32>
      %13 = arith.truncf %12 : vector<8x128xf32> to vector<8x128xbf16>
      %c0_12 = arith.constant 0 : index
      %c0_13 = arith.constant 0 : index
      %14 = vector.load %arg4[%c0_12, %c0_13] : memref<8x128xbf16, #tpu.memory_space<vmem>>, vector<8x128xbf16>
      tpu.vector_store %arg4[%c0_12, %c0_13], %13 {strides = array<i32>} : memref<8x128xbf16, #tpu.memory_space<vmem>>, vector<8x128xbf16>,
      %cst_14 = arith.constant dense<0.000000e+00> : vector<128xf32>
      %15 = vector.multi_reduction <add>, %12, %cst_14 [0] : vector<8x128xf32> to vector<128xf32>
      %16 = vector.shape_cast %15 : vector<128xf32> to vector<1x128xf32>
      %17 = arith.mulf %12, %12 : vector<8x128xf32>
      %cst_15 = arith.constant dense<0.000000e+00> : vector<128xf32>
      %18 = vector.multi_reduction <add>, %17, %cst_15 [0] : vector<8x128xf32> to vector<128xf32>
      %19 = vector.shape_cast %18 : vector<128xf32> to vector<1x128xf32>
      %20 = vector.shape_cast %16 : vector<1x128xf32> to vector<1x128xf32>
      %21 = vector.broadcast %20 : vector<1x128xf32> to vector<8x128xf32>
      %c0_16 = arith.constant 0 : index
      %c0_17 = arith.constant 0 : index
      %22 = vector.load %arg5[%c0_16, %c0_17] : memref<8x128xf32, #tpu.memory_space<vmem>>, vector<8x128xf32>
      tpu.vector_store %arg5[%c0_16, %c0_17], %21 {strides = array<i32>} : memref<8x128xf32, #tpu.memory_space<vmem>>, vector<8x128xf32>,
      %23 = vector.shape_cast %19 : vector<1x128xf32> to vector<1x128xf32>
      %24 = vector.broadcast %23 : vector<1x128xf32> to vector<8x128xf32>
      %c0_18 = arith.constant 0 : index
      %c0_19 = arith.constant 0 : index
      %25 = vector.load %arg6[%c0_18, %c0_19] : memref<8x128xf32, #tpu.memory_space<vmem>>, vector<8x128xf32>
      tpu.vector_store %arg6[%c0_18, %c0_19], %24 {strides = array<i32>} : memref<8x128xf32, #tpu.memory_space<vmem>>, vector<8x128xf32>,
    } else {
    }
    return
  }
  func.func @transform_0(%arg0: i32, %arg1: i32) -> (i32, i32) {
    %c0_i32 = arith.constant 0 : i32
    return %arg0, %arg1 : i32, i32
  }
  func.func @transform_1(%arg0: i32, %arg1: i32) -> (i32, i32) {
    %c0_i32 = arith.constant 0 : i32
    %c0_i32_0 = arith.constant 0 : i32
    return %arg1, %c0_i32 : i32, i32
  }
  func.func @transform_2(%arg0: i32, %arg1: i32) -> (i32, i32) {
    %c0_i32 = arith.constant 0 : i32
    %c0_i32_0 = arith.constant 0 : i32
    return %arg0, %c0_i32 : i32, i32
  }
  func.func @transform_3(%arg0: i32, %arg1: i32) -> (i32, i32) {
    %c0_i32 = arith.constant 0 : i32
    %c0_i32_0 = arith.constant 0 : i32
    return %arg0, %c0_i32 : i32, i32
  }
  func.func @transform_4(%arg0: i32, %arg1: i32) -> (i32, i32) {
    %c0_i32 = arith.constant 0 : i32
    %c0_i32_0 = arith.constant 0 : i32
    return %arg0, %c0_i32 : i32, i32
  }
}

module attributes {stable_mosaic.version = 11 : i64} {
  func.func @_affine_act_kernel(%arg0: i32, %arg1: memref<8x128xbf16, #tpu.memory_space<vmem>>, %arg2: memref<1x128xf32, #tpu.memory_space<vmem>>, %arg3: memref<1x128xf32, #tpu.memory_space<vmem>>, %arg4: memref<8x128xbf16, #tpu.memory_space<vmem>>) attributes {dimension_semantics = [#tpu.dimension_semantics<parallel>], iteration_bounds = array<i64: 1>, scalar_prefetch = 0 : i64, scratch_operands = 0 : i64, tpu.core_type = #tpu.core_type<tc>, window_params = [{transform_indices = @transform_0, window_bounds = array<i64: 8, 128>}, {pipeline_mode = #tpu.pipeline_mode<synchronous>, transform_indices = @transform_1, window_bounds = array<i64: 1, 128>}, {pipeline_mode = #tpu.pipeline_mode<synchronous>, transform_indices = @transform_2, window_bounds = array<i64: 1, 128>}, {transform_indices = @transform_3, window_bounds = array<i64: 8, 128>}]} {
    %c0 = arith.constant 0 : index
    %c0_0 = arith.constant 0 : index
    %0 = vector.load %arg1[%c0, %c0_0] : memref<8x128xbf16, #tpu.memory_space<vmem>>, vector<8x128xbf16>
    %1 = arith.extf %0 : vector<8x128xbf16> to vector<8x128xf32>
    %c0_1 = arith.constant 0 : index
    %c0_2 = arith.constant 0 : index
    %2 = vector.load %arg2[%c0_1, %c0_2] : memref<1x128xf32, #tpu.memory_space<vmem>>, vector<1x128xf32>
    %3 = vector.broadcast %2 : vector<1x128xf32> to vector<8x128xf32>
    %4 = arith.mulf %1, %3 : vector<8x128xf32>
    %c0_3 = arith.constant 0 : index
    %c0_4 = arith.constant 0 : index
    %5 = vector.load %arg3[%c0_3, %c0_4] : memref<1x128xf32, #tpu.memory_space<vmem>>, vector<1x128xf32>
    %6 = vector.broadcast %5 : vector<1x128xf32> to vector<8x128xf32>
    %7 = arith.addf %4, %6 : vector<8x128xf32>
    %cst = arith.constant 0.000000e+00 : f32
    %8 = vector.broadcast %cst : f32 to vector<8x128xf32>
    %9 = arith.maximumf %7, %8 : vector<8x128xf32>
    %10 = arith.truncf %9 : vector<8x128xf32> to vector<8x128xbf16>
    %c0_5 = arith.constant 0 : index
    %c0_6 = arith.constant 0 : index
    %11 = vector.load %arg4[%c0_5, %c0_6] : memref<8x128xbf16, #tpu.memory_space<vmem>>, vector<8x128xbf16>
    tpu.vector_store %arg4[%c0_5, %c0_6], %10 {strides = array<i32>} : memref<8x128xbf16, #tpu.memory_space<vmem>>, vector<8x128xbf16>,
    return
  }
  func.func @transform_0(%arg0: i32) -> (i32, i32) {
    %c0_i32 = arith.constant 0 : i32
    %c0_i32_0 = arith.constant 0 : i32
    return %arg0, %c0_i32 : i32, i32
  }
  func.func @transform_1(%arg0: i32) -> (i32, i32) {
    %c0_i32 = arith.constant 0 : i32
    %c0_i32_0 = arith.constant 0 : i32
    %c0_i32_1 = arith.constant 0 : i32
    return %c0_i32, %c0_i32_0 : i32, i32
  }
  func.func @transform_2(%arg0: i32) -> (i32, i32) {
    %c0_i32 = arith.constant 0 : i32
    %c0_i32_0 = arith.constant 0 : i32
    %c0_i32_1 = arith.constant 0 : i32
    return %c0_i32, %c0_i32_0 : i32, i32
  }
  func.func @transform_3(%arg0: i32) -> (i32, i32) {
    %c0_i32 = arith.constant 0 : i32
    %c0_i32_0 = arith.constant 0 : i32
    return %arg0, %c0_i32 : i32, i32
  }
}

module attributes {stable_mosaic.version = 11 : i64} {
  func.func @_mm_stats_kernel(%arg0: i32, %arg1: i32, %arg2: memref<32x288xbf16, #tpu.memory_space<vmem>>, %arg3: memref<288x128xbf16, #tpu.memory_space<vmem>>, %arg4: memref<32x128xbf16, #tpu.memory_space<vmem>>, %arg5: memref<8x128xf32, #tpu.memory_space<vmem>>, %arg6: memref<8x128xf32, #tpu.memory_space<vmem>>, %arg7: memref<32x128xf32, #tpu.memory_space<vmem>>) attributes {dimension_semantics = [#tpu.dimension_semantics<parallel>, #tpu.dimension_semantics<arbitrary>], iteration_bounds = array<i64: 1, 1>, scalar_prefetch = 0 : i64, scratch_operands = 1 : i64, tpu.core_type = #tpu.core_type<tc>, window_params = [{transform_indices = @transform_0, window_bounds = array<i64: 32, 288>}, {transform_indices = @transform_1, window_bounds = array<i64: 288, 128>}, {transform_indices = @transform_2, window_bounds = array<i64: 32, 128>}, {transform_indices = @transform_3, window_bounds = array<i64: 8, 128>}, {transform_indices = @transform_4, window_bounds = array<i64: 8, 128>}]} {
    %c0_i32 = arith.constant 0 : i32
    %0 = arith.cmpi eq, %arg1, %c0_i32 : i32
    %1 = arith.extui %0 : i1 to i32
    %c0_i32_0 = arith.constant 0 : i32
    %2 = arith.cmpi ne, %1, %c0_i32_0 : i32
    scf.if %2 {
      %cst_10 = arith.constant 0.000000e+00 : f32
      %12 = vector.broadcast %cst_10 : f32 to vector<32x128xf32>
      %c0_11 = arith.constant 0 : index
      %c0_12 = arith.constant 0 : index
      %13 = vector.load %arg7[%c0_11, %c0_12] : memref<32x128xf32, #tpu.memory_space<vmem>>, vector<32x128xf32>
      tpu.vector_store %arg7[%c0_11, %c0_12], %12 {strides = array<i32>} : memref<32x128xf32, #tpu.memory_space<vmem>>, vector<32x128xf32>,
    } else {
    }
    %c0 = arith.constant 0 : index
    %c0_1 = arith.constant 0 : index
    %3 = vector.load %arg7[%c0, %c0_1] : memref<32x128xf32, #tpu.memory_space<vmem>>, vector<32x128xf32>
    %c0_2 = arith.constant 0 : index
    %c0_3 = arith.constant 0 : index
    %4 = vector.load %arg2[%c0_2, %c0_3] : memref<32x288xbf16, #tpu.memory_space<vmem>>, vector<32x288xbf16>
    %c0_4 = arith.constant 0 : index
    %c0_5 = arith.constant 0 : index
    %5 = vector.load %arg3[%c0_4, %c0_5] : memref<288x128xbf16, #tpu.memory_space<vmem>>, vector<288x128xbf16>
    %cst = arith.constant dense<0.000000e+00> : vector<32x128xf32>
    %6 = tpu.matmul %4, %5, %cst {dimension_numbers = #tpu.dot_dimension_numbers<[1], [0], [0], [1], [0, 0, 1, 1], [], []>} : vector<32x288xbf16>, vector<288x128xbf16>, vector<32x128xf32> -> vector<32x128xf32>
    %7 = arith.addf %3, %6 : vector<32x128xf32>
    %c0_6 = arith.constant 0 : index
    %c0_7 = arith.constant 0 : index
    %8 = vector.load %arg7[%c0_6, %c0_7] : memref<32x128xf32, #tpu.memory_space<vmem>>, vector<32x128xf32>
    tpu.vector_store %arg7[%c0_6, %c0_7], %7 {strides = array<i32>} : memref<32x128xf32, #tpu.memory_space<vmem>>, vector<32x128xf32>,
    %c0_i32_8 = arith.constant 0 : i32
    %9 = arith.cmpi eq, %arg1, %c0_i32_8 : i32
    %10 = arith.extui %9 : i1 to i32
    %c0_i32_9 = arith.constant 0 : i32
    %11 = arith.cmpi ne, %10, %c0_i32_9 : i32
    scf.if %11 {
      %c0_10 = arith.constant 0 : index
      %c0_11 = arith.constant 0 : index
      %12 = vector.load %arg7[%c0_10, %c0_11] : memref<32x128xf32, #tpu.memory_space<vmem>>, vector<32x128xf32>
      %13 = arith.truncf %12 : vector<32x128xf32> to vector<32x128xbf16>
      %c0_12 = arith.constant 0 : index
      %c0_13 = arith.constant 0 : index
      %14 = vector.load %arg4[%c0_12, %c0_13] : memref<32x128xbf16, #tpu.memory_space<vmem>>, vector<32x128xbf16>
      tpu.vector_store %arg4[%c0_12, %c0_13], %13 {strides = array<i32>} : memref<32x128xbf16, #tpu.memory_space<vmem>>, vector<32x128xbf16>,
      %cst_14 = arith.constant dense<0.000000e+00> : vector<128xf32>
      %15 = vector.multi_reduction <add>, %12, %cst_14 [0] : vector<32x128xf32> to vector<128xf32>
      %16 = vector.shape_cast %15 : vector<128xf32> to vector<1x128xf32>
      %17 = arith.mulf %12, %12 : vector<32x128xf32>
      %cst_15 = arith.constant dense<0.000000e+00> : vector<128xf32>
      %18 = vector.multi_reduction <add>, %17, %cst_15 [0] : vector<32x128xf32> to vector<128xf32>
      %19 = vector.shape_cast %18 : vector<128xf32> to vector<1x128xf32>
      %20 = vector.shape_cast %16 : vector<1x128xf32> to vector<1x128xf32>
      %21 = vector.broadcast %20 : vector<1x128xf32> to vector<8x128xf32>
      %c0_16 = arith.constant 0 : index
      %c0_17 = arith.constant 0 : index
      %22 = vector.load %arg5[%c0_16, %c0_17] : memref<8x128xf32, #tpu.memory_space<vmem>>, vector<8x128xf32>
      tpu.vector_store %arg5[%c0_16, %c0_17], %21 {strides = array<i32>} : memref<8x128xf32, #tpu.memory_space<vmem>>, vector<8x128xf32>,
      %23 = vector.shape_cast %19 : vector<1x128xf32> to vector<1x128xf32>
      %24 = vector.broadcast %23 : vector<1x128xf32> to vector<8x128xf32>
      %c0_18 = arith.constant 0 : index
      %c0_19 = arith.constant 0 : index
      %25 = vector.load %arg6[%c0_18, %c0_19] : memref<8x128xf32, #tpu.memory_space<vmem>>, vector<8x128xf32>
      tpu.vector_store %arg6[%c0_18, %c0_19], %24 {strides = array<i32>} : memref<8x128xf32, #tpu.memory_space<vmem>>, vector<8x128xf32>,
    } else {
    }
    return
  }
  func.func @transform_0(%arg0: i32, %arg1: i32) -> (i32, i32) {
    %c0_i32 = arith.constant 0 : i32
    return %arg0, %arg1 : i32, i32
  }
  func.func @transform_1(%arg0: i32, %arg1: i32) -> (i32, i32) {
    %c0_i32 = arith.constant 0 : i32
    %c0_i32_0 = arith.constant 0 : i32
    return %arg1, %c0_i32 : i32, i32
  }
  func.func @transform_2(%arg0: i32, %arg1: i32) -> (i32, i32) {
    %c0_i32 = arith.constant 0 : i32
    %c0_i32_0 = arith.constant 0 : i32
    return %arg0, %c0_i32 : i32, i32
  }
  func.func @transform_3(%arg0: i32, %arg1: i32) -> (i32, i32) {
    %c0_i32 = arith.constant 0 : i32
    %c0_i32_0 = arith.constant 0 : i32
    return %arg0, %c0_i32 : i32, i32
  }
  func.func @transform_4(%arg0: i32, %arg1: i32) -> (i32, i32) {
    %c0_i32 = arith.constant 0 : i32
    %c0_i32_0 = arith.constant 0 : i32
    return %arg0, %c0_i32 : i32, i32
  }
}

module attributes {stable_mosaic.version = 11 : i64} {
  func.func @_affine_act_kernel(%arg0: i32, %arg1: memref<32x128xbf16, #tpu.memory_space<vmem>>, %arg2: memref<1x128xf32, #tpu.memory_space<vmem>>, %arg3: memref<1x128xf32, #tpu.memory_space<vmem>>, %arg4: memref<32x128xbf16, #tpu.memory_space<vmem>>) attributes {dimension_semantics = [#tpu.dimension_semantics<parallel>], iteration_bounds = array<i64: 1>, scalar_prefetch = 0 : i64, scratch_operands = 0 : i64, tpu.core_type = #tpu.core_type<tc>, window_params = [{transform_indices = @transform_0, window_bounds = array<i64: 32, 128>}, {pipeline_mode = #tpu.pipeline_mode<synchronous>, transform_indices = @transform_1, window_bounds = array<i64: 1, 128>}, {pipeline_mode = #tpu.pipeline_mode<synchronous>, transform_indices = @transform_2, window_bounds = array<i64: 1, 128>}, {transform_indices = @transform_3, window_bounds = array<i64: 32, 128>}]} {
    %c0 = arith.constant 0 : index
    %c0_0 = arith.constant 0 : index
    %0 = vector.load %arg1[%c0, %c0_0] : memref<32x128xbf16, #tpu.memory_space<vmem>>, vector<32x128xbf16>
    %1 = arith.extf %0 : vector<32x128xbf16> to vector<32x128xf32>
    %c0_1 = arith.constant 0 : index
    %c0_2 = arith.constant 0 : index
    %2 = vector.load %arg2[%c0_1, %c0_2] : memref<1x128xf32, #tpu.memory_space<vmem>>, vector<1x128xf32>
    %3 = vector.broadcast %2 : vector<1x128xf32> to vector<32x128xf32>
    %4 = arith.mulf %1, %3 : vector<32x128xf32>
    %c0_3 = arith.constant 0 : index
    %c0_4 = arith.constant 0 : index
    %5 = vector.load %arg3[%c0_3, %c0_4] : memref<1x128xf32, #tpu.memory_space<vmem>>, vector<1x128xf32>
    %6 = vector.broadcast %5 : vector<1x128xf32> to vector<32x128xf32>
    %7 = arith.addf %4, %6 : vector<32x128xf32>
    %cst = arith.constant 0.000000e+00 : f32
    %8 = vector.broadcast %cst : f32 to vector<32x128xf32>
    %9 = arith.maximumf %7, %8 : vector<32x128xf32>
    %10 = arith.truncf %9 : vector<32x128xf32> to vector<32x128xbf16>
    %c0_5 = arith.constant 0 : index
    %c0_6 = arith.constant 0 : index
    %11 = vector.load %arg4[%c0_5, %c0_6] : memref<32x128xbf16, #tpu.memory_space<vmem>>, vector<32x128xbf16>
    tpu.vector_store %arg4[%c0_5, %c0_6], %10 {strides = array<i32>} : memref<32x128xbf16, #tpu.memory_space<vmem>>, vector<32x128xbf16>,
    return
  }
  func.func @transform_0(%arg0: i32) -> (i32, i32) {
    %c0_i32 = arith.constant 0 : i32
    %c0_i32_0 = arith.constant 0 : i32
    return %arg0, %c0_i32 : i32, i32
  }
  func.func @transform_1(%arg0: i32) -> (i32, i32) {
    %c0_i32 = arith.constant 0 : i32
    %c0_i32_0 = arith.constant 0 : i32
    %c0_i32_1 = arith.constant 0 : i32
    return %c0_i32, %c0_i32_0 : i32, i32
  }
  func.func @transform_2(%arg0: i32) -> (i32, i32) {
    %c0_i32 = arith.constant 0 : i32
    %c0_i32_0 = arith.constant 0 : i32
    %c0_i32_1 = arith.constant 0 : i32
    return %c0_i32, %c0_i32_0 : i32, i32
  }
  func.func @transform_3(%arg0: i32) -> (i32, i32) {
    %c0_i32 = arith.constant 0 : i32
    %c0_i32_0 = arith.constant 0 : i32
    return %arg0, %c0_i32 : i32, i32
  }
}

module attributes {stable_mosaic.version = 11 : i64} {
  func.func @_mm_stats_kernel(%arg0: i32, %arg1: i32, %arg2: memref<128x144xbf16, #tpu.memory_space<vmem>>, %arg3: memref<144x128xbf16, #tpu.memory_space<vmem>>, %arg4: memref<128x128xbf16, #tpu.memory_space<vmem>>, %arg5: memref<8x128xf32, #tpu.memory_space<vmem>>, %arg6: memref<8x128xf32, #tpu.memory_space<vmem>>, %arg7: memref<128x128xf32, #tpu.memory_space<vmem>>) attributes {dimension_semantics = [#tpu.dimension_semantics<parallel>, #tpu.dimension_semantics<arbitrary>], iteration_bounds = array<i64: 1, 1>, scalar_prefetch = 0 : i64, scratch_operands = 1 : i64, tpu.core_type = #tpu.core_type<tc>, window_params = [{transform_indices = @transform_0, window_bounds = array<i64: 128, 144>}, {transform_indices = @transform_1, window_bounds = array<i64: 144, 128>}, {transform_indices = @transform_2, window_bounds = array<i64: 128, 128>}, {transform_indices = @transform_3, window_bounds = array<i64: 8, 128>}, {transform_indices = @transform_4, window_bounds = array<i64: 8, 128>}]} {
    %c0_i32 = arith.constant 0 : i32
    %0 = arith.cmpi eq, %arg1, %c0_i32 : i32
    %1 = arith.extui %0 : i1 to i32
    %c0_i32_0 = arith.constant 0 : i32
    %2 = arith.cmpi ne, %1, %c0_i32_0 : i32
    scf.if %2 {
      %cst_10 = arith.constant 0.000000e+00 : f32
      %12 = vector.broadcast %cst_10 : f32 to vector<128x128xf32>
      %c0_11 = arith.constant 0 : index
      %c0_12 = arith.constant 0 : index
      %13 = vector.load %arg7[%c0_11, %c0_12] : memref<128x128xf32, #tpu.memory_space<vmem>>, vector<128x128xf32>
      tpu.vector_store %arg7[%c0_11, %c0_12], %12 {strides = array<i32>} : memref<128x128xf32, #tpu.memory_space<vmem>>, vector<128x128xf32>,
    } else {
    }
    %c0 = arith.constant 0 : index
    %c0_1 = arith.constant 0 : index
    %3 = vector.load %arg7[%c0, %c0_1] : memref<128x128xf32, #tpu.memory_space<vmem>>, vector<128x128xf32>
    %c0_2 = arith.constant 0 : index
    %c0_3 = arith.constant 0 : index
    %4 = vector.load %arg2[%c0_2, %c0_3] : memref<128x144xbf16, #tpu.memory_space<vmem>>, vector<128x144xbf16>
    %c0_4 = arith.constant 0 : index
    %c0_5 = arith.constant 0 : index
    %5 = vector.load %arg3[%c0_4, %c0_5] : memref<144x128xbf16, #tpu.memory_space<vmem>>, vector<144x128xbf16>
    %cst = arith.constant dense<0.000000e+00> : vector<128x128xf32>
    %6 = tpu.matmul %4, %5, %cst {dimension_numbers = #tpu.dot_dimension_numbers<[1], [0], [0], [1], [0, 0, 1, 1], [], []>} : vector<128x144xbf16>, vector<144x128xbf16>, vector<128x128xf32> -> vector<128x128xf32>
    %7 = arith.addf %3, %6 : vector<128x128xf32>
    %c0_6 = arith.constant 0 : index
    %c0_7 = arith.constant 0 : index
    %8 = vector.load %arg7[%c0_6, %c0_7] : memref<128x128xf32, #tpu.memory_space<vmem>>, vector<128x128xf32>
    tpu.vector_store %arg7[%c0_6, %c0_7], %7 {strides = array<i32>} : memref<128x128xf32, #tpu.memory_space<vmem>>, vector<128x128xf32>,
    %c0_i32_8 = arith.constant 0 : i32
    %9 = arith.cmpi eq, %arg1, %c0_i32_8 : i32
    %10 = arith.extui %9 : i1 to i32
    %c0_i32_9 = arith.constant 0 : i32
    %11 = arith.cmpi ne, %10, %c0_i32_9 : i32
    scf.if %11 {
      %c0_10 = arith.constant 0 : index
      %c0_11 = arith.constant 0 : index
      %12 = vector.load %arg7[%c0_10, %c0_11] : memref<128x128xf32, #tpu.memory_space<vmem>>, vector<128x128xf32>
      %13 = arith.truncf %12 : vector<128x128xf32> to vector<128x128xbf16>
      %c0_12 = arith.constant 0 : index
      %c0_13 = arith.constant 0 : index
      %14 = vector.load %arg4[%c0_12, %c0_13] : memref<128x128xbf16, #tpu.memory_space<vmem>>, vector<128x128xbf16>
      tpu.vector_store %arg4[%c0_12, %c0_13], %13 {strides = array<i32>} : memref<128x128xbf16, #tpu.memory_space<vmem>>, vector<128x128xbf16>,
      %cst_14 = arith.constant dense<0.000000e+00> : vector<128xf32>
      %15 = vector.multi_reduction <add>, %12, %cst_14 [0] : vector<128x128xf32> to vector<128xf32>
      %16 = vector.shape_cast %15 : vector<128xf32> to vector<1x128xf32>
      %17 = arith.mulf %12, %12 : vector<128x128xf32>
      %cst_15 = arith.constant dense<0.000000e+00> : vector<128xf32>
      %18 = vector.multi_reduction <add>, %17, %cst_15 [0] : vector<128x128xf32> to vector<128xf32>
      %19 = vector.shape_cast %18 : vector<128xf32> to vector<1x128xf32>
      %20 = vector.shape_cast %16 : vector<1x128xf32> to vector<1x128xf32>
      %21 = vector.broadcast %20 : vector<1x128xf32> to vector<8x128xf32>
      %c0_16 = arith.constant 0 : index
      %c0_17 = arith.constant 0 : index
      %22 = vector.load %arg5[%c0_16, %c0_17] : memref<8x128xf32, #tpu.memory_space<vmem>>, vector<8x128xf32>
      tpu.vector_store %arg5[%c0_16, %c0_17], %21 {strides = array<i32>} : memref<8x128xf32, #tpu.memory_space<vmem>>, vector<8x128xf32>,
      %23 = vector.shape_cast %19 : vector<1x128xf32> to vector<1x128xf32>
      %24 = vector.broadcast %23 : vector<1x128xf32> to vector<8x128xf32>
      %c0_18 = arith.constant 0 : index
      %c0_19 = arith.constant 0 : index
      %25 = vector.load %arg6[%c0_18, %c0_19] : memref<8x128xf32, #tpu.memory_space<vmem>>, vector<8x128xf32>
      tpu.vector_store %arg6[%c0_18, %c0_19], %24 {strides = array<i32>} : memref<8x128xf32, #tpu.memory_space<vmem>>, vector<8x128xf32>,
    } else {
    }
    return
  }
  func.func @transform_0(%arg0: i32, %arg1: i32) -> (i32, i32) {
    %c0_i32 = arith.constant 0 : i32
    return %arg0, %arg1 : i32, i32
  }
  func.func @transform_1(%arg0: i32, %arg1: i32) -> (i32, i32) {
    %c0_i32 = arith.constant 0 : i32
    %c0_i32_0 = arith.constant 0 : i32
    return %arg1, %c0_i32 : i32, i32
  }
  func.func @transform_2(%arg0: i32, %arg1: i32) -> (i32, i32) {
    %c0_i32 = arith.constant 0 : i32
    %c0_i32_0 = arith.constant 0 : i32
    return %arg0, %c0_i32 : i32, i32
  }
  func.func @transform_3(%arg0: i32, %arg1: i32) -> (i32, i32) {
    %c0_i32 = arith.constant 0 : i32
    %c0_i32_0 = arith.constant 0 : i32
    return %arg0, %c0_i32 : i32, i32
  }
  func.func @transform_4(%arg0: i32, %arg1: i32) -> (i32, i32) {
    %c0_i32 = arith.constant 0 : i32
    %c0_i32_0 = arith.constant 0 : i32
    return %arg0, %c0_i32 : i32, i32
  }
}

module attributes {stable_mosaic.version = 11 : i64} {
  func.func @_affine_act_kernel(%arg0: i32, %arg1: memref<128x128xbf16, #tpu.memory_space<vmem>>, %arg2: memref<1x128xf32, #tpu.memory_space<vmem>>, %arg3: memref<1x128xf32, #tpu.memory_space<vmem>>, %arg4: memref<128x128xbf16, #tpu.memory_space<vmem>>) attributes {dimension_semantics = [#tpu.dimension_semantics<parallel>], iteration_bounds = array<i64: 1>, scalar_prefetch = 0 : i64, scratch_operands = 0 : i64, tpu.core_type = #tpu.core_type<tc>, window_params = [{transform_indices = @transform_0, window_bounds = array<i64: 128, 128>}, {pipeline_mode = #tpu.pipeline_mode<synchronous>, transform_indices = @transform_1, window_bounds = array<i64: 1, 128>}, {pipeline_mode = #tpu.pipeline_mode<synchronous>, transform_indices = @transform_2, window_bounds = array<i64: 1, 128>}, {transform_indices = @transform_3, window_bounds = array<i64: 128, 128>}]} {
    %c0 = arith.constant 0 : index
    %c0_0 = arith.constant 0 : index
    %0 = vector.load %arg1[%c0, %c0_0] : memref<128x128xbf16, #tpu.memory_space<vmem>>, vector<128x128xbf16>
    %1 = arith.extf %0 : vector<128x128xbf16> to vector<128x128xf32>
    %c0_1 = arith.constant 0 : index
    %c0_2 = arith.constant 0 : index
    %2 = vector.load %arg2[%c0_1, %c0_2] : memref<1x128xf32, #tpu.memory_space<vmem>>, vector<1x128xf32>
    %3 = vector.broadcast %2 : vector<1x128xf32> to vector<128x128xf32>
    %4 = arith.mulf %1, %3 : vector<128x128xf32>
    %c0_3 = arith.constant 0 : index
    %c0_4 = arith.constant 0 : index
    %5 = vector.load %arg3[%c0_3, %c0_4] : memref<1x128xf32, #tpu.memory_space<vmem>>, vector<1x128xf32>
    %6 = vector.broadcast %5 : vector<1x128xf32> to vector<128x128xf32>
    %7 = arith.addf %4, %6 : vector<128x128xf32>
    %cst = arith.constant 0.000000e+00 : f32
    %8 = vector.broadcast %cst : f32 to vector<128x128xf32>
    %9 = arith.maximumf %7, %8 : vector<128x128xf32>
    %10 = arith.truncf %9 : vector<128x128xf32> to vector<128x128xbf16>
    %c0_5 = arith.constant 0 : index
    %c0_6 = arith.constant 0 : index
    %11 = vector.load %arg4[%c0_5, %c0_6] : memref<128x128xbf16, #tpu.memory_space<vmem>>, vector<128x128xbf16>
    tpu.vector_store %arg4[%c0_5, %c0_6], %10 {strides = array<i32>} : memref<128x128xbf16, #tpu.memory_space<vmem>>, vector<128x128xbf16>,
    return
  }
  func.func @transform_0(%arg0: i32) -> (i32, i32) {
    %c0_i32 = arith.constant 0 : i32
    %c0_i32_0 = arith.constant 0 : i32
    return %arg0, %c0_i32 : i32, i32
  }
  func.func @transform_1(%arg0: i32) -> (i32, i32) {
    %c0_i32 = arith.constant 0 : i32
    %c0_i32_0 = arith.constant 0 : i32
    %c0_i32_1 = arith.constant 0 : i32
    return %c0_i32, %c0_i32_0 : i32, i32
  }
  func.func @transform_2(%arg0: i32) -> (i32, i32) {
    %c0_i32 = arith.constant 0 : i32
    %c0_i32_0 = arith.constant 0 : i32
    %c0_i32_1 = arith.constant 0 : i32
    return %c0_i32, %c0_i32_0 : i32, i32
  }
  func.func @transform_3(%arg0: i32) -> (i32, i32) {
    %c0_i32 = arith.constant 0 : i32
    %c0_i32_0 = arith.constant 0 : i32
    return %arg0, %c0_i32 : i32, i32
  }
}

module attributes {stable_mosaic.version = 11 : i64} {
  func.func @_mm_act_kernel(%arg0: i32, %arg1: i32, %arg2: memref<256x72xbf16, #tpu.memory_space<vmem>>, %arg3: memref<72x128xbf16, #tpu.memory_space<vmem>>, %arg4: memref<256x128xf32, #tpu.memory_space<vmem>>, %arg5: memref<256x128xf32, #tpu.memory_space<vmem>>) attributes {dimension_semantics = [#tpu.dimension_semantics<parallel>, #tpu.dimension_semantics<arbitrary>], iteration_bounds = array<i64: 2, 1>, scalar_prefetch = 0 : i64, scratch_operands = 1 : i64, tpu.core_type = #tpu.core_type<tc>, window_params = [{transform_indices = @transform_0, window_bounds = array<i64: 256, 72>}, {transform_indices = @transform_1, window_bounds = array<i64: 72, 128>}, {transform_indices = @transform_2, window_bounds = array<i64: 256, 128>}]} {
    %c0_i32 = arith.constant 0 : i32
    %0 = arith.cmpi eq, %arg1, %c0_i32 : i32
    %1 = arith.extui %0 : i1 to i32
    %c0_i32_0 = arith.constant 0 : i32
    %2 = arith.cmpi ne, %1, %c0_i32_0 : i32
    scf.if %2 {
      %cst_10 = arith.constant 0.000000e+00 : f32
      %12 = vector.broadcast %cst_10 : f32 to vector<256x128xf32>
      %c0_11 = arith.constant 0 : index
      %c0_12 = arith.constant 0 : index
      %13 = vector.load %arg5[%c0_11, %c0_12] : memref<256x128xf32, #tpu.memory_space<vmem>>, vector<256x128xf32>
      tpu.vector_store %arg5[%c0_11, %c0_12], %12 {strides = array<i32>} : memref<256x128xf32, #tpu.memory_space<vmem>>, vector<256x128xf32>,
    } else {
    }
    %c0 = arith.constant 0 : index
    %c0_1 = arith.constant 0 : index
    %3 = vector.load %arg5[%c0, %c0_1] : memref<256x128xf32, #tpu.memory_space<vmem>>, vector<256x128xf32>
    %c0_2 = arith.constant 0 : index
    %c0_3 = arith.constant 0 : index
    %4 = vector.load %arg2[%c0_2, %c0_3] : memref<256x72xbf16, #tpu.memory_space<vmem>>, vector<256x72xbf16>
    %c0_4 = arith.constant 0 : index
    %c0_5 = arith.constant 0 : index
    %5 = vector.load %arg3[%c0_4, %c0_5] : memref<72x128xbf16, #tpu.memory_space<vmem>>, vector<72x128xbf16>
    %cst = arith.constant dense<0.000000e+00> : vector<256x128xf32>
    %6 = tpu.matmul %4, %5, %cst {dimension_numbers = #tpu.dot_dimension_numbers<[1], [0], [0], [1], [0, 0, 1, 1], [], []>} : vector<256x72xbf16>, vector<72x128xbf16>, vector<256x128xf32> -> vector<256x128xf32>
    %7 = arith.addf %3, %6 : vector<256x128xf32>
    %c0_6 = arith.constant 0 : index
    %c0_7 = arith.constant 0 : index
    %8 = vector.load %arg5[%c0_6, %c0_7] : memref<256x128xf32, #tpu.memory_space<vmem>>, vector<256x128xf32>
    tpu.vector_store %arg5[%c0_6, %c0_7], %7 {strides = array<i32>} : memref<256x128xf32, #tpu.memory_space<vmem>>, vector<256x128xf32>,
    %c0_i32_8 = arith.constant 0 : i32
    %9 = arith.cmpi eq, %arg1, %c0_i32_8 : i32
    %10 = arith.extui %9 : i1 to i32
    %c0_i32_9 = arith.constant 0 : i32
    %11 = arith.cmpi ne, %10, %c0_i32_9 : i32
    scf.if %11 {
      %c0_10 = arith.constant 0 : index
      %c0_11 = arith.constant 0 : index
      %12 = vector.load %arg5[%c0_10, %c0_11] : memref<256x128xf32, #tpu.memory_space<vmem>>, vector<256x128xf32>
      %13 = math.tanh %12 : vector<256x128xf32>
      %c0_12 = arith.constant 0 : index
      %c0_13 = arith.constant 0 : index
      %14 = vector.load %arg4[%c0_12, %c0_13] : memref<256x128xf32, #tpu.memory_space<vmem>>, vector<256x128xf32>
      tpu.vector_store %arg4[%c0_12, %c0_13], %13 {strides = array<i32>} : memref<256x128xf32, #tpu.memory_space<vmem>>, vector<256x128xf32>,
    } else {
    }
    return
  }
  func.func @transform_0(%arg0: i32, %arg1: i32) -> (i32, i32) {
    %c0_i32 = arith.constant 0 : i32
    return %arg0, %arg1 : i32, i32
  }
  func.func @transform_1(%arg0: i32, %arg1: i32) -> (i32, i32) {
    %c0_i32 = arith.constant 0 : i32
    %c0_i32_0 = arith.constant 0 : i32
    return %arg1, %c0_i32 : i32, i32
  }
  func.func @transform_2(%arg0: i32, %arg1: i32) -> (i32, i32) {
    %c0_i32 = arith.constant 0 : i32
    %c0_i32_0 = arith.constant 0 : i32
    return %arg0, %c0_i32 : i32, i32
  }
}

</mosaic_0001>

<bundles_post_ra>
// kernel: generator_forward.14
= control target key start
LH: loop header
LB: loop body
LE: loop exit
PB: predicated region body
PF: predicated region fallthrough
CT: control target
= control target key end

     0   :  { %s1167_s9 = smov 0   ;;  %s1169_s10 = smov 0   ;;  %s1268_s0 = inlined_call_operand.vmem [shape: bf16[512,48], index: 0, kind: input, shape index: {}]   ;;  %s1269_s1 = inlined_call_operand.vmem [shape: bf16[48,128], index: 1, kind: input, shape index: {}]   ;;  %s1270_s2 = inlined_call_operand.vmem [shape: bf16[512,128], index: 2, kind: output, shape index: {}]  }
   0x1   :  { %s1171_s11 = smov 0  }
   0x2 LB: > { %s24_s12 = sadd.s32 1, %s1146_s10  ;;  %p882_p0 = scmp.ge.s32.totalorder %s1150_s11, 1  ;;  %s1150_s11 = sphi %s1171_s11, %s12_s11   ;;  %s1146_s10 = sphi %s1169_s10, %s1272_s10   ;;  %s1142_s9 = sphi %s1167_s9, %s1271_s9  }
   0x3   : > { %p26_p1 = scmp.ge.s32.totalorder %s24_s12, 2  ;;  %p141_p2 = scmp.lt.s32.totalorder %s1150_s11, 3 }
   0x5   : > { %s1274_s12 = smov (%p26_p1, %s24_s12), 0  ;;  %p142_p3 = pnand %p882_p0, %p141_p2 }
   0x6   : > { %s883_s15 = sshll.u32 (!%p142_p3), %s1142_s9, 5 }
   0x7   : > { %145 = sbr.rel (%p142_p3) target bundleno = 220 (0xdc), region = 28  ;;  %p172_p4 = scmp.lt.s32.totalorder (!%p142_p3), %s883_s15, 63 }
   0xc   : > { %v999_v0 = vld [vmem:[%s1269_s1 + $0x10] sm:$0xff]  ;;  %v998_v1 = vld [vmem:[%s1269_s1 + $0x8] sm:$0xff]  ;;  %s1276_s15 = smov (!%p172_p4, %s883_s15), 63  ;;  %v997_v2 = vld [vmem:[%s1269_s1] sm:$0xff]  ;;  %vm397_vm0 = vcmask 392192  }
   0xd   : > { %451 = vmatpush.bf16.msra.mxu0 %v999_v0  ;;  %1095 = vmatpush.bf16.msra.mxu1 %v999_v0  ;;  %s884_s18 = sshll.u32 %s1276_s15, 2 }
   0xe   : > { %1096 = vmatpush.bf16.msra.mxu2 %v999_v0  ;;  %1097 = vmatpush.bf16.msra.mxu3 %v999_v0  ;;  %s1202_s23 = scalar_lea.vmem %s1268_s0, %s884_s18  ;;  %s1241_s26 = scalar_lea.vmem %s1270_s2, %s884_s18 }
   0xf   : > { %v981_v3 = vld [vmem:[%s1202_s23] sm:$0xff]  ;;  %v982_v7 = vld [vmem:[%s1202_s23 + $0x8] sm:$0xff]  ;;  %v983_v11 = vld [vmem:[%s1202_s23 + $0x10] sm:$0xff] }
  0x10   : > { %v985_v4 = vld [vmem:[%s1202_s23 + $0x20] sm:$0xff]  ;;  %v986_v8 = vld [vmem:[%s1202_s23 + $0x28] sm:$0xff]  ;;  %v987_v12 = vld [vmem:[%s1202_s23 + $0x30] sm:$0xff] }
  0x11   : > { %452 = vmatpush.bf16.msra.mxu0 %v998_v1  ;;  %1098 = vmatpush.bf16.msra.mxu1 %v998_v1  ;;  %v989_v5 = vld [vmem:[%s1202_s23 + $0x40] sm:$0xff]  ;;  %v990_v9 = vld [vmem:[%s1202_s23 + $0x48] sm:$0xff]  ;;  %v991_v13 = vld [vmem:[%s1202_s23 + $0x50] sm:$0xff] }
  0x12   : > { %1099 = vmatpush.bf16.msra.mxu2 %v998_v1  ;;  %1100 = vmatpush.bf16.msra.mxu3 %v998_v1  ;;  %v993_v6 = vld [vmem:[%s1202_s23 + $0x60] sm:$0xff]  ;;  %v994_v10 = vld [vmem:[%s1202_s23 + $0x68] sm:$0xff]  ;;  %v995_v14 = vld [vmem:[%s1202_s23 + $0x70] sm:$0xff] }
  0x13   : > { %v984_v15 = vld [vmem:[%s1202_s23 + $0x18] sm:$0xff] }
  0x14   : > { %v988_v16 = vld [vmem:[%s1202_s23 + $0x38] sm:$0xff] }
  0x15   : > { %453 = vmatpush.bf16.msra.mxu0 %v997_v2  ;;  %1101 = vmatpush.bf16.msra.mxu1 %v997_v2  ;;  %v992_v17 = vld [vmem:[%s1202_s23 + $0x58] sm:$0xff] }
  0x16   : > { %1102 = vmatpush.bf16.msra.mxu2 %v997_v2  ;;  %1103 = vmatpush.bf16.msra.mxu3 %v997_v2  ;;  %v996_v18 = vld [vmem:[%s1202_s23 + $0x78] sm:$0xff] }
  0x18   : > { %963 = vmatmul.msk.bf16.vlgmr.msra.gmra.mxu0 %vm397_vm0, %v981_v3  ;;  %967 = vmatmul.msk.bf16.vlgmr.msra.gmra.mxu1 %vm397_vm0, %v985_v4 }
  0x19   : > { %971 = vmatmul.msk.bf16.vlgmr.msra.gmra.mxu2 %vm397_vm0, %v989_v5  ;;  %975 = vmatmul.msk.bf16.vlgmr.msra.gmra.mxu3 %vm397_vm0, %v993_v6 }
  0x28   : > { %964 = vmatmul.msk.bf16.gmra.mxu0 %vm397_vm0, %v982_v7  ;;  %968 = vmatmul.msk.bf16.gmra.mxu1 %vm397_vm0, %v986_v8 }
  0x29   : > { %972 = vmatmul.msk.bf16.gmra.mxu2 %vm397_vm0, %v990_v9  ;;  %976 = vmatmul.msk.bf16.gmra.mxu3 %vm397_vm0, %v994_v10 }
  0x38   : > { %965 = vmatmul.msk.bf16.gmra.mxu0 %vm397_vm0, %v983_v11  ;;  %969 = vmatmul.msk.bf16.gmra.mxu1 %vm397_vm0, %v987_v12 }
  0x39   : > { %973 = vmatmul.msk.bf16.gmra.mxu2 %vm397_vm0, %v991_v13  ;;  %977 = vmatmul.msk.bf16.gmra.mxu3 %vm397_vm0, %v995_v14 }
  0x48   : > { %966 = vmatmul.msk.bf16.gmra.mxu0 %vm397_vm0, %v984_v15  ;;  %970 = vmatmul.msk.bf16.gmra.mxu1 %vm397_vm0, %v988_v16 }
  0x49   : > { %974 = vmatmul.msk.bf16.gmra.mxu2 %vm397_vm0, %v992_v17  ;;  %978 = vmatmul.msk.bf16.gmra.mxu3 %vm397_vm0, %v996_v18 }
  0x95   : > { %v455_v19 = vpop.f32.mrf.mxu0  ;;  %v475_v20 = vpop.f32.mrf.mxu1 }
  0x96   : > { %v666_v21 = vmul.f32 0.2, %v455_v19  ;;  %v674_v22 = vmul.f32 0.2, %v475_v20  ;;  %vm634_vm1 = vcmp.gt.f32.partialorder %v455_v19, 0.0  ;;  %vm642_vm2 = vcmp.gt.f32.partialorder %v475_v20, 0.0 }
  0x98   : > { %v698_v29 = vsel %vm634_vm1, %v455_v19, %v666_v21  ;;  %v706_v30 = vsel %vm642_vm2, %v475_v20, %v674_v22 }
  0x9c   : > { %v495_v23 = vpop.f32.mrf.mxu2  ;;  %v515_v24 = vpop.f32.mrf.mxu3 }
  0x9d   : > { %v457_v25 = vpop.f32.mrf.mxu0  ;;  %v477_v26 = vpop.f32.mrf.mxu1  ;;  %v682_v35 = vmul.f32 0.2, %v495_v23  ;;  %v690_v36 = vmul.f32 0.2, %v515_v24  ;;  %vm650_vm5 = vcmp.gt.f32.partialorder %v495_v23, 0.0  ;;  %vm658_vm6 = vcmp.gt.f32.partialorder %v515_v24, 0.0 }
  0x9e   : > { %vm635_vm3 = vcmp.gt.f32.partialorder %v457_v25, 0.0  ;;  %v667_v27 = vmul.f32 0.2, %v457_v25  ;;  %vm643_vm4 = vcmp.gt.f32.partialorder %v477_v26, 0.0  ;;  %v675_v28 = vmul.f32 0.2, %v477_v26 }
  0x9f   : > { %v714_v43 = vsel %vm650_vm5, %v495_v23, %v682_v35  ;;  %v722_v44 = vsel %vm658_vm6, %v515_v24, %v690_v36 }
  0xa0   : > { %v699_v31 = vsel %vm635_vm3, %v457_v25, %v667_v27  ;;  %v707_v32 = vsel %vm643_vm4, %v477_v26, %v675_v28 }
  0xa1   : > { %v1003_v33 = vpack.c.bf16 %v699_v31, %v698_v29  ;;  %v1023_v34 = vpack.c.bf16 %v707_v32, %v706_v30 }
  0xa3   : > { %1004 = vst [vmem:[%s1241_s26] sm:$0xff] %v1003_v33  }
  0xa4   : > { %1083 = vst [vmem:[%s1241_s26 + $0x20] sm:$0xff] %v1023_v34   ;;  %v497_v37 = vpop.f32.mrf.mxu2  ;;  %v517_v38 = vpop.f32.mrf.mxu3 }
  0xa5   : > { %vm651_vm7 = vcmp.gt.f32.partialorder %v497_v37, 0.0  ;;  %v683_v39 = vmul.f32 0.2, %v497_v37  ;;  %vm659_vm8 = vcmp.gt.f32.partialorder %v517_v38, 0.0  ;;  %v691_v40 = vmul.f32 0.2, %v517_v38  ;;  %v460_v41 = vpop.f32.mrf.mxu0  ;;  %v480_v42 = vpop.f32.mrf.mxu1 }
  0xa6   : > { %v668_v49 = vmul.f32 0.2, %v460_v41  ;;  %v676_v50 = vmul.f32 0.2, %v480_v42  ;;  %vm636_vm9 = vcmp.gt.f32.partialorder %v460_v41, 0.0  ;;  %vm644_vm10 = vcmp.gt.f32.partialorder %v480_v42, 0.0 }
  0xa7   : > { %v715_v45 = vsel %vm651_vm7, %v497_v37, %v683_v39  ;;  %v723_v46 = vsel %vm659_vm8, %v517_v38, %v691_v40 }
  0xa8   : > { %v1043_v47 = vpack.c.bf16 %v715_v45, %v714_v43  ;;  %v1063_v48 = vpack.c.bf16 %v723_v46, %v722_v44  ;;  %v700_v57 = vsel %vm636_vm9, %v460_v41, %v668_v49  ;;  %v708_v58 = vsel %vm644_vm10, %v480_v42, %v676_v50 }
  0xaa   : > { %1087 = vst [vmem:[%s1241_s26 + $0x40] sm:$0xff] %v1043_v47  }
  0xab   : > { %1091 = vst [vmem:[%s1241_s26 + $0x60] sm:$0xff] %v1063_v48  }
  0xac   : > { %v500_v51 = vpop.f32.mrf.mxu2  ;;  %v520_v52 = vpop.f32.mrf.mxu3 }
  0xad   : > { %v462_v53 = vpop.f32.mrf.mxu0  ;;  %v482_v54 = vpop.f32.mrf.mxu1  ;;  %v684_v63 = vmul.f32 0.2, %v500_v51  ;;  %v692_v0 = vmul.f32 0.2, %v520_v52  ;;  %vm652_vm13 = vcmp.gt.f32.partialorder %v500_v51, 0.0  ;;  %vm660_vm14 = vcmp.gt.f32.partialorder %v520_v52, 0.0 }
  0xae   : > { %vm637_vm11 = vcmp.gt.f32.partialorder %v462_v53, 0.0  ;;  %v669_v55 = vmul.f32 0.2, %v462_v53  ;;  %vm645_vm12 = vcmp.gt.f32.partialorder %v482_v54, 0.0  ;;  %v677_v56 = vmul.f32 0.2, %v482_v54 }
  0xaf   : > { %v716_v7 = vsel %vm652_vm13, %v500_v51, %v684_v63  ;;  %v724_v8 = vsel %vm660_vm14, %v520_v52, %v692_v0 }
  0xb0   : > { %v701_v59 = vsel %vm637_vm11, %v462_v53, %v669_v55  ;;  %v709_v60 = vsel %vm645_vm12, %v482_v54, %v677_v56 }
  0xb1   : > { %v1008_v61 = vpack.c.bf16 %v701_v59, %v700_v57  ;;  %v1028_v62 = vpack.c.bf16 %v709_v60, %v708_v58 }
  0xb3   : > { %1080 = vst [vmem:[%s1241_s26 + $0x8] sm:$0xff] %v1008_v61  }
  0xb4   : > { %1084 = vst [vmem:[%s1241_s26 + $0x28] sm:$0xff] %v1028_v62   ;;  %v502_v1 = vpop.f32.mrf.mxu2  ;;  %v522_v2 = vpop.f32.mrf.mxu3 }
  0xb5   : > { %vm653_vm15 = vcmp.gt.f32.partialorder %v502_v1, 0.0  ;;  %v685_v3 = vmul.f32 0.2, %v502_v1  ;;  %vm661_vm0 = vcmp.gt.f32.partialorder %v522_v2, 0.0  ;;  %v693_v4 = vmul.f32 0.2, %v522_v2  ;;  %v465_v5 = vpop.f32.mrf.mxu0  ;;  %v485_v6 = vpop.f32.mrf.mxu1 }
  0xb6   : > { %v670_v13 = vmul.f32 0.2, %v465_v5  ;;  %v678_v14 = vmul.f32 0.2, %v485_v6  ;;  %vm638_vm1 = vcmp.gt.f32.partialorder %v465_v5, 0.0  ;;  %vm646_vm2 = vcmp.gt.f32.partialorder %v485_v6, 0.0 }
  0xb7   : > { %v717_v9 = vsel %vm653_vm15, %v502_v1, %v685_v3  ;;  %v725_v10 = vsel %vm661_vm0, %v522_v2, %v693_v4 }
  0xb8   : > { %v1048_v11 = vpack.c.bf16 %v717_v9, %v716_v7  ;;  %v1068_v12 = vpack.c.bf16 %v725_v10, %v724_v8  ;;  %v702_v21 = vsel %vm638_vm1, %v465_v5, %v670_v13  ;;  %v710_v22 = vsel %vm646_vm2, %v485_v6, %v678_v14 }
  0xba   : > { %1088 = vst [vmem:[%s1241_s26 + $0x48] sm:$0xff] %v1048_v11  }
  0xbb   : > { %1092 = vst [vmem:[%s1241_s26 + $0x68] sm:$0xff] %v1068_v12  }
  0xbc   : > { %v505_v15 = vpop.f32.mrf.mxu2  ;;  %v525_v16 = vpop.f32.mrf.mxu3 }
  0xbd   : > { %v467_v17 = vpop.f32.mrf.mxu0  ;;  %v487_v18 = vpop.f32.mrf.mxu1  ;;  %v686_v27 = vmul.f32 0.2, %v505_v15  ;;  %v694_v28 = vmul.f32 0.2, %v525_v16  ;;  %vm654_vm5 = vcmp.gt.f32.partialorder %v505_v15, 0.0  ;;  %vm662_vm6 = vcmp.gt.f32.partialorder %v525_v16, 0.0 }
  0xbe   : > { %vm639_vm3 = vcmp.gt.f32.partialorder %v467_v17, 0.0  ;;  %v671_v19 = vmul.f32 0.2, %v467_v17  ;;  %vm647_vm4 = vcmp.gt.f32.partialorder %v487_v18, 0.0  ;;  %v679_v20 = vmul.f32 0.2, %v487_v18 }
  0xbf   : > { %v718_v35 = vsel %vm654_vm5, %v505_v15, %v686_v27  ;;  %v726_v36 = vsel %vm662_vm6, %v525_v16, %v694_v28 }
  0xc0   : > { %v703_v23 = vsel %vm639_vm3, %v467_v17, %v671_v19  ;;  %v711_v24 = vsel %vm647_vm4, %v487_v18, %v679_v20 }
  0xc1   : > { %v1013_v25 = vpack.c.bf16 %v703_v23, %v702_v21  ;;  %v1033_v26 = vpack.c.bf16 %v711_v24, %v710_v22 }
  0xc3   : > { %1081 = vst [vmem:[%s1241_s26 + $0x10] sm:$0xff] %v1013_v25  }
  0xc4   : > { %1085 = vst [vmem:[%s1241_s26 + $0x30] sm:$0xff] %v1033_v26   ;;  %v507_v29 = vpop.f32.mrf.mxu2  ;;  %v527_v30 = vpop.f32.mrf.mxu3 }
  0xc5   : > { %vm655_vm7 = vcmp.gt.f32.partialorder %v507_v29, 0.0  ;;  %v687_v31 = vmul.f32 0.2, %v507_v29  ;;  %vm663_vm8 = vcmp.gt.f32.partialorder %v527_v30, 0.0  ;;  %v695_v32 = vmul.f32 0.2, %v527_v30  ;;  %v470_v33 = vpop.f32.mrf.mxu0  ;;  %v490_v34 = vpop.f32.mrf.mxu1 }
  0xc6   : > { %v672_v41 = vmul.f32 0.2, %v470_v33  ;;  %v680_v42 = vmul.f32 0.2, %v490_v34  ;;  %vm640_vm9 = vcmp.gt.f32.partialorder %v470_v33, 0.0  ;;  %vm648_vm10 = vcmp.gt.f32.partialorder %v490_v34, 0.0 }
  0xc7   : > { %v719_v37 = vsel %vm655_vm7, %v507_v29, %v687_v31  ;;  %v727_v38 = vsel %vm663_vm8, %v527_v30, %v695_v32 }
  0xc8   : > { %v1053_v39 = vpack.c.bf16 %v719_v37, %v718_v35  ;;  %v1073_v40 = vpack.c.bf16 %v727_v38, %v726_v36  ;;  %v704_v49 = vsel %vm640_vm9, %v470_v33, %v672_v41  ;;  %v712_v50 = vsel %vm648_vm10, %v490_v34, %v680_v42 }
  0xca   : > { %1089 = vst [vmem:[%s1241_s26 + $0x50] sm:$0xff] %v1053_v39  }
  0xcb   : > { %1093 = vst [vmem:[%s1241_s26 + $0x70] sm:$0xff] %v1073_v40  }
  0xcc   : > { %v510_v43 = vpop.f32.mrf.mxu2  ;;  %v530_v44 = vpop.f32.mrf.mxu3 }
  0xcd   : > { %v472_v45 = vpop.f32.mrf.mxu0  ;;  %v492_v46 = vpop.f32.mrf.mxu1  ;;  %v688_v55 = vmul.f32 0.2, %v510_v43  ;;  %v696_v56 = vmul.f32 0.2, %v530_v44  ;;  %vm656_vm13 = vcmp.gt.f32.partialorder %v510_v43, 0.0  ;;  %vm664_vm14 = vcmp.gt.f32.partialorder %v530_v44, 0.0 }
  0xce   : > { %vm641_vm11 = vcmp.gt.f32.partialorder %v472_v45, 0.0  ;;  %v673_v47 = vmul.f32 0.2, %v472_v45  ;;  %vm649_vm12 = vcmp.gt.f32.partialorder %v492_v46, 0.0  ;;  %v681_v48 = vmul.f32 0.2, %v492_v46 }
  0xcf   : > { %v720_v61 = vsel %vm656_vm13, %v510_v43, %v688_v55  ;;  %v728_v62 = vsel %vm664_vm14, %v530_v44, %v696_v56 }
  0xd0   : > { %v705_v51 = vsel %vm641_vm11, %v472_v45, %v673_v47  ;;  %v713_v52 = vsel %vm649_vm12, %v492_v46, %v681_v48 }
  0xd1   : > { %v1018_v53 = vpack.c.bf16 %v705_v51, %v704_v49  ;;  %v1038_v54 = vpack.c.bf16 %v713_v52, %v712_v50 }
  0xd3   : > { %1082 = vst [vmem:[%s1241_s26 + $0x18] sm:$0xff] %v1018_v53  }
  0xd4   : > { %1086 = vst [vmem:[%s1241_s26 + $0x38] sm:$0xff] %v1038_v54   ;;  %v512_v57 = vpop.f32.mrf.mxu2  ;;  %v532_v58 = vpop.f32.mrf.mxu3 }
  0xd5   : > { %vm657_vm15 = vcmp.gt.f32.partialorder %v512_v57, 0.0  ;;  %v689_v59 = vmul.f32 0.2, %v512_v57  ;;  %vm665_vm0 = vcmp.gt.f32.partialorder %v532_v58, 0.0  ;;  %v697_v60 = vmul.f32 0.2, %v532_v58 }
  0xd7   : > { %v721_v63 = vsel %vm657_vm15, %v512_v57, %v689_v59  ;;  %v729_v0 = vsel %vm665_vm0, %v532_v58, %v697_v60 }
  0xd8   : > { %v1058_v1 = vpack.c.bf16 %v721_v63, %v720_v61  ;;  %v1078_v2 = vpack.c.bf16 %v729_v0, %v728_v62 }
  0xda   : > { %1090 = vst [vmem:[%s1241_s26 + $0x58] sm:$0xff] %v1058_v1  }
  0xdb   : > { %1094 = vst [vmem:[%s1241_s26 + $0x78] sm:$0xff] %v1078_v2  }
  0xdc PF: > { %s12_s11 = sadd.s32 1, %s1150_s11   ;;  %s1271_s9 = smov %s1146_s10 }
  0xdd   : > { %p9_p5 = scmp.ge.s32.totalorder %s12_s11, 4   ;;  %s1272_s10 = smov %s1274_s12 }
  0xdf   :  { %11 = sbr.rel (!%p9_p5) target bundleno = 2 (0x2), region = 69 }

// kernel: generator_forward.15
= control target key start
LH: loop header
LB: loop body
LE: loop exit
PB: predicated region body
PF: predicated region fallthrough
CT: control target
= control target key end

     0   :  { %s642_s1 = inlined_call_operand.vmem [shape: bf16[128,128], index: 1, kind: input, shape index: {}]   ;;  %s643_s0 = inlined_call_operand.vmem [shape: bf16[128,128], index: 0, kind: input, shape index: {}]   ;;  %s644_s2 = inlined_call_operand.vmem [shape: bf16[128,128], index: 2, kind: output, shape index: {0}]   ;;  %s645_s3 = inlined_call_operand.vmem [shape: f32[8,128], index: 3, kind: output, shape index: {1}]   ;;  %s646_s4 = inlined_call_operand.vmem [shape: f32[8,128], index: 4, kind: output, shape index: {2}]  }
   0x1   :  { %v461_v0 = vld [vmem:[%s642_s1 + $0x38] sm:$0xff]  ;;  %v460_v1 = vld [vmem:[%s642_s1 + $0x30] sm:$0xff]  ;;  %v459_v2 = vld [vmem:[%s642_s1 + $0x28] sm:$0xff] }
   0x2   :  { %178 = vmatpush.bf16.msra.mxu0 %v461_v0  ;;  %509 = vmatpush.bf16.msra.mxu1 %v461_v0  ;;  %v458_v3 = vld [vmem:[%s642_s1 + $0x20] sm:$0xff]  ;;  %v457_v4 = vld [vmem:[%s642_s1 + $0x18] sm:$0xff]  ;;  %v456_v5 = vld [vmem:[%s642_s1 + $0x10] sm:$0xff] }
   0x3   :  { %510 = vmatpush.bf16.msra.mxu2 %v461_v0  ;;  %511 = vmatpush.bf16.msra.mxu3 %v461_v0  ;;  %v455_v6 = vld [vmem:[%s642_s1 + $0x8] sm:$0xff]  ;;  %v454_v7 = vld [vmem:[%s642_s1] sm:$0xff]  ;;  %v448_v9 = vld [vmem:[%s643_s0 + $0x10] sm:$0xff] }
   0x4   :  { %v446_v8 = vld [vmem:[%s643_s0] sm:$0xff]  ;;  %v452_v11 = vld [vmem:[%s643_s0 + $0x30] sm:$0xff]  ;;  %v447_v12 = vld [vmem:[%s643_s0 + $0x8] sm:$0xff] }
   0x5   :  { %v450_v10 = vld [vmem:[%s643_s0 + $0x20] sm:$0xff]  ;;  %v449_v13 = vld [vmem:[%s643_s0 + $0x18] sm:$0xff]  ;;  %v451_v14 = vld [vmem:[%s643_s0 + $0x28] sm:$0xff] }
   0x6   :  { %179 = vmatpush.bf16.msra.mxu0 %v460_v1  ;;  %512 = vmatpush.bf16.msra.mxu1 %v460_v1  ;;  %v453_v15 = vld [vmem:[%s643_s0 + $0x38] sm:$0xff] }
   0x7   :  { %513 = vmatpush.bf16.msra.mxu2 %v460_v1  ;;  %514 = vmatpush.bf16.msra.mxu3 %v460_v1 }
   0xa   :  { %180 = vmatpush.bf16.msra.mxu0 %v459_v2  ;;  %515 = vmatpush.bf16.msra.mxu1 %v459_v2 }
   0xb   :  { %516 = vmatpush.bf16.msra.mxu2 %v459_v2  ;;  %517 = vmatpush.bf16.msra.mxu3 %v459_v2 }
   0xe   :  { %181 = vmatpush.bf16.msra.mxu0 %v458_v3  ;;  %518 = vmatpush.bf16.msra.mxu1 %v458_v3 }
   0xf   :  { %519 = vmatpush.bf16.msra.mxu2 %v458_v3  ;;  %520 = vmatpush.bf16.msra.mxu3 %v458_v3 }
  0x12   :  { %182 = vmatpush.bf16.msra.mxu0 %v457_v4  ;;  %521 = vmatpush.bf16.msra.mxu1 %v457_v4 }
  0x13   :  { %522 = vmatpush.bf16.msra.mxu2 %v457_v4  ;;  %523 = vmatpush.bf16.msra.mxu3 %v457_v4 }
  0x16   :  { %183 = vmatpush.bf16.msra.mxu0 %v456_v5  ;;  %524 = vmatpush.bf16.msra.mxu1 %v456_v5 }
  0x17   :  { %525 = vmatpush.bf16.msra.mxu2 %v456_v5  ;;  %526 = vmatpush.bf16.msra.mxu3 %v456_v5 }
  0x1a   :  { %184 = vmatpush.bf16.msra.mxu0 %v455_v6  ;;  %527 = vmatpush.bf16.msra.mxu1 %v455_v6 }
  0x1b   :  { %528 = vmatpush.bf16.msra.mxu2 %v455_v6  ;;  %529 = vmatpush.bf16.msra.mxu3 %v455_v6 }
  0x1e   :  { %185 = vmatpush.bf16.msra.mxu0 %v454_v7  ;;  %530 = vmatpush.bf16.msra.mxu1 %v454_v7 }
  0x1f   :  { %531 = vmatpush.bf16.msra.mxu2 %v454_v7  ;;  %532 = vmatpush.bf16.msra.mxu3 %v454_v7 }
  0x21   :  { %186 = vmatmul.bf16.vlgmr.msra.gmra.mxu0 %v446_v8  ;;  %196 = vmatmul.bf16.vlgmr.msra.gmra.mxu1 %v448_v9 }
  0x22   :  { %206 = vmatmul.bf16.vlgmr.msra.gmra.mxu2 %v450_v10  ;;  %216 = vmatmul.bf16.vlgmr.msra.gmra.mxu3 %v452_v11 }
  0x31   :  { %191 = vmatmul.bf16.gmra.mxu0 %v447_v12  ;;  %201 = vmatmul.bf16.gmra.mxu1 %v449_v13 }
  0x32   :  { %211 = vmatmul.bf16.gmra.mxu2 %v451_v14  ;;  %221 = vmatmul.bf16.gmra.mxu3 %v453_v15 }
  0x9e   :  { %v187_v16 = vpop.f32.mrf.mxu0  ;;  %v197_v17 = vpop.f32.mrf.mxu1 }
  0x9f   :  { %v331_v31 = vmul.f32 %v187_v16, %v187_v16  ;;  %v335_v45 = vmul.f32 %v197_v17, %v197_v17 }
  0xa5   :  { %v207_v18 = vpop.f32.mrf.mxu2  ;;  %v606_v19 = vpop.f32.mrf.mxu3 }
  0xa6   :  { %v189_v20 = vpop.f32.mrf.mxu0  ;;  %v199_v21 = vpop.f32.mrf.mxu1  ;;  %v339_v61 = vmul.f32 %v207_v18, %v207_v18  ;;  %v343_v9 = vmul.f32 %v606_v19, %v606_v19 }
  0xa7   :  { %v465_v22 = vpack.c.bf16 %v189_v20, %v187_v16  ;;  %v475_v23 = vpack.c.bf16 %v199_v21, %v197_v17  ;;  %v332_v30 = vmul.f32 %v189_v20, %v189_v20  ;;  %v310_v33 = vadd.f32 %v189_v20, %v187_v16 }
  0xa8   :  { %v336_v48 = vmul.f32 %v199_v21, %v199_v21 }
  0xa9   :  { %466 = vst [vmem:[%s644_s2] sm:$0xff] %v465_v22   ;;  %v347_v34 = vadd.f32 %v332_v30, %v331_v31 }
  0xaa   :  { %503 = vst [vmem:[%s644_s2 + $0x10] sm:$0xff] %v475_v23  }
  0xad   :  { %v209_v24 = vpop.f32.mrf.mxu2  ;;  %v219_v25 = vpop.f32.mrf.mxu3 }
  0xae   :  { %v192_v26 = vpop.f32.mrf.mxu0  ;;  %v202_v27 = vpop.f32.mrf.mxu1  ;;  %v485_v28 = vpack.c.bf16 %v209_v24, %v207_v18  ;;  %v495_v29 = vpack.c.bf16 %v219_v25, %v606_v19  ;;  %v340_v0 = vmul.f32 %v209_v24, %v209_v24  ;;  %v344_v12 = vmul.f32 %v219_v25, %v219_v25 }
  0xaf   :  { %v333_v32 = vmul.f32 %v192_v26, %v192_v26  ;;  %v311_v35 = vadd.f32 %v310_v33, %v192_v26  ;;  %v337_v51 = vmul.f32 %v202_v27, %v202_v27 }
  0xb0   :  { %505 = vst [vmem:[%s644_s2 + $0x20] sm:$0xff] %v485_v28  }
  0xb1   :  { %507 = vst [vmem:[%s644_s2 + $0x30] sm:$0xff] %v495_v29   ;;  %v348_v38 = vadd.f32 %v347_v34, %v333_v32 }
  0xb5   :  { %v212_v36 = vpop.f32.mrf.mxu2  ;;  %v222_v37 = vpop.f32.mrf.mxu3 }
  0xb6   :  { %v194_v39 = vpop.f32.mrf.mxu0  ;;  %v204_v40 = vpop.f32.mrf.mxu1  ;;  %v341_v4 = vmul.f32 %v212_v36, %v212_v36  ;;  %v345_v16 = vmul.f32 %v222_v37, %v222_v37 }
  0xb7   :  { %v470_v41 = vpack.c.bf16 %v194_v39, %v192_v26  ;;  %v312_v42 = vadd.f32 %v311_v35, %v194_v39  ;;  %v334_v43 = vmul.f32 %v194_v39, %v194_v39  ;;  %v480_v44 = vpack.c.bf16 %v204_v40, %v202_v27 }
  0xb8   :  { %v338_v59 = vmul.f32 %v204_v40, %v204_v40 }
  0xb9   :  { %502 = vst [vmem:[%s644_s2 + $0x8] sm:$0xff] %v470_v41   ;;  %v313_v46 = vadd.f32 %v312_v42, %v197_v17  ;;  %v349_v47 = vadd.f32 %v348_v38, %v334_v43 }
  0xba   :  { %504 = vst [vmem:[%s644_s2 + $0x18] sm:$0xff] %v480_v44  }
  0xbb   :  { %v350_v49 = vadd.f32 %v349_v47, %v335_v45  ;;  %v314_v50 = vadd.f32 %v313_v46, %v199_v21 }
  0xbd   :  { %v315_v52 = vadd.f32 %v314_v50, %v202_v27  ;;  %v351_v53 = vadd.f32 %v350_v49, %v336_v48  ;;  %v214_v54 = vpop.f32.mrf.mxu2  ;;  %v224_v55 = vpop.f32.mrf.mxu3 }
  0xbe   :  { %v490_v56 = vpack.c.bf16 %v214_v54, %v212_v36  ;;  %v500_v57 = vpack.c.bf16 %v224_v55, %v222_v37  ;;  %v342_v8 = vmul.f32 %v214_v54, %v214_v54  ;;  %v346_v21 = vmul.f32 %v224_v55, %v224_v55 }
  0xbf   :  { %v316_v58 = vadd.f32 %v315_v52, %v204_v40  ;;  %v352_v60 = vadd.f32 %v351_v53, %v337_v51 }
  0xc0   :  { %506 = vst [vmem:[%s644_s2 + $0x28] sm:$0xff] %v490_v56  }
  0xc1   :  { %v317_v62 = vadd.f32 %v316_v58, %v207_v18  ;;  %v353_v63 = vadd.f32 %v352_v60, %v338_v59  ;;  %508 = vst [vmem:[%s644_s2 + $0x38] sm:$0xff] %v500_v57  }
  0xc3   :  { %v354_v1 = vadd.f32 %v353_v63, %v339_v61  ;;  %v318_v2 = vadd.f32 %v317_v62, %v209_v24 }
  0xc5   :  { %v319_v3 = vadd.f32 %v318_v2, %v212_v36  ;;  %v355_v5 = vadd.f32 %v354_v1, %v340_v0 }
  0xc7   :  { %v356_v6 = vadd.f32 %v355_v5, %v341_v4  ;;  %v320_v7 = vadd.f32 %v319_v3, %v214_v54 }
  0xc9   :  { %v321_v10 = vadd.f32 %v320_v7, %v606_v19  ;;  %v357_v11 = vadd.f32 %v356_v6, %v342_v8 }
  0xcb   :  { %v358_v13 = vadd.f32 %v357_v11, %v343_v9  ;;  %v322_v14 = vadd.f32 %v321_v10, %v219_v25 }
  0xcd   :  { %v323_v15 = vadd.f32 %v322_v14, %v222_v37  ;;  %v359_v17 = vadd.f32 %v358_v13, %v344_v12 }
  0xcf   :  { %v360_v18 = vadd.f32 %v359_v17, %v345_v16  ;;  %v324_v20 = vadd.f32 %v323_v15, %v224_v55 }
  0xd1   :  { %v325_v22 = vrot.slane %v324_v20, 4  ;;  %v361_v23 = vadd.f32 %v360_v18, %v346_v21 }
  0xd3   :  { %v326_v24 = vadd.f32 %v325_v22, %v324_v20  ;;  %v362_v26 = vrot.slane %v361_v23, 4 }
  0xd5   :  { %v327_v27 = vrot.slane %v326_v24, 2  ;;  %v363_v28 = vadd.f32 %v362_v26, %v361_v23 }
  0xd7   :  { %v328_v29 = vadd.f32 %v327_v27, %v326_v24  ;;  %v364_v30 = vrot.slane %v363_v28, 2 }
  0xd9   :  { %v329_v31 = vrot.slane %v328_v29, 1  ;;  %v365_v19 = vadd.f32 %v364_v30, %v363_v28 }
  0xdb   :  { %v330_v32 = vadd.f32 %v329_v31, %v328_v29  ;;  %v366_v33 = vrot.slane %v365_v19, 1 }
  0xdd   :  { %v367_v34 = vadd.f32 %v366_v33, %v365_v19  ;;  %368 = vst [vmem:[%s645_s3] sm:$0xff] %v330_v32 }
  0xdf   :  { %369 = vst [vmem:[%s646_s4] sm:$0xff] %v367_v34 }

// kernel: generator_forward.16
= control target key start
LH: loop header
LB: loop body
LE: loop exit
PB: predicated region body
PF: predicated region fallthrough
CT: control target
= control target key end

     0   :  { %s368_s0 = inlined_call_operand.vmem [shape: bf16[128,128], index: 0, kind: input, shape index: {}]   ;;  %s369_s1 = inlined_call_operand.vmem [shape: f32[1,128], index: 1, kind: input, shape index: {}]   ;;  %s370_s2 = inlined_call_operand.vmem [shape: f32[1,128], index: 2, kind: input, shape index: {}]   ;;  %s371_s3 = inlined_call_operand.vmem [shape: bf16[128,128], index: 3, kind: output, shape index: {}]  }
   0x1   :  { %v171_v0 = vld [vmem:[%s368_s0] sm:$0xff]   ;;  %v242_v5 = vld [vmem:[%s368_s0 + $0x8] sm:$0xff]   ;;  %v243_v8 = vld [vmem:[%s368_s0 + $0x10] sm:$0xff]  }
   0x2   :  { %v284_v1 = vld [vmem:[%s369_s1] ss:$0 sm:$0xff]  ;;  %v172_v2 = vunpack.c.l.bf16 %v171_v0  ;;  %v173_v3 = vunpack.c.h.bf16 %v171_v0  ;;  %v176_v6 = vunpack.c.l.bf16 %v242_v5  ;;  %v177_v7 = vunpack.c.h.bf16 %v242_v5  ;;  %v244_v9 = vld [vmem:[%s368_s0 + $0x18] sm:$0xff]   ;;  %v246_v39 = vld [vmem:[%s368_s0 + $0x28] sm:$0xff]  }
   0x3   :  { %v289_v4 = vld [vmem:[%s370_s2] ss:$0 sm:$0xff]  ;;  %v180_v12 = vunpack.c.l.bf16 %v243_v8  ;;  %v181_v13 = vunpack.c.h.bf16 %v243_v8  ;;  %v184_v16 = vunpack.c.l.bf16 %v244_v9  ;;  %v185_v17 = vunpack.c.h.bf16 %v244_v9  ;;  %v247_v49 = vld [vmem:[%s368_s0 + $0x30] sm:$0xff]   ;;  %v248_v57 = vld [vmem:[%s368_s0 + $0x38] sm:$0xff]  }
   0x4   :  { %v50_v10 = vmul.f32 %v284_v1, %v172_v2  ;;  %v51_v11 = vmul.f32 %v284_v1, %v173_v3  ;;  %v52_v14 = vmul.f32 %v284_v1, %v176_v6  ;;  %v53_v15 = vmul.f32 %v284_v1, %v177_v7  ;;  %v245_v38 = vld [vmem:[%s368_s0 + $0x20] sm:$0xff]  }
   0x5   :  { %v54_v20 = vmul.f32 %v284_v1, %v180_v12  ;;  %v55_v21 = vmul.f32 %v284_v1, %v181_v13  ;;  %v56_v24 = vmul.f32 %v284_v1, %v184_v16  ;;  %v57_v25 = vmul.f32 %v284_v1, %v185_v17 }
   0x6   :  { %v70_v18 = vadd.f32 %v289_v4, %v50_v10  ;;  %v71_v19 = vadd.f32 %v289_v4, %v51_v11  ;;  %v72_v22 = vadd.f32 %v289_v4, %v52_v14  ;;  %v73_v23 = vadd.f32 %v289_v4, %v53_v15 }
   0x7   :  { %v74_v32 = vadd.f32 %v289_v4, %v54_v20  ;;  %v75_v33 = vadd.f32 %v289_v4, %v55_v21  ;;  %v76_v37 = vadd.f32 %v289_v4, %v56_v24  ;;  %v77_v43 = vadd.f32 %v289_v4, %v57_v25 }
   0x8   :  { %vm86_vm0 = vcmp.gt.f32.partialorder %v70_v18, 0.0  ;;  %vm87_vm1 = vcmp.gt.f32.partialorder %v71_v19, 0.0  ;;  %v102_v26 = vmul.f32 0.2, %v70_v18  ;;  %v103_v27 = vmul.f32 0.2, %v71_v19 }
   0x9   :  { %vm88_vm2 = vcmp.gt.f32.partialorder %v72_v22, 0.0  ;;  %vm89_vm3 = vcmp.gt.f32.partialorder %v73_v23, 0.0  ;;  %v104_v28 = vmul.f32 0.2, %v72_v22  ;;  %v105_v29 = vmul.f32 0.2, %v73_v23 }
   0xa   :  { %v118_v30 = vsel %vm86_vm0, %v70_v18, %v102_v26  ;;  %v119_v31 = vsel %vm87_vm1, %v71_v19, %v103_v27  ;;  %vm90_vm4 = vcmp.gt.f32.partialorder %v74_v32, 0.0  ;;  %vm91_vm5 = vcmp.gt.f32.partialorder %v75_v33, 0.0 }
   0xb   :  { %v205_v34 = vpack.c.bf16 %v119_v31, %v118_v30  ;;  %v120_v35 = vsel %vm88_vm2, %v72_v22, %v104_v28  ;;  %v121_v36 = vsel %vm89_vm3, %v73_v23, %v105_v29  ;;  %v106_v41 = vmul.f32 0.2, %v74_v32 }
   0xc   :  { %v210_v40 = vpack.c.bf16 %v121_v36, %v120_v35  ;;  %v107_v42 = vmul.f32 0.2, %v75_v33  ;;  %vm92_vm6 = vcmp.gt.f32.partialorder %v76_v37, 0.0  ;;  %v108_v44 = vmul.f32 0.2, %v76_v37 }
   0xd   :  { %206 = vst [vmem:[%s371_s3] sm:$0xff] %v205_v34   ;;  %v122_v45 = vsel %vm90_vm4, %v74_v32, %v106_v41  ;;  %v188_v46 = vunpack.c.l.bf16 %v245_v38  ;;  %v189_v47 = vunpack.c.h.bf16 %v245_v38  ;;  %v192_v48 = vunpack.c.l.bf16 %v246_v39 }
   0xe   :  { %249 = vst [vmem:[%s371_s3 + $0x8] sm:$0xff] %v210_v40   ;;  %v123_v50 = vsel %vm91_vm5, %v75_v33, %v107_v42  ;;  %vm93_vm7 = vcmp.gt.f32.partialorder %v77_v43, 0.0  ;;  %v109_v51 = vmul.f32 0.2, %v77_v43  ;;  %v124_v52 = vsel %vm92_vm6, %v76_v37, %v108_v44 }
   0xf   :  { %v215_v53 = vpack.c.bf16 %v123_v50, %v122_v45  ;;  %v58_v54 = vmul.f32 %v284_v1, %v188_v46  ;;  %v59_v55 = vmul.f32 %v284_v1, %v189_v47  ;;  %v193_v56 = vunpack.c.h.bf16 %v246_v39 }
  0x10   :  { %v125_v58 = vsel %vm93_vm7, %v77_v43, %v109_v51  ;;  %v60_v59 = vmul.f32 %v284_v1, %v192_v48  ;;  %v196_v60 = vunpack.c.l.bf16 %v247_v49  ;;  %v197_v61 = vunpack.c.h.bf16 %v247_v49 }
  0x11   :  { %250 = vst [vmem:[%s371_s3 + $0x10] sm:$0xff] %v215_v53   ;;  %v220_v62 = vpack.c.bf16 %v125_v58, %v124_v52  ;;  %v78_v63 = vadd.f32 %v289_v4, %v58_v54  ;;  %v79_v0 = vadd.f32 %v289_v4, %v59_v55  ;;  %v61_v2 = vmul.f32 %v284_v1, %v193_v56 }
  0x12   :  { %v80_v3 = vadd.f32 %v289_v4, %v60_v59  ;;  %v62_v5 = vmul.f32 %v284_v1, %v196_v60  ;;  %v63_v6 = vmul.f32 %v284_v1, %v197_v61  ;;  %v200_v7 = vunpack.c.l.bf16 %v248_v57 }
  0x13   :  { %251 = vst [vmem:[%s371_s3 + $0x18] sm:$0xff] %v220_v62   ;;  %vm94_vm8 = vcmp.gt.f32.partialorder %v78_v63, 0.0  ;;  %vm95_vm9 = vcmp.gt.f32.partialorder %v79_v0, 0.0  ;;  %v110_v8 = vmul.f32 0.2, %v78_v63  ;;  %v81_v9 = vadd.f32 %v289_v4, %v61_v2 }
  0x14   :  { %v111_v10 = vmul.f32 0.2, %v79_v0  ;;  %vm96_vm10 = vcmp.gt.f32.partialorder %v80_v3, 0.0  ;;  %v112_v11 = vmul.f32 0.2, %v80_v3  ;;  %v82_v12 = vadd.f32 %v289_v4, %v62_v5 }
  0x15   :  { %v126_v13 = vsel %vm94_vm8, %v78_v63, %v110_v8  ;;  %vm97_vm11 = vcmp.gt.f32.partialorder %v81_v9, 0.0  ;;  %v113_v14 = vmul.f32 0.2, %v81_v9  ;;  %v83_v15 = vadd.f32 %v289_v4, %v63_v6 }
  0x16   :  { %v127_v16 = vsel %vm95_vm9, %v79_v0, %v111_v10  ;;  %v128_v17 = vsel %vm96_vm10, %v80_v3, %v112_v11  ;;  %vm98_vm12 = vcmp.gt.f32.partialorder %v82_v12, 0.0  ;;  %v114_v18 = vmul.f32 0.2, %v82_v12 }
  0x17   :  { %v225_v19 = vpack.c.bf16 %v127_v16, %v126_v13  ;;  %v129_v20 = vsel %vm97_vm11, %v81_v9, %v113_v14  ;;  %vm99_vm13 = vcmp.gt.f32.partialorder %v83_v15, 0.0  ;;  %v115_v21 = vmul.f32 0.2, %v83_v15 }
  0x18   :  { %v230_v22 = vpack.c.bf16 %v129_v20, %v128_v17  ;;  %v130_v23 = vsel %vm98_vm12, %v82_v12, %v114_v18  ;;  %v201_v24 = vunpack.c.h.bf16 %v248_v57  ;;  %v64_v25 = vmul.f32 %v284_v1, %v200_v7 }
  0x19   :  { %252 = vst [vmem:[%s371_s3 + $0x20] sm:$0xff] %v225_v19   ;;  %v131_v26 = vsel %vm99_vm13, %v83_v15, %v115_v21 }
  0x1a   :  { %253 = vst [vmem:[%s371_s3 + $0x28] sm:$0xff] %v230_v22   ;;  %v235_v27 = vpack.c.bf16 %v131_v26, %v130_v23  ;;  %v65_v28 = vmul.f32 %v284_v1, %v201_v24  ;;  %v84_v29 = vadd.f32 %v289_v4, %v64_v25 }
  0x1c   :  { %254 = vst [vmem:[%s371_s3 + $0x30] sm:$0xff] %v235_v27   ;;  %v85_v30 = vadd.f32 %v289_v4, %v65_v28  ;;  %vm100_vm14 = vcmp.gt.f32.partialorder %v84_v29, 0.0  ;;  %v116_v31 = vmul.f32 0.2, %v84_v29 }
  0x1e   :  { %vm101_vm15 = vcmp.gt.f32.partialorder %v85_v30, 0.0  ;;  %v117_v32 = vmul.f32 0.2, %v85_v30  ;;  %v132_v33 = vsel %vm100_vm14, %v84_v29, %v116_v31 }
  0x20   :  { %v133_v34 = vsel %vm101_vm15, %v85_v30, %v117_v32 }
  0x21   :  { %v240_v35 = vpack.c.bf16 %v133_v34, %v132_v33 }
  0x23   :  { %255 = vst [vmem:[%s371_s3 + $0x38] sm:$0xff] %v240_v35  }

// kernel: generator_forward.18
= control target key start
LH: loop header
LB: loop body
LE: loop exit
PB: predicated region body
PF: predicated region fallthrough
CT: control target
= control target key end

     0   :  { %s122_s0 = inlined_call_operand.vmem [shape: bf16[32,128], index: 0, kind: input, shape index: {}]   ;;  %s123_s1 = inlined_call_operand.vmem [shape: f32[1,128], index: 1, kind: input, shape index: {}]   ;;  %s124_s2 = inlined_call_operand.vmem [shape: f32[1,128], index: 2, kind: input, shape index: {}]   ;;  %s125_s3 = inlined_call_operand.vmem [shape: bf16[32,128], index: 3, kind: output, shape index: {}]  }
   0x1   :  { %v63_v0 = vld [vmem:[%s122_s0] sm:$0xff]   ;;  %v80_v5 = vld [vmem:[%s122_s0 + $0x8] sm:$0xff]  }
   0x2   :  { %v82_v1 = vld [vmem:[%s123_s1] ss:$0 sm:$0xff]  ;;  %v64_v2 = vunpack.c.l.bf16 %v63_v0  ;;  %v65_v3 = vunpack.c.h.bf16 %v63_v0  ;;  %v68_v6 = vunpack.c.l.bf16 %v80_v5  ;;  %v69_v7 = vunpack.c.h.bf16 %v80_v5 }
   0x3   :  { %v83_v4 = vld [vmem:[%s124_s2] ss:$0 sm:$0xff] }
   0x4   :  { %v26_v8 = vmul.f32 %v82_v1, %v64_v2  ;;  %v27_v9 = vmul.f32 %v82_v1, %v65_v3  ;;  %v28_v10 = vmul.f32 %v82_v1, %v68_v6  ;;  %v29_v11 = vmul.f32 %v82_v1, %v69_v7 }
   0x6   :  { %v34_v12 = vadd.f32 %v83_v4, %v26_v8  ;;  %v35_v13 = vadd.f32 %v83_v4, %v27_v9  ;;  %v36_v14 = vadd.f32 %v83_v4, %v28_v10  ;;  %v37_v15 = vadd.f32 %v83_v4, %v29_v11 }
   0x8   :  { %vm38_vm0 = vcmp.gt.f32.partialorder %v34_v12, 0.0  ;;  %vm39_vm1 = vcmp.gt.f32.partialorder %v35_v13, 0.0  ;;  %v42_v16 = vmul.f32 0.2, %v34_v12  ;;  %v43_v17 = vmul.f32 0.2, %v35_v13 }
   0x9   :  { %vm40_vm2 = vcmp.gt.f32.partialorder %v36_v14, 0.0  ;;  %vm41_vm3 = vcmp.gt.f32.partialorder %v37_v15, 0.0  ;;  %v44_v18 = vmul.f32 0.2, %v36_v14  ;;  %v45_v19 = vmul.f32 0.2, %v37_v15 }
   0xa   :  { %v46_v20 = vsel %vm38_vm0, %v34_v12, %v42_v16  ;;  %v47_v21 = vsel %vm39_vm1, %v35_v13, %v43_v17 }
   0xb   :  { %v73_v22 = vpack.c.bf16 %v47_v21, %v46_v20  ;;  %v48_v23 = vsel %vm40_vm2, %v36_v14, %v44_v18  ;;  %v49_v24 = vsel %vm41_vm3, %v37_v15, %v45_v19 }
   0xc   :  { %v78_v25 = vpack.c.bf16 %v49_v24, %v48_v23 }
   0xd   :  { %74 = vst [vmem:[%s125_s3] sm:$0xff] %v73_v22  }
   0xe   :  { %81 = vst [vmem:[%s125_s3 + $0x8] sm:$0xff] %v78_v25  }

// kernel: generator_forward.17
= control target key start
LH: loop header
LB: loop body
LE: loop exit
PB: predicated region body
PF: predicated region fallthrough
CT: control target
= control target key end

     0   :  { %s511_s1 = inlined_call_operand.vmem [shape: bf16[256,128], index: 1, kind: input, shape index: {}]   ;;  %s512_s0 = inlined_call_operand.vmem [shape: bf16[32,256], index: 0, kind: input, shape index: {}]   ;;  %s513_s2 = inlined_call_operand.vmem [shape: bf16[32,128], index: 2, kind: output, shape index: {0}]   ;;  %s514_s3 = inlined_call_operand.vmem [shape: f32[8,128], index: 3, kind: output, shape index: {1}]   ;;  %s515_s4 = inlined_call_operand.vmem [shape: f32[8,128], index: 4, kind: output, shape index: {2}]  }
   0x1   :  { %v366_v0 = vld [vmem:[%s511_s1 + $0x38] sm:$0xff]  ;;  %v365_v2 = vld [vmem:[%s511_s1 + $0x30] sm:$0xff]  ;;  %v364_v4 = vld [vmem:[%s511_s1 + $0x28] sm:$0xff] }
   0x2   :  { %v374_v1 = vld [vmem:[%s511_s1 + $0x78] sm:$0xff]  ;;  %178 = vmatpush.bf16.msra.mxu0 %v366_v0  ;;  %386 = vmatpush.bf16.msra.mxu2 %v366_v0  ;;  %v373_v3 = vld [vmem:[%s511_s1 + $0x70] sm:$0xff]  ;;  %v372_v5 = vld [vmem:[%s511_s1 + $0x68] sm:$0xff] }
   0x3   :  { %197 = vmatpush.bf16.msra.mxu1 %v374_v1  ;;  %394 = vmatpush.bf16.msra.mxu3 %v374_v1  ;;  %v363_v6 = vld [vmem:[%s511_s1 + $0x20] sm:$0xff]  ;;  %v362_v8 = vld [vmem:[%s511_s1 + $0x18] sm:$0xff]  ;;  %v361_v10 = vld [vmem:[%s511_s1 + $0x10] sm:$0xff] }
   0x4   :  { %v371_v7 = vld [vmem:[%s511_s1 + $0x60] sm:$0xff]  ;;  %v370_v9 = vld [vmem:[%s511_s1 + $0x58] sm:$0xff]  ;;  %v369_v11 = vld [vmem:[%s511_s1 + $0x50] sm:$0xff] }
   0x5   :  { %v360_v12 = vld [vmem:[%s511_s1 + $0x8] sm:$0xff]  ;;  %v359_v14 = vld [vmem:[%s511_s1] sm:$0xff]  ;;  %v285_v18 = vld [vmem:[%s512_s0 + $0x10] sm:$0xf] }
   0x6   :  { %179 = vmatpush.bf16.msra.mxu0 %v365_v2  ;;  %387 = vmatpush.bf16.msra.mxu2 %v365_v2  ;;  %v368_v13 = vld [vmem:[%s511_s1 + $0x48] sm:$0xff]  ;;  %v367_v15 = vld [vmem:[%s511_s1 + $0x40] sm:$0xff]  ;;  %v358_v19 = vld [vmem:[%s512_s0 + $0x14] sm:$0xf0] }
   0x7   :  { %198 = vmatpush.bf16.msra.mxu1 %v373_v3  ;;  %395 = vmatpush.bf16.msra.mxu3 %v373_v3  ;;  %v277_v16 = vld [vmem:[%s512_s0] sm:$0xf]  ;;  %v356_v17 = vld [vmem:[%s512_s0 + $0x4] sm:$0xf0]  ;;  %v355_v20 = vld [vmem:[%s512_s0 + $0x4] sm:$0xf]  ;;  %v286_v25 = vor.u32 %v358_v19, %v285_v18 }
   0x8   :  { %v279_v21 = vld [vmem:[%s512_s0 + $0x8] sm:$0xf0]  ;;  %v357_v22 = vld [vmem:[%s512_s0 + $0x14] sm:$0xf]  ;;  %v287_v23 = vld [vmem:[%s512_s0 + $0x18] sm:$0xf0]  ;;  %v278_v24 = vor.u32 %v356_v17, %v277_v16 }
   0x9   :  { %v282_v26 = vor.u32 %v355_v20, %v279_v21  ;;  %v290_v27 = vor.u32 %v357_v22, %v287_v23 }
   0xa   :  { %180 = vmatpush.bf16.msra.mxu0 %v364_v4  ;;  %388 = vmatpush.bf16.msra.mxu2 %v364_v4 }
   0xb   :  { %199 = vmatpush.bf16.msra.mxu1 %v372_v5  ;;  %396 = vmatpush.bf16.msra.mxu3 %v372_v5 }
   0xe   :  { %181 = vmatpush.bf16.msra.mxu0 %v363_v6  ;;  %389 = vmatpush.bf16.msra.mxu2 %v363_v6 }
   0xf   :  { %200 = vmatpush.bf16.msra.mxu1 %v371_v7  ;;  %397 = vmatpush.bf16.msra.mxu3 %v371_v7 }
  0x12   :  { %182 = vmatpush.bf16.msra.mxu0 %v362_v8  ;;  %390 = vmatpush.bf16.msra.mxu2 %v362_v8 }
  0x13   :  { %201 = vmatpush.bf16.msra.mxu1 %v370_v9  ;;  %398 = vmatpush.bf16.msra.mxu3 %v370_v9 }
  0x16   :  { %183 = vmatpush.bf16.msra.mxu0 %v361_v10  ;;  %391 = vmatpush.bf16.msra.mxu2 %v361_v10 }
  0x17   :  { %202 = vmatpush.bf16.msra.mxu1 %v369_v11  ;;  %399 = vmatpush.bf16.msra.mxu3 %v369_v11 }
  0x1a   :  { %184 = vmatpush.bf16.msra.mxu0 %v360_v12  ;;  %392 = vmatpush.bf16.msra.mxu2 %v360_v12 }
  0x1b   :  { %203 = vmatpush.bf16.msra.mxu1 %v368_v13  ;;  %400 = vmatpush.bf16.msra.mxu3 %v368_v13 }
  0x1e   :  { %185 = vmatpush.bf16.msra.mxu0 %v359_v14  ;;  %393 = vmatpush.bf16.msra.mxu2 %v359_v14 }
  0x1f   :  { %204 = vmatpush.bf16.msra.mxu1 %v367_v15  ;;  %401 = vmatpush.bf16.msra.mxu3 %v367_v15 }
  0x21   :  { %186 = vmatmul.bf16.vlgmr.msra.gmra.mxu0 %v278_v24  ;;  %191 = vmatmul.bf16.vlgmr.msra.gmra.mxu2 %v286_v25 }
  0x22   :  { %205 = vmatmul.bf16.vlgmr.msra.gmra.mxu1 %v282_v26  ;;  %210 = vmatmul.bf16.vlgmr.msra.gmra.mxu3 %v290_v27 }
  0x9e   :  { %v187_v28 = vpop.f32.mrf.mxu0 }
  0x9f   :  { %v206_v29 = vpop.f32.mrf.mxu1 }
  0xa0   :  { %v207_v31 = vadd.f32 %v206_v29, %v187_v28 }
  0xa2   :  { %v248_v36 = vmul.f32 %v207_v31, %v207_v31 }
  0xa4   :  { %v192_v30 = vpop.f32.mrf.mxu2 }
  0xa5   :  { %v211_v32 = vpop.f32.mrf.mxu3 }
  0xa6   :  { %v189_v33 = vpop.f32.mrf.mxu0  ;;  %v212_v37 = vadd.f32 %v211_v32, %v192_v30 }
  0xa7   :  { %v208_v34 = vpop.f32.mrf.mxu1 }
  0xa8   :  { %v209_v35 = vadd.f32 %v208_v34, %v189_v33  ;;  %v250_v44 = vmul.f32 %v212_v37, %v212_v37 }
  0xaa   :  { %v378_v38 = vpack.c.bf16 %v209_v35, %v207_v31  ;;  %v239_v39 = vadd.f32 %v209_v35, %v207_v31  ;;  %v249_v40 = vmul.f32 %v209_v35, %v209_v35 }
  0xac   :  { %379 = vst [vmem:[%s513_s2] sm:$0xff] %v378_v38   ;;  %v252_v41 = vadd.f32 %v249_v40, %v248_v36  ;;  %v194_v42 = vpop.f32.mrf.mxu2  ;;  %v240_v46 = vadd.f32 %v239_v39, %v212_v37 }
  0xad   :  { %v213_v43 = vpop.f32.mrf.mxu3 }
  0xae   :  { %v214_v45 = vadd.f32 %v213_v43, %v194_v42  ;;  %v253_v50 = vadd.f32 %v252_v41, %v250_v44 }
  0xb0   :  { %v383_v47 = vpack.c.bf16 %v214_v45, %v212_v37  ;;  %v241_v48 = vadd.f32 %v240_v46, %v214_v45  ;;  %v251_v49 = vmul.f32 %v214_v45, %v214_v45 }
  0xb2   :  { %385 = vst [vmem:[%s513_s2 + $0x8] sm:$0xff] %v383_v47   ;;  %v242_v51 = vrot.slane %v241_v48, 4  ;;  %v254_v52 = vadd.f32 %v253_v50, %v251_v49 }
  0xb4   :  { %v243_v53 = vadd.f32 %v242_v51, %v241_v48  ;;  %v255_v54 = vrot.slane %v254_v52, 4 }
  0xb6   :  { %v244_v55 = vrot.slane %v243_v53, 2  ;;  %v256_v56 = vadd.f32 %v255_v54, %v254_v52 }
  0xb8   :  { %v245_v57 = vadd.f32 %v244_v55, %v243_v53  ;;  %v257_v58 = vrot.slane %v256_v56, 2 }
  0xba   :  { %v246_v59 = vrot.slane %v245_v57, 1  ;;  %v258_v60 = vadd.f32 %v257_v58, %v256_v56 }
  0xbc   :  { %v247_v61 = vadd.f32 %v246_v59, %v245_v57  ;;  %v259_v62 = vrot.slane %v258_v60, 1 }
  0xbe   :  { %v260_v63 = vadd.f32 %v259_v62, %v258_v60  ;;  %261 = vst [vmem:[%s514_s3] sm:$0xff] %v247_v61 }
  0xc0   :  { %262 = vst [vmem:[%s515_s4] sm:$0xff] %v260_v63 }

// kernel: generator_forward.20
= control target key start
LH: loop header
LB: loop body
LE: loop exit
PB: predicated region body
PF: predicated region fallthrough
CT: control target
= control target key end

     0   :  { %s69_s0 = inlined_call_operand.vmem [shape: bf16[8,128], index: 0, kind: input, shape index: {}]   ;;  %s70_s1 = inlined_call_operand.vmem [shape: f32[1,128], index: 1, kind: input, shape index: {}]   ;;  %s71_s2 = inlined_call_operand.vmem [shape: f32[1,128], index: 2, kind: input, shape index: {}]   ;;  %s72_s3 = inlined_call_operand.vmem [shape: bf16[8,128], index: 3, kind: output, shape index: {}]  }
   0x1   :  { %v14_v0 = vld [vmem:[%s69_s0] sm:$0xf] }
   0x2   :  { %v35_v1 = vld [vmem:[%s70_s1] ss:$0 sm:$0xff]  ;;  %v15_v2 = vunpack.c.l.bf16 %v14_v0 }
   0x3   :  { %v36_v3 = vld [vmem:[%s71_s2] ss:$0 sm:$0xff] }
   0x4   :  { %v20_v4 = vmul.f32 %v35_v1, %v15_v2 }
   0x6   :  { %v25_v5 = vadd.f32 %v36_v3, %v20_v4 }
   0x8   :  { %vm26_vm0 = vcmp.gt.f32.partialorder %v25_v5, 0.0  ;;  %v27_v6 = vmul.f32 0.2, %v25_v5 }
   0xa   :  { %v28_v7 = vsel %vm26_vm0, %v25_v5, %v27_v6 }
   0xb   :  { %v29_v8 = vpack.c.bf16 %v28_v7, %v28_v7 }
   0xd   :  { %30 = vst [vmem:[%s72_s3] sm:$0xf] %v29_v8 }

// kernel: generator_forward.19
= control target key start
LH: loop header
LB: loop body
LE: loop exit
PB: predicated region body
PF: predicated region fallthrough
CT: control target
= control target key end

     0   :  { %s675_s1 = inlined_call_operand.vmem [shape: bf16[512,128], index: 1, kind: input, shape index: {}]   ;;  %s676_s0 = inlined_call_operand.vmem [shape: bf16[8,512], index: 0, kind: input, shape index: {}]   ;;  %s677_s2 = inlined_call_operand.vmem [shape: bf16[8,128], index: 2, kind: output, shape index: {0}]   ;;  %s678_s3 = inlined_call_operand.vmem [shape: f32[8,128], index: 3, kind: output, shape index: {1}]   ;;  %s679_s4 = inlined_call_operand.vmem [shape: f32[8,128], index: 4, kind: output, shape index: {2}]  }
   0x1   :  { %v514_v0 = vld [vmem:[%s675_s1 + $0x38] sm:$0xff]  ;;  %v513_v4 = vld [vmem:[%s675_s1 + $0x30] sm:$0xff]  ;;  %v512_v8 = vld [vmem:[%s675_s1 + $0x28] sm:$0xff] }
   0x2   :  { %v522_v1 = vld [vmem:[%s675_s1 + $0x78] sm:$0xff]  ;;  %292 = vmatpush.bf16.msra.mxu0 %v514_v0  ;;  %v521_v5 = vld [vmem:[%s675_s1 + $0x70] sm:$0xff]  ;;  %v520_v9 = vld [vmem:[%s675_s1 + $0x68] sm:$0xff] }
   0x3   :  { %v530_v2 = vld [vmem:[%s675_s1 + $0xb8] sm:$0xff]  ;;  %305 = vmatpush.bf16.msra.mxu1 %v522_v1  ;;  %v529_v6 = vld [vmem:[%s675_s1 + $0xb0] sm:$0xff]  ;;  %v528_v10 = vld [vmem:[%s675_s1 + $0xa8] sm:$0xff] }
   0x4   :  { %v538_v3 = vld [vmem:[%s675_s1 + $0xf8] sm:$0xff]  ;;  %318 = vmatpush.bf16.msra.mxu2 %v530_v2  ;;  %v537_v7 = vld [vmem:[%s675_s1 + $0xf0] sm:$0xff]  ;;  %v536_v11 = vld [vmem:[%s675_s1 + $0xe8] sm:$0xff] }
   0x5   :  { %331 = vmatpush.bf16.msra.mxu3 %v538_v3  ;;  %v511_v12 = vld [vmem:[%s675_s1 + $0x20] sm:$0xff]  ;;  %v510_v16 = vld [vmem:[%s675_s1 + $0x18] sm:$0xff]  ;;  %v509_v20 = vld [vmem:[%s675_s1 + $0x10] sm:$0xff] }
   0x6   :  { %293 = vmatpush.bf16.msra.mxu0 %v513_v4  ;;  %v519_v13 = vld [vmem:[%s675_s1 + $0x60] sm:$0xff]  ;;  %v518_v17 = vld [vmem:[%s675_s1 + $0x58] sm:$0xff]  ;;  %v517_v21 = vld [vmem:[%s675_s1 + $0x50] sm:$0xff] }
   0x7   :  { %306 = vmatpush.bf16.msra.mxu1 %v521_v5  ;;  %v527_v14 = vld [vmem:[%s675_s1 + $0xa0] sm:$0xff]  ;;  %v526_v18 = vld [vmem:[%s675_s1 + $0x98] sm:$0xff]  ;;  %v525_v22 = vld [vmem:[%s675_s1 + $0x90] sm:$0xff] }
   0x8   :  { %319 = vmatpush.bf16.msra.mxu2 %v529_v6  ;;  %v535_v15 = vld [vmem:[%s675_s1 + $0xe0] sm:$0xff]  ;;  %v534_v19 = vld [vmem:[%s675_s1 + $0xd8] sm:$0xff]  ;;  %v533_v23 = vld [vmem:[%s675_s1 + $0xd0] sm:$0xff] }
   0x9   :  { %332 = vmatpush.bf16.msra.mxu3 %v537_v7  ;;  %v508_v24 = vld [vmem:[%s675_s1 + $0x8] sm:$0xff]  ;;  %v20_v26 = vld [vmem:[%s676_s0] sm:$0xff] }
   0xa   :  { %294 = vmatpush.bf16.msra.mxu0 %v512_v8  ;;  %v516_v25 = vld [vmem:[%s675_s1 + $0x48] sm:$0xff]  ;;  %v88_v30 = vunpack.c.l.b16 %v20_v26  ;;  %v89_v31 = vunpack.c.h.b16 %v20_v26  ;;  %v507_v32 = vld [vmem:[%s675_s1] sm:$0xff] }
   0xb   :  { %307 = vmatpush.bf16.msra.mxu1 %v520_v9  ;;  %v524_v27 = vld [vmem:[%s675_s1 + $0x88] sm:$0xff]  ;;  %v515_v33 = vld [vmem:[%s675_s1 + $0x40] sm:$0xff] }
   0xc   :  { %320 = vmatpush.bf16.msra.mxu2 %v528_v10  ;;  %v532_v28 = vld [vmem:[%s675_s1 + $0xc8] sm:$0xff]  ;;  %v523_v36 = vld [vmem:[%s675_s1 + $0x80] sm:$0xff]  ;;  %v92_v38 = vpack.c.b16 %v88_v30, %v88_v30  ;;  %v93_v39 = vpack.c.b16 %v89_v31, %v89_v31 }
   0xd   :  { %333 = vmatpush.bf16.msra.mxu3 %v536_v11  ;;  %v21_v29 = vld [vmem:[%s676_s0 + $0x8] sm:$0xff]  ;;  %v531_v37 = vld [vmem:[%s675_s1 + $0xc0] sm:$0xff] }
   0xe   :  { %295 = vmatpush.bf16.msra.mxu0 %v511_v12  ;;  %v90_v34 = vunpack.c.l.b16 %v21_v29  ;;  %v91_v35 = vunpack.c.h.b16 %v21_v29 }
   0xf   :  { %308 = vmatpush.bf16.msra.mxu1 %v519_v13 }
  0x10   :  { %321 = vmatpush.bf16.msra.mxu2 %v527_v14  ;;  %v94_v40 = vpack.c.b16 %v90_v34, %v90_v34  ;;  %v95_v41 = vpack.c.b16 %v91_v35, %v91_v35 }
  0x11   :  { %334 = vmatpush.bf16.msra.mxu3 %v535_v15 }
  0x12   :  { %296 = vmatpush.bf16.msra.mxu0 %v510_v16 }
  0x13   :  { %309 = vmatpush.bf16.msra.mxu1 %v518_v17 }
  0x14   :  { %322 = vmatpush.bf16.msra.mxu2 %v526_v18 }
  0x15   :  { %335 = vmatpush.bf16.msra.mxu3 %v534_v19 }
  0x16   :  { %297 = vmatpush.bf16.msra.mxu0 %v509_v20 }
  0x17   :  { %310 = vmatpush.bf16.msra.mxu1 %v517_v21 }
  0x18   :  { %323 = vmatpush.bf16.msra.mxu2 %v525_v22 }
  0x19   :  { %336 = vmatpush.bf16.msra.mxu3 %v533_v23 }
  0x1a   :  { %298 = vmatpush.bf16.msra.mxu0 %v508_v24 }
  0x1b   :  { %311 = vmatpush.bf16.msra.mxu1 %v516_v25 }
  0x1c   :  { %324 = vmatpush.bf16.msra.mxu2 %v524_v27 }
  0x1d   :  { %337 = vmatpush.bf16.msra.mxu3 %v532_v28 }
  0x1e   :  { %299 = vmatpush.bf16.msra.mxu0 %v507_v32 }
  0x1f   :  { %312 = vmatpush.bf16.msra.mxu1 %v515_v33 }
  0x20   :  { %325 = vmatpush.bf16.msra.mxu2 %v523_v36 }
  0x21   :  { %338 = vmatpush.bf16.msra.mxu3 %v531_v37  ;;  %300 = vmatmul.bf16.vlgmr.msra.gmra.mxu0 %v92_v38 }
  0x22   :  { %313 = vmatmul.bf16.vlgmr.msra.gmra.mxu1 %v93_v39 }
  0x23   :  { %326 = vmatmul.bf16.vlgmr.msra.gmra.mxu2 %v94_v40 }
  0x24   :  { %339 = vmatmul.bf16.vlgmr.msra.gmra.mxu3 %v95_v41 }
  0x9e   :  { %v301_v42 = vpop.f32.mrf.mxu0 }
  0x9f   :  { %v314_v43 = vpop.f32.mrf.mxu1 }
  0xa0   :  { %v315_v44 = vadd.f32 %v314_v43, %v301_v42 }
  0xa6   :  { %v327_v45 = vpop.f32.mrf.mxu2  ;;  %v303_v48 = vpop.f32.mrf.mxu0 }
  0xa7   :  { %v340_v46 = vpop.f32.mrf.mxu3  ;;  %v328_v47 = vadd.f32 %v327_v45, %v315_v44  ;;  %v316_v49 = vpop.f32.mrf.mxu1 }
  0xa9   :  { %v341_v50 = vadd.f32 %v340_v46, %v328_v47 }
  0xab   :  { %v350_v51 = vpack.c.bf16 %v341_v50, %v341_v50  ;;  %v352_v52 = vrot.slane %v341_v50, 4  ;;  %v358_v53 = vmul.f32 %v341_v50, %v341_v50 }
  0xad   :  { %351 = vst [vmem:[%s677_s2] sm:$0xf] %v350_v51  ;;  %v353_v54 = vadd.f32 %v352_v52, %v341_v50  ;;  %v359_v55 = vrot.slane %v358_v53, 4 }
  0xae   :  { %v329_v56 = vpop.f32.mrf.mxu2 }
  0xaf   :  { %v342_v57 = vpop.f32.mrf.mxu3  ;;  %v354_v58 = vrot.slane %v353_v54, 2  ;;  %v360_v59 = vadd.f32 %v359_v55, %v358_v53 }
  0xb1   :  { %v355_v60 = vadd.f32 %v354_v58, %v353_v54  ;;  %v361_v61 = vrot.slane %v360_v59, 2 }
  0xb3   :  { %v356_v62 = vrot.slane %v355_v60, 1  ;;  %v362_v63 = vadd.f32 %v361_v61, %v360_v59 }
  0xb5   :  { %v357_v0 = vadd.f32 %v356_v62, %v355_v60  ;;  %v363_v1 = vrot.slane %v362_v63, 1 }
  0xb7   :  { %v364_v2 = vadd.f32 %v363_v1, %v362_v63  ;;  %365 = vst [vmem:[%s678_s3] sm:$0xff] %v357_v0 }
  0xb9   :  { %366 = vst [vmem:[%s679_s4] sm:$0xff] %v364_v2 }

// kernel: tile.45
= control target key start
LH: loop header
LB: loop body
LE: loop exit
PB: predicated region body
PF: predicated region fallthrough
CT: control target
= control target key end

     0   :  { %s22_s0 = inlined_call_operand.vmem [shape: f32[32], index: 0, kind: input, shape index: {}]   ;;  %s23_s1 = inlined_call_operand.vmem [shape: f32[4,32], index: 1, kind: output, shape index: {}]  }
   0x1   :  { %v4_v0 = vld [vmem:[%s22_s0] ss:$0 sm:$0xff] }
   0x2   :  { %5 = vst [vmem:[%s23_s1] sm:$0xf] %v4_v0 }

// kernel: tile.50
= control target key start
LH: loop header
LB: loop body
LE: loop exit
PB: predicated region body
PF: predicated region fallthrough
CT: control target
= control target key end

     0   :  { %s37_s8 = smov 32   ;;  %s38_s9 = smov 64   ;;  %vm7_vm0 = vcmask 261120   ;;  %vm13_vm1 = vcmask 1048320   ;;  %vm19_vm2 = vcmask 785920   ;;  %vm25_vm3 = vcmask 523520   ;;  %s55_s0 = inlined_call_operand.vmem [shape: f32[4,32], index: 0, kind: input, shape index: {}]   ;;  %s56_s1 = inlined_call_operand.vmem [shape: f32[1,128], index: 1, kind: output, shape index: {}]  }
   0x1   :  { %v4_v0 = vld [vmem:[%s55_s0] sm:$0xf]  ;;  %s36_s0 = smov 96  }
   0x2   :  { %5 = vst [vmem:[#allocation1] sm:$0xf] %v4_v0 }
   0x9   :  { %v10_v1 = vld [vmem:[#allocation1 + $0x3] sm:$0x1]   ;;  %v22_v2 = vld [vmem:[#allocation1 + $0x1] sm:$0x1]   ;;  %v16_v3 = vld [vmem:[#allocation1 + $0x2] sm:$0x1]  }
   0xa   :  { %11 = vrot.lane.b32.xlu0 %v10_v1, %s36_s0  ;;  %23 = vrot.lane.b32.xlu1 %v22_v2, %s37_s8  ;;  %v6_v4 = vld [vmem:[#allocation1] sm:$0x1]  }
   0xb   :  { %8 = vst.msk [vmem:[#allocation0] sm:$0x1] %vm7_vm0, %v6_v4  }
  0x12   :  { %17 = vrot.lane.b32.xlu0 %v16_v3, %s38_s9 }
  0x7c   :  { %v12_v5 = vpop.permute.xlu0 %11   ;;  %v24_v6 = vpop.permute.xlu1 %23  }
  0x7d   :  { %14 = vst.msk [vmem:[#allocation0] sm:$0x1] %vm13_vm1, %v12_v5  }
  0x84   :  { %v18_v7 = vpop.permute.xlu0 %17  }
  0x85   :  { %20 = vst.msk [vmem:[#allocation0] sm:$0x1] %vm19_vm2, %v18_v7  }
  0x86   :  { %26 = vst.msk [vmem:[#allocation0] sm:$0x1] %vm25_vm3, %v24_v6  }
  0x8d   :  { %v29_v8 = vld [vmem:[#allocation0] sm:$0x1] }
  0x8e   :  { %32 = vst [vmem:[%s56_s1] sm:$0x1] %v29_v8 }

// kernel: generator_forward.21
= control target key start
LH: loop header
LB: loop body
LE: loop exit
PB: predicated region body
PF: predicated region fallthrough
CT: control target
= control target key end

     0   :  { %vm329_vm0 = vcmask 523264   ;;  %s765_s1 = inlined_call_operand.vmem [shape: bf16[576,128], index: 1, kind: input, shape index: {}]   ;;  %s766_s0 = inlined_call_operand.vmem [shape: bf16[8,576], index: 0, kind: input, shape index: {}]   ;;  %s767_s2 = inlined_call_operand.vmem [shape: bf16[8,128], index: 2, kind: output, shape index: {0}]   ;;  %s768_s3 = inlined_call_operand.vmem [shape: f32[8,128], index: 3, kind: output, shape index: {1}]   ;;  %s769_s4 = inlined_call_operand.vmem [shape: f32[8,128], index: 4, kind: output, shape index: {2}]  }
   0x1   :  { %v585_v0 = vld [vmem:[%s765_s1 + $0x38] sm:$0xff]  ;;  %v584_v4 = vld [vmem:[%s765_s1 + $0x30] sm:$0xff]  ;;  %v583_v8 = vld [vmem:[%s765_s1 + $0x28] sm:$0xff] }
   0x2   :  { %v593_v1 = vld [vmem:[%s765_s1 + $0x78] sm:$0xff]  ;;  %333 = vmatpush.bf16.msra.mxu0 %v585_v0  ;;  %v592_v5 = vld [vmem:[%s765_s1 + $0x70] sm:$0xff]  ;;  %v591_v9 = vld [vmem:[%s765_s1 + $0x68] sm:$0xff] }
   0x3   :  { %v601_v2 = vld [vmem:[%s765_s1 + $0xb8] sm:$0xff]  ;;  %346 = vmatpush.bf16.msra.mxu1 %v593_v1  ;;  %v600_v6 = vld [vmem:[%s765_s1 + $0xb0] sm:$0xff]  ;;  %v599_v10 = vld [vmem:[%s765_s1 + $0xa8] sm:$0xff] }
   0x4   :  { %v609_v3 = vld [vmem:[%s765_s1 + $0xf8] sm:$0xff]  ;;  %359 = vmatpush.bf16.msra.mxu2 %v601_v2  ;;  %v608_v7 = vld [vmem:[%s765_s1 + $0xf0] sm:$0xff]  ;;  %v607_v11 = vld [vmem:[%s765_s1 + $0xe8] sm:$0xff] }
   0x5   :  { %372 = vmatpush.bf16.msra.mxu3 %v609_v3  ;;  %v582_v12 = vld [vmem:[%s765_s1 + $0x20] sm:$0xff]  ;;  %v581_v16 = vld [vmem:[%s765_s1 + $0x18] sm:$0xff]  ;;  %v580_v20 = vld [vmem:[%s765_s1 + $0x10] sm:$0xff] }
   0x6   :  { %334 = vmatpush.bf16.msra.mxu0 %v584_v4  ;;  %v590_v13 = vld [vmem:[%s765_s1 + $0x60] sm:$0xff]  ;;  %v589_v17 = vld [vmem:[%s765_s1 + $0x58] sm:$0xff]  ;;  %v588_v21 = vld [vmem:[%s765_s1 + $0x50] sm:$0xff] }
   0x7   :  { %347 = vmatpush.bf16.msra.mxu1 %v592_v5  ;;  %v598_v14 = vld [vmem:[%s765_s1 + $0xa0] sm:$0xff]  ;;  %v597_v18 = vld [vmem:[%s765_s1 + $0x98] sm:$0xff]  ;;  %v596_v22 = vld [vmem:[%s765_s1 + $0x90] sm:$0xff] }
   0x8   :  { %360 = vmatpush.bf16.msra.mxu2 %v600_v6  ;;  %v606_v15 = vld [vmem:[%s765_s1 + $0xe0] sm:$0xff]  ;;  %v605_v19 = vld [vmem:[%s765_s1 + $0xd8] sm:$0xff]  ;;  %v604_v23 = vld [vmem:[%s765_s1 + $0xd0] sm:$0xff] }
   0x9   :  { %373 = vmatpush.bf16.msra.mxu3 %v608_v7  ;;  %v579_v24 = vld [vmem:[%s765_s1 + $0x8] sm:$0xff]  ;;  %v21_v26 = vld [vmem:[%s766_s0] sm:$0xff]  ;;  %v613_v38 = vld [vmem:[%s765_s1 + $0x118] sm:$0xff] }
   0xa   :  { %335 = vmatpush.bf16.msra.mxu0 %v583_v8  ;;  %v587_v25 = vld [vmem:[%s765_s1 + $0x48] sm:$0xff]  ;;  %v99_v30 = vunpack.c.l.b16 %v21_v26  ;;  %v100_v31 = vunpack.c.h.b16 %v21_v26  ;;  %v578_v32 = vld [vmem:[%s765_s1] sm:$0xff]  ;;  %v612_v43 = vld [vmem:[%s765_s1 + $0x110] sm:$0xff] }
   0xb   :  { %348 = vmatpush.bf16.msra.mxu1 %v591_v9  ;;  %v595_v27 = vld [vmem:[%s765_s1 + $0x88] sm:$0xff]  ;;  %v586_v33 = vld [vmem:[%s765_s1 + $0x40] sm:$0xff]  ;;  %v23_v45 = vld [vmem:[%s766_s0 + $0x10] sm:$0xf] }
   0xc   :  { %361 = vmatpush.bf16.msra.mxu2 %v599_v10  ;;  %v603_v28 = vld [vmem:[%s765_s1 + $0xc8] sm:$0xff]  ;;  %v594_v36 = vld [vmem:[%s765_s1 + $0x80] sm:$0xff]  ;;  %v104_v39 = vpack.c.b16 %v99_v30, %v99_v30  ;;  %v105_v40 = vpack.c.b16 %v100_v31, %v100_v31  ;;  %v103_v47 = vunpack.c.l.b16 %v23_v45 }
   0xd   :  { %374 = vmatpush.bf16.msra.mxu3 %v607_v11  ;;  %v22_v29 = vld [vmem:[%s766_s0 + $0x8] sm:$0xff]  ;;  %v602_v37 = vld [vmem:[%s765_s1 + $0xc0] sm:$0xff] }
   0xe   :  { %336 = vmatpush.bf16.msra.mxu0 %v582_v12  ;;  %v101_v34 = vunpack.c.l.b16 %v22_v29  ;;  %v102_v35 = vunpack.c.h.b16 %v22_v29  ;;  %v611_v44 = vld [vmem:[%s765_s1 + $0x108] sm:$0xff]  ;;  %v610_v46 = vld [vmem:[%s765_s1 + $0x100] sm:$0xff]  ;;  %v108_v48 = vpack.c.b16 %v103_v47, %v103_v47 }
   0xf   :  { %349 = vmatpush.bf16.msra.mxu1 %v590_v13 }
  0x10   :  { %362 = vmatpush.bf16.msra.mxu2 %v598_v14  ;;  %v106_v41 = vpack.c.b16 %v101_v34, %v101_v34  ;;  %v107_v42 = vpack.c.b16 %v102_v35, %v102_v35 }
  0x11   :  { %375 = vmatpush.bf16.msra.mxu3 %v606_v15 }
  0x12   :  { %337 = vmatpush.bf16.msra.mxu0 %v581_v16 }
  0x13   :  { %350 = vmatpush.bf16.msra.mxu1 %v589_v17 }
  0x14   :  { %363 = vmatpush.bf16.msra.mxu2 %v597_v18 }
  0x15   :  { %376 = vmatpush.bf16.msra.mxu3 %v605_v19 }
  0x16   :  { %338 = vmatpush.bf16.msra.mxu0 %v580_v20 }
  0x17   :  { %351 = vmatpush.bf16.msra.mxu1 %v588_v21 }
  0x18   :  { %364 = vmatpush.bf16.msra.mxu2 %v596_v22 }
  0x19   :  { %377 = vmatpush.bf16.msra.mxu3 %v604_v23 }
  0x1a   :  { %339 = vmatpush.bf16.msra.mxu0 %v579_v24 }
  0x1b   :  { %352 = vmatpush.bf16.msra.mxu1 %v587_v25 }
  0x1c   :  { %365 = vmatpush.bf16.msra.mxu2 %v595_v27 }
  0x1d   :  { %378 = vmatpush.bf16.msra.mxu3 %v603_v28 }
  0x1e   :  { %340 = vmatpush.bf16.msra.mxu0 %v578_v32 }
  0x1f   :  { %353 = vmatpush.bf16.msra.mxu1 %v586_v33 }
  0x20   :  { %366 = vmatpush.bf16.msra.mxu2 %v594_v36 }
  0x21   :  { %379 = vmatpush.bf16.msra.mxu3 %v602_v37  ;;  %341 = vmatmul.bf16.vlgmr.msra.gmra.mxu0 %v104_v39 }
  0x22   :  { %389 = vmatpush.bf16.msrb.mxu0 %v613_v38  ;;  %354 = vmatmul.bf16.vlgmr.msra.gmra.mxu1 %v105_v40 }
  0x23   :  { %367 = vmatmul.bf16.vlgmr.msra.gmra.mxu2 %v106_v41 }
  0x24   :  { %380 = vmatmul.bf16.vlgmr.msra.gmra.mxu3 %v107_v42 }
  0x26   :  { %390 = vmatpush.bf16.msrb.mxu0 %v612_v43 }
  0x2a   :  { %391 = vmatpush.bf16.msrb.mxu0 %v611_v44 }
  0x2e   :  { %392 = vmatpush.bf16.msrb.mxu0 %v610_v46 }
  0x31   :  { %577 = vmatmul.msk.bf16.vlgmr.msrb.gmra.mxu0 %vm329_vm0, %v108_v48 }
  0x9e   :  { %v342_v49 = vpop.f32.mrf.mxu0 }
  0x9f   :  { %v355_v50 = vpop.f32.mrf.mxu1 }
  0xa0   :  { %v356_v55 = vadd.f32 %v355_v50, %v342_v49 }
  0xa6   :  { %v368_v51 = vpop.f32.mrf.mxu2  ;;  %v344_v53 = vpop.f32.mrf.mxu0 }
  0xa7   :  { %v381_v52 = vpop.f32.mrf.mxu3  ;;  %v357_v54 = vpop.f32.mrf.mxu1  ;;  %v369_v56 = vadd.f32 %v368_v51, %v356_v55 }
  0xa9   :  { %v382_v57 = vadd.f32 %v381_v52, %v369_v56 }
  0xae   :  { %v370_v58 = vpop.f32.mrf.mxu2  ;;  %v394_v60 = vpop.f32.mrf.mxu0 }
  0xaf   :  { %v383_v59 = vpop.f32.mrf.mxu3  ;;  %v395_v61 = vadd.f32 %v394_v60, %v382_v57 }
  0xb1   :  { %v404_v62 = vpack.c.bf16 %v395_v61, %v395_v61  ;;  %v406_v63 = vrot.slane %v395_v61, 4  ;;  %v412_v0 = vmul.f32 %v395_v61, %v395_v61 }
  0xb3   :  { %405 = vst [vmem:[%s767_s2] sm:$0xf] %v404_v62  ;;  %v407_v1 = vadd.f32 %v406_v63, %v395_v61  ;;  %v413_v2 = vrot.slane %v412_v0, 4 }
  0xb5   :  { %v408_v3 = vrot.slane %v407_v1, 2  ;;  %v414_v4 = vadd.f32 %v413_v2, %v412_v0 }
  0xb6   :  { %v396_v5 = vpop.f32.mrf.mxu0 }
  0xb7   :  { %v409_v6 = vadd.f32 %v408_v3, %v407_v1  ;;  %v415_v7 = vrot.slane %v414_v4, 2 }
  0xb9   :  { %v410_v8 = vrot.slane %v409_v6, 1  ;;  %v416_v9 = vadd.f32 %v415_v7, %v414_v4 }
  0xbb   :  { %v411_v10 = vadd.f32 %v410_v8, %v409_v6  ;;  %v417_v11 = vrot.slane %v416_v9, 1 }
  0xbd   :  { %v418_v12 = vadd.f32 %v417_v11, %v416_v9  ;;  %419 = vst [vmem:[%s768_s3] sm:$0xff] %v411_v10 }
  0xbf   :  { %420 = vst [vmem:[%s769_s4] sm:$0xff] %v418_v12 }

// kernel: generator_forward.22
= control target key start
LH: loop header
LB: loop body
LE: loop exit
PB: predicated region body
PF: predicated region fallthrough
CT: control target
= control target key end

     0   :  { %s67_s0 = inlined_call_operand.vmem [shape: bf16[8,128], index: 0, kind: input, shape index: {}]   ;;  %s68_s1 = inlined_call_operand.vmem [shape: f32[1,128], index: 1, kind: input, shape index: {}]   ;;  %s69_s2 = inlined_call_operand.vmem [shape: f32[1,128], index: 2, kind: input, shape index: {}]   ;;  %s70_s3 = inlined_call_operand.vmem [shape: bf16[8,128], index: 3, kind: output, shape index: {}]  }
   0x1   :  { %v14_v0 = vld [vmem:[%s67_s0] sm:$0xf] }
   0x2   :  { %v33_v1 = vld [vmem:[%s68_s1] ss:$0 sm:$0xff]  ;;  %v15_v2 = vunpack.c.l.bf16 %v14_v0 }
   0x3   :  { %v34_v3 = vld [vmem:[%s69_s2] ss:$0 sm:$0xff] }
   0x4   :  { %v20_v4 = vmul.f32 %v33_v1, %v15_v2 }
   0x6   :  { %v25_v5 = vadd.f32 %v34_v3, %v20_v4 }
   0x8   :  { %v26_v6 = vmax.f32 %v25_v5, 0.0 }
   0xa   :  { %v27_v7 = vpack.c.bf16 %v26_v6, %v26_v6 }
   0xc   :  { %28 = vst [vmem:[%s70_s3] sm:$0xf] %v27_v7 }

// kernel: tile.55
= control target key start
LH: loop header
LB: loop body
LE: loop exit
PB: predicated region body
PF: predicated region fallthrough
CT: control target
= control target key end

     0   :  { %s22_s0 = inlined_call_operand.vmem [shape: f32[16], index: 0, kind: input, shape index: {}]   ;;  %s23_s1 = inlined_call_operand.vmem [shape: f32[4,16], index: 1, kind: output, shape index: {}]  }
   0x1   :  { %v4_v0 = vld [vmem:[%s22_s0] ss:$0 sm:$0xff] }
   0x2   :  { %5 = vst [vmem:[%s23_s1] sm:$0xf] %v4_v0 }

// kernel: tile.60
= control target key start
LH: loop header
LB: loop body
LE: loop exit
PB: predicated region body
PF: predicated region fallthrough
CT: control target
= control target key end

     0   :  { %s37_s8 = smov 16   ;;  %s38_s9 = smov 32   ;;  %vm7_vm0 = vcmask 130048   ;;  %vm13_vm1 = vcmask 523648   ;;  %vm19_vm2 = vcmask 392448   ;;  %vm25_vm3 = vcmask 261248   ;;  %s55_s0 = inlined_call_operand.vmem [shape: f32[4,16], index: 0, kind: input, shape index: {}]   ;;  %s56_s1 = inlined_call_operand.vmem [shape: f32[1,64], index: 1, kind: output, shape index: {}]  }
   0x1   :  { %v4_v0 = vld [vmem:[%s55_s0] sm:$0xf]  ;;  %s36_s0 = smov 48  }
   0x2   :  { %5 = vst [vmem:[#allocation1] sm:$0xf] %v4_v0 }
   0x9   :  { %v10_v1 = vld [vmem:[#allocation1 + $0x3] sm:$0x1]   ;;  %v22_v2 = vld [vmem:[#allocation1 + $0x1] sm:$0x1]   ;;  %v16_v3 = vld [vmem:[#allocation1 + $0x2] sm:$0x1]  }
   0xa   :  { %11 = vrot.lane.b32.xlu0 %v10_v1, %s36_s0  ;;  %23 = vrot.lane.b32.xlu1 %v22_v2, %s37_s8  ;;  %v6_v4 = vld [vmem:[#allocation1] sm:$0x1]  }
   0xb   :  { %8 = vst.msk [vmem:[#allocation0] sm:$0x1] %vm7_vm0, %v6_v4  }
  0x12   :  { %17 = vrot.lane.b32.xlu0 %v16_v3, %s38_s9 }
  0x7c   :  { %v12_v5 = vpop.permute.xlu0 %11   ;;  %v24_v6 = vpop.permute.xlu1 %23  }
  0x7d   :  { %14 = vst.msk [vmem:[#allocation0] sm:$0x1] %vm13_vm1, %v12_v5  }
  0x84   :  { %v18_v7 = vpop.permute.xlu0 %17  }
  0x85   :  { %20 = vst.msk [vmem:[#allocation0] sm:$0x1] %vm19_vm2, %v18_v7  }
  0x86   :  { %26 = vst.msk [vmem:[#allocation0] sm:$0x1] %vm25_vm3, %v24_v6  }
  0x8d   :  { %v29_v8 = vld [vmem:[#allocation0] sm:$0x1] }
  0x8e   :  { %32 = vst [vmem:[%s56_s1] sm:$0x1] %v29_v8 }

// kernel: generator_forward.23
= control target key start
LH: loop header
LB: loop body
LE: loop exit
PB: predicated region body
PF: predicated region fallthrough
CT: control target
= control target key end

     0   :  { %vm209_vm0 = vcmask 261120   ;;  %s602_s1 = inlined_call_operand.vmem [shape: bf16[288,128], index: 1, kind: input, shape index: {}]   ;;  %s603_s0 = inlined_call_operand.vmem [shape: bf16[32,288], index: 0, kind: input, shape index: {}]   ;;  %s604_s2 = inlined_call_operand.vmem [shape: bf16[32,128], index: 2, kind: output, shape index: {0}]   ;;  %s605_s3 = inlined_call_operand.vmem [shape: f32[8,128], index: 3, kind: output, shape index: {1}]   ;;  %s606_s4 = inlined_call_operand.vmem [shape: f32[8,128], index: 4, kind: output, shape index: {2}]  }
   0x1   :  { %v443_v0 = vld [vmem:[%s602_s1 + $0x38] sm:$0xff]  ;;  %v442_v2 = vld [vmem:[%s602_s1 + $0x30] sm:$0xff]  ;;  %v453_v4 = vld [vmem:[%s602_s1 + $0x88] sm:$0xff] }
   0x2   :  { %v451_v1 = vld [vmem:[%s602_s1 + $0x78] sm:$0xff]  ;;  %216 = vmatpush.bf16.msra.mxu0 %v443_v0  ;;  %v450_v3 = vld [vmem:[%s602_s1 + $0x70] sm:$0xff]  ;;  %465 = vmatpush.bf16.msra.mxu3 %v443_v0  ;;  %v452_v5 = vld [vmem:[%s602_s1 + $0x80] sm:$0xff] }
   0x3   :  { %235 = vmatpush.bf16.msra.mxu1 %v451_v1  ;;  %260 = vmatpush.bf16.msra.mxu2 %v453_v4  ;;  %v342_v6 = vld [vmem:[%s603_s0 + $0x8] sm:$0xf]  ;;  %v432_v7 = vld [vmem:[%s603_s0 + $0x10] sm:$0xf0]  ;;  %v440_v11 = vld [vmem:[%s602_s1 + $0x20] sm:$0xff] }
   0x4   :  { %v441_v8 = vld [vmem:[%s602_s1 + $0x28] sm:$0xff]  ;;  %v343_v10 = vor.u32 %v432_v7, %v342_v6  ;;  %v448_v12 = vld [vmem:[%s602_s1 + $0x60] sm:$0xff]  ;;  %v439_v13 = vld [vmem:[%s602_s1 + $0x18] sm:$0xff] }
   0x5   :  { %v449_v9 = vld [vmem:[%s602_s1 + $0x68] sm:$0xff]  ;;  %v447_v14 = vld [vmem:[%s602_s1 + $0x58] sm:$0xff]  ;;  %v438_v15 = vld [vmem:[%s602_s1 + $0x10] sm:$0xff] }
   0x6   :  { %217 = vmatpush.bf16.msra.mxu0 %v442_v2  ;;  %466 = vmatpush.bf16.msra.mxu3 %v442_v2  ;;  %v446_v16 = vld [vmem:[%s602_s1 + $0x50] sm:$0xff]  ;;  %v354_v17 = vld [vmem:[%s603_s0 + $0x20] sm:$0xf]  ;;  %v435_v18 = vld [vmem:[%s603_s0 + $0x28] sm:$0xf0] }
   0x7   :  { %236 = vmatpush.bf16.msra.mxu1 %v450_v3  ;;  %261 = vmatpush.bf16.msra.mxu2 %v452_v5  ;;  %v437_v19 = vld [vmem:[%s602_s1 + $0x8] sm:$0xff]  ;;  %v355_v21 = vor.u32 %v435_v18, %v354_v17  ;;  %v436_v22 = vld [vmem:[%s602_s1] sm:$0xff]  ;;  %v336_v27 = vld [vmem:[%s603_s0 + $0xc] sm:$0xf0] }
   0x8   :  { %v445_v20 = vld [vmem:[%s602_s1 + $0x48] sm:$0xff]  ;;  %v444_v23 = vld [vmem:[%s602_s1 + $0x40] sm:$0xff]  ;;  %v346_v28 = vld [vmem:[%s603_s0 + $0x18] sm:$0xf] }
   0x9   :  { %v334_v24 = vld [vmem:[%s603_s0] sm:$0xf]  ;;  %v431_v25 = vld [vmem:[%s603_s0 + $0x8] sm:$0xf0]  ;;  %v430_v26 = vld [vmem:[%s603_s0 + $0x4] sm:$0xf] }
   0xa   :  { %218 = vmatpush.bf16.msra.mxu0 %v441_v8  ;;  %467 = vmatpush.bf16.msra.mxu3 %v441_v8  ;;  %v434_v29 = vld [vmem:[%s603_s0 + $0x20] sm:$0xf0]  ;;  %v335_v30 = vor.u32 %v431_v25, %v334_v24  ;;  %v339_v31 = vor.u32 %v430_v26, %v336_v27  ;;  %v433_v33 = vld [vmem:[%s603_s0 + $0x1c] sm:$0xf]  ;;  %v348_v34 = vld [vmem:[%s603_s0 + $0x24] sm:$0xf0] }
   0xb   :  { %237 = vmatpush.bf16.msra.mxu1 %v449_v9  ;;  %428 = vmatmul.msk.bf16.vlgmr.msra.gmra.mxu2 %vm209_vm0, %v343_v10  ;;  %v347_v32 = vor.u32 %v434_v29, %v346_v28  ;;  %v351_v35 = vor.u32 %v433_v33, %v348_v34 }
   0xe   :  { %219 = vmatpush.bf16.msra.mxu0 %v440_v11  ;;  %468 = vmatpush.bf16.msra.mxu3 %v440_v11 }
   0xf   :  { %238 = vmatpush.bf16.msra.mxu1 %v448_v12 }
  0x12   :  { %220 = vmatpush.bf16.msra.mxu0 %v439_v13  ;;  %469 = vmatpush.bf16.msra.mxu3 %v439_v13 }
  0x13   :  { %239 = vmatpush.bf16.msra.mxu1 %v447_v14 }
  0x16   :  { %221 = vmatpush.bf16.msra.mxu0 %v438_v15  ;;  %470 = vmatpush.bf16.msra.mxu3 %v438_v15 }
  0x17   :  { %240 = vmatpush.bf16.msra.mxu1 %v446_v16 }
  0x1a   :  { %222 = vmatpush.bf16.msra.mxu0 %v437_v19  ;;  %471 = vmatpush.bf16.msra.mxu3 %v437_v19 }
  0x1b   :  { %241 = vmatpush.bf16.msra.mxu1 %v445_v20  ;;  %429 = vmatmul.msk.bf16.gmra.mxu2 %vm209_vm0, %v355_v21 }
  0x1e   :  { %223 = vmatpush.bf16.msra.mxu0 %v436_v22  ;;  %472 = vmatpush.bf16.msra.mxu3 %v436_v22 }
  0x1f   :  { %242 = vmatpush.bf16.msra.mxu1 %v444_v23 }
  0x21   :  { %224 = vmatmul.bf16.vlgmr.msra.gmra.mxu0 %v335_v30  ;;  %229 = vmatmul.bf16.vlgmr.msra.gmra.mxu3 %v347_v32 }
  0x22   :  { %243 = vmatmul.bf16.vlgmr.msra.gmra.mxu1 %v339_v31 }
  0x32   :  { %248 = vmatmul.bf16.gmra.mxu1 %v351_v35 }
  0x8e   :  { %v263_v36 = vpop.f32.mrf.mxu2 }
  0x96   :  { %v265_v39 = vpop.f32.mrf.mxu2 }
  0x9e   :  { %v225_v37 = vpop.f32.mrf.mxu0  ;;  %v268_v48 = vpop.f32.mrf.mxu2 }
  0x9f   :  { %v244_v38 = vpop.f32.mrf.mxu1 }
  0xa0   :  { %v245_v40 = vadd.f32 %v244_v38, %v225_v37 }
  0xa2   :  { %v264_v44 = vadd.f32 %v263_v36, %v245_v40 }
  0xa4   :  { %v230_v47 = vpop.f32.mrf.mxu3  ;;  %v305_v55 = vmul.f32 %v264_v44, %v264_v44 }
  0xa6   :  { %v227_v41 = vpop.f32.mrf.mxu0  ;;  %v270_v59 = vpop.f32.mrf.mxu2 }
  0xa7   :  { %v246_v42 = vpop.f32.mrf.mxu1 }
  0xa8   :  { %v247_v43 = vadd.f32 %v246_v42, %v227_v41 }
  0xaa   :  { %v266_v45 = vadd.f32 %v265_v39, %v247_v43 }
  0xac   :  { %v457_v46 = vpack.c.bf16 %v266_v45, %v264_v44  ;;  %v306_v52 = vmul.f32 %v266_v45, %v266_v45  ;;  %v232_v53 = vpop.f32.mrf.mxu3  ;;  %v296_v56 = vadd.f32 %v266_v45, %v264_v44 }
  0xae   :  { %458 = vst [vmem:[%s604_s2] sm:$0xff] %v457_v46   ;;  %v309_v60 = vadd.f32 %v306_v52, %v305_v55 }
  0xaf   :  { %v249_v49 = vpop.f32.mrf.mxu1 }
  0xb0   :  { %v250_v50 = vadd.f32 %v249_v49, %v230_v47 }
  0xb2   :  { %v269_v51 = vadd.f32 %v268_v48, %v250_v50 }
  0xb4   :  { %v307_v57 = vmul.f32 %v269_v51, %v269_v51  ;;  %v297_v61 = vadd.f32 %v296_v56, %v269_v51 }
  0xb6   :  { %v310_v63 = vadd.f32 %v309_v60, %v307_v57 }
  0xb7   :  { %v251_v54 = vpop.f32.mrf.mxu1 }
  0xb8   :  { %v252_v58 = vadd.f32 %v251_v54, %v232_v53 }
  0xba   :  { %v271_v62 = vadd.f32 %v270_v59, %v252_v58 }
  0xbc   :  { %v462_v0 = vpack.c.bf16 %v271_v62, %v269_v51  ;;  %v298_v1 = vadd.f32 %v297_v61, %v271_v62  ;;  %v308_v2 = vmul.f32 %v271_v62, %v271_v62 }
  0xbe   :  { %464 = vst [vmem:[%s604_s2 + $0x8] sm:$0xff] %v462_v0   ;;  %v299_v3 = vrot.slane %v298_v1, 4  ;;  %v311_v4 = vadd.f32 %v310_v63, %v308_v2 }
  0xc0   :  { %v300_v5 = vadd.f32 %v299_v3, %v298_v1  ;;  %v312_v6 = vrot.slane %v311_v4, 4 }
  0xc2   :  { %v301_v7 = vrot.slane %v300_v5, 2  ;;  %v313_v8 = vadd.f32 %v312_v6, %v311_v4 }
  0xc4   :  { %v302_v9 = vadd.f32 %v301_v7, %v300_v5  ;;  %v314_v10 = vrot.slane %v313_v8, 2 }
  0xc6   :  { %v303_v11 = vrot.slane %v302_v9, 1  ;;  %v315_v12 = vadd.f32 %v314_v10, %v313_v8 }
  0xc8   :  { %v304_v13 = vadd.f32 %v303_v11, %v302_v9  ;;  %v316_v14 = vrot.slane %v315_v12, 1 }
  0xca   :  { %v317_v15 = vadd.f32 %v316_v14, %v315_v12  ;;  %318 = vst [vmem:[%s605_s3] sm:$0xff] %v304_v13 }
  0xcc   :  { %319 = vst [vmem:[%s606_s4] sm:$0xff] %v317_v15 }

// kernel: generator_forward.24
= control target key start
LH: loop header
LB: loop body
LE: loop exit
PB: predicated region body
PF: predicated region fallthrough
CT: control target
= control target key end

     0   :  { %s114_s0 = inlined_call_operand.vmem [shape: bf16[32,128], index: 0, kind: input, shape index: {}]   ;;  %s115_s1 = inlined_call_operand.vmem [shape: f32[1,128], index: 1, kind: input, shape index: {}]   ;;  %s116_s2 = inlined_call_operand.vmem [shape: f32[1,128], index: 2, kind: input, shape index: {}]   ;;  %s117_s3 = inlined_call_operand.vmem [shape: bf16[32,128], index: 3, kind: output, shape index: {}]  }
   0x1   :  { %v55_v0 = vld [vmem:[%s114_s0] sm:$0xff]   ;;  %v72_v5 = vld [vmem:[%s114_s0 + $0x8] sm:$0xff]  }
   0x2   :  { %v74_v1 = vld [vmem:[%s115_s1] ss:$0 sm:$0xff]  ;;  %v56_v2 = vunpack.c.l.bf16 %v55_v0  ;;  %v57_v3 = vunpack.c.h.bf16 %v55_v0  ;;  %v60_v6 = vunpack.c.l.bf16 %v72_v5  ;;  %v61_v7 = vunpack.c.h.bf16 %v72_v5 }
   0x3   :  { %v75_v4 = vld [vmem:[%s116_s2] ss:$0 sm:$0xff] }
   0x4   :  { %v26_v8 = vmul.f32 %v74_v1, %v56_v2  ;;  %v27_v9 = vmul.f32 %v74_v1, %v57_v3  ;;  %v28_v10 = vmul.f32 %v74_v1, %v60_v6  ;;  %v29_v11 = vmul.f32 %v74_v1, %v61_v7 }
   0x6   :  { %v34_v12 = vadd.f32 %v75_v4, %v26_v8  ;;  %v35_v13 = vadd.f32 %v75_v4, %v27_v9  ;;  %v36_v14 = vadd.f32 %v75_v4, %v28_v10  ;;  %v37_v15 = vadd.f32 %v75_v4, %v29_v11 }
   0x8   :  { %v38_v16 = vmax.f32 %v34_v12, 0.0  ;;  %v39_v17 = vmax.f32 %v35_v13, 0.0  ;;  %v40_v18 = vmax.f32 %v36_v14, 0.0  ;;  %v41_v19 = vmax.f32 %v37_v15, 0.0 }
   0xa   :  { %v65_v20 = vpack.c.bf16 %v39_v17, %v38_v16  ;;  %v70_v21 = vpack.c.bf16 %v41_v19, %v40_v18 }
   0xc   :  { %66 = vst [vmem:[%s117_s3] sm:$0xff] %v65_v20  }
   0xd   :  { %73 = vst [vmem:[%s117_s3 + $0x8] sm:$0xff] %v70_v21  }

// kernel: tile.65
= control target key start
LH: loop header
LB: loop body
LE: loop exit
PB: predicated region body
PF: predicated region fallthrough
CT: control target
= control target key end

     0   :  { %s22_s0 = inlined_call_operand.vmem [shape: f32[8], index: 0, kind: input, shape index: {}]   ;;  %s23_s1 = inlined_call_operand.vmem [shape: f32[4,8], index: 1, kind: output, shape index: {}]  }
   0x1   :  { %v4_v0 = vld [vmem:[%s22_s0] ss:$0 sm:$0xff] }
   0x2   :  { %5 = vst [vmem:[%s23_s1] sm:$0xf] %v4_v0 }

// kernel: tile.70
= control target key start
LH: loop header
LB: loop body
LE: loop exit
PB: predicated region body
PF: predicated region fallthrough
CT: control target
= control target key end

     0   :  { %s37_s8 = smov 8   ;;  %s38_s9 = smov 16   ;;  %vm7_vm0 = vcmask 64512   ;;  %vm13_vm1 = vcmask 261312   ;;  %vm19_vm2 = vcmask 195712   ;;  %vm25_vm3 = vcmask 130112   ;;  %s55_s0 = inlined_call_operand.vmem [shape: f32[4,8], index: 0, kind: input, shape index: {}]   ;;  %s56_s1 = inlined_call_operand.vmem [shape: f32[1,32], index: 1, kind: output, shape index: {}]  }
   0x1   :  { %v4_v0 = vld [vmem:[%s55_s0] sm:$0xf]  ;;  %s36_s0 = smov 24  }
   0x2   :  { %5 = vst [vmem:[#allocation1] sm:$0xf] %v4_v0 }
   0x9   :  { %v10_v1 = vld [vmem:[#allocation1 + $0x3] sm:$0x1]   ;;  %v22_v2 = vld [vmem:[#allocation1 + $0x1] sm:$0x1]   ;;  %v16_v3 = vld [vmem:[#allocation1 + $0x2] sm:$0x1]  }
   0xa   :  { %11 = vrot.lane.b32.xlu0 %v10_v1, %s36_s0  ;;  %23 = vrot.lane.b32.xlu1 %v22_v2, %s37_s8  ;;  %v6_v4 = vld [vmem:[#allocation1] sm:$0x1]  }
   0xb   :  { %8 = vst.msk [vmem:[#allocation0] sm:$0x1] %vm7_vm0, %v6_v4  }
  0x12   :  { %17 = vrot.lane.b32.xlu0 %v16_v3, %s38_s9 }
  0x7c   :  { %v12_v5 = vpop.permute.xlu0 %11   ;;  %v24_v6 = vpop.permute.xlu1 %23  }
  0x7d   :  { %14 = vst.msk [vmem:[#allocation0] sm:$0x1] %vm13_vm1, %v12_v5  }
  0x84   :  { %v18_v7 = vpop.permute.xlu0 %17  }
  0x85   :  { %20 = vst.msk [vmem:[#allocation0] sm:$0x1] %vm19_vm2, %v18_v7  }
  0x86   :  { %26 = vst.msk [vmem:[#allocation0] sm:$0x1] %vm25_vm3, %v24_v6  }
  0x8d   :  { %v29_v8 = vld [vmem:[#allocation0] sm:$0x1] }
  0x8e   :  { %32 = vst [vmem:[%s56_s1] sm:$0x1] %v29_v8 }

// kernel: generator_forward.25
= control target key start
LH: loop header
LB: loop body
LE: loop exit
PB: predicated region body
PF: predicated region fallthrough
CT: control target
= control target key end

     0   :  { %vm211_vm0 = vcmask 130048   ;;  %s876_s1 = inlined_call_operand.vmem [shape: bf16[144,128], index: 1, kind: input, shape index: {}]   ;;  %s877_s0 = inlined_call_operand.vmem [shape: bf16[128,144], index: 0, kind: input, shape index: {}]   ;;  %s878_s2 = inlined_call_operand.vmem [shape: bf16[128,128], index: 2, kind: output, shape index: {0}]   ;;  %s879_s3 = inlined_call_operand.vmem [shape: f32[8,128], index: 3, kind: output, shape index: {1}]   ;;  %s880_s4 = inlined_call_operand.vmem [shape: f32[8,128], index: 4, kind: output, shape index: {2}]  }
   0x1   :  { %v620_v0 = vld [vmem:[%s876_s1 + $0x38] sm:$0xff]  ;;  %v621_v1 = vld [vmem:[%s876_s1 + $0x40] sm:$0xff]  ;;  %v493_v3 = vld [vmem:[%s877_s0 + $0x8] sm:$0xf0] }
   0x2   :  { %v597_v2 = vld [vmem:[%s877_s0 + $0x4] sm:$0xf]  ;;  %236 = vmatpush.bf16.msra.mxu0 %v620_v0  ;;  %292 = vmatpush.bf16.msra.mxu1 %v621_v1  ;;  %v619_v5 = vld [vmem:[%s876_s1 + $0x30] sm:$0xff]  ;;  %v618_v6 = vld [vmem:[%s876_s1 + $0x28] sm:$0xff] }
   0x3   :  { %v496_v4 = vor.u32 %v597_v2, %v493_v3  ;;  %669 = vmatpush.bf16.msra.mxu2 %v620_v0  ;;  %677 = vmatpush.bf16.msra.mxu3 %v621_v1  ;;  %v617_v7 = vld [vmem:[%s876_s1 + $0x20] sm:$0xff]  ;;  %v616_v8 = vld [vmem:[%s876_s1 + $0x18] sm:$0xff]  ;;  %v599_v9 = vld [vmem:[%s877_s0 + $0x14] sm:$0xf] }
   0x4   :  { %v501_v10 = vld [vmem:[%s877_s0 + $0x18] sm:$0xf0]  ;;  %v607_v11 = vld [vmem:[%s877_s0 + $0x54] sm:$0xf]  ;;  %v614_v16 = vld [vmem:[%s876_s1 + $0x8] sm:$0xff] }
   0x5   :  { %589 = vmatmul.msk.bf16.vlgmr.msra.gmra.mxu1 %vm211_vm0, %v496_v4  ;;  %v504_v12 = vor.u32 %v599_v9, %v501_v10  ;;  %v533_v13 = vld [vmem:[%s877_s0 + $0x58] sm:$0xf0]  ;;  %v615_v14 = vld [vmem:[%s876_s1 + $0x10] sm:$0xff]  ;;  %v613_v17 = vld [vmem:[%s876_s1] sm:$0xff] }
   0x6   :  { %237 = vmatpush.bf16.msra.mxu0 %v619_v5  ;;  %v536_v15 = vor.u32 %v607_v11, %v533_v13  ;;  %v491_v18 = vld [vmem:[%s877_s0] sm:$0xf]  ;;  %v598_v19 = vld [vmem:[%s877_s0 + $0x4] sm:$0xf0]  ;;  %v601_v24 = vld [vmem:[%s877_s0 + $0x24] sm:$0xf] }
   0x7   :  { %670 = vmatpush.bf16.msra.mxu2 %v619_v5  ;;  %v523_v20 = vld [vmem:[%s877_s0 + $0x40] sm:$0xf]  ;;  %v606_v21 = vld [vmem:[%s877_s0 + $0x44] sm:$0xf0]  ;;  %v492_v22 = vor.u32 %v598_v19, %v491_v18  ;;  %v509_v25 = vld [vmem:[%s877_s0 + $0x28] sm:$0xf0] }
   0x8   :  { %594 = vmatmul.msk.bf16.vlgmr.msra.gmra.mxu3 %vm211_vm0, %v536_v15  ;;  %v524_v23 = vor.u32 %v606_v21, %v523_v20  ;;  %v609_v26 = vld [vmem:[%s877_s0 + $0x64] sm:$0xf]  ;;  %v512_v27 = vor.u32 %v601_v24, %v509_v25  ;;  %v541_v28 = vld [vmem:[%s877_s0 + $0x68] sm:$0xf0]  ;;  %v499_v30 = vld [vmem:[%s877_s0 + $0x10] sm:$0xf] }
   0x9   :  { %v544_v29 = vor.u32 %v609_v26, %v541_v28  ;;  %v600_v31 = vld [vmem:[%s877_s0 + $0x14] sm:$0xf0]  ;;  %v531_v32 = vld [vmem:[%s877_s0 + $0x50] sm:$0xf]  ;;  %v603_v36 = vld [vmem:[%s877_s0 + $0x34] sm:$0xf] }
   0xa   :  { %238 = vmatpush.bf16.msra.mxu0 %v618_v6  ;;  %v608_v33 = vld [vmem:[%s877_s0 + $0x54] sm:$0xf0]  ;;  %v500_v34 = vor.u32 %v600_v31, %v499_v30  ;;  %v517_v37 = vld [vmem:[%s877_s0 + $0x38] sm:$0xf0]  ;;  %v611_v38 = vld [vmem:[%s877_s0 + $0x74] sm:$0xf] }
   0xb   :  { %671 = vmatpush.bf16.msra.mxu2 %v618_v6  ;;  %v532_v35 = vor.u32 %v608_v33, %v531_v32  ;;  %v520_v39 = vor.u32 %v603_v36, %v517_v37  ;;  %v549_v40 = vld [vmem:[%s877_s0 + $0x78] sm:$0xf0]  ;;  %v507_v42 = vld [vmem:[%s877_s0 + $0x20] sm:$0xf]  ;;  %v602_v43 = vld [vmem:[%s877_s0 + $0x24] sm:$0xf0] }
   0xc   :  { %v552_v41 = vor.u32 %v611_v38, %v549_v40  ;;  %v539_v44 = vld [vmem:[%s877_s0 + $0x60] sm:$0xf]  ;;  %v610_v45 = vld [vmem:[%s877_s0 + $0x64] sm:$0xf0]  ;;  %v508_v46 = vor.u32 %v602_v43, %v507_v42  ;;  %v605_v48 = vld [vmem:[%s877_s0 + $0x44] sm:$0xf] }
   0xd   :  { %v540_v47 = vor.u32 %v610_v45, %v539_v44  ;;  %v525_v49 = vld [vmem:[%s877_s0 + $0x48] sm:$0xf0]  ;;  %v515_v51 = vld [vmem:[%s877_s0 + $0x30] sm:$0xf]  ;;  %v604_v52 = vld [vmem:[%s877_s0 + $0x34] sm:$0xf0] }
   0xe   :  { %239 = vmatpush.bf16.msra.mxu0 %v617_v7  ;;  %v528_v50 = vor.u32 %v605_v48, %v525_v49  ;;  %v547_v53 = vld [vmem:[%s877_s0 + $0x70] sm:$0xf]  ;;  %v612_v54 = vld [vmem:[%s877_s0 + $0x74] sm:$0xf0]  ;;  %v516_v55 = vor.u32 %v604_v52, %v515_v51 }
   0xf   :  { %672 = vmatpush.bf16.msra.mxu2 %v617_v7  ;;  %v548_v56 = vor.u32 %v612_v54, %v547_v53 }
  0x12   :  { %240 = vmatpush.bf16.msra.mxu0 %v616_v8 }
  0x13   :  { %673 = vmatpush.bf16.msra.mxu2 %v616_v8 }
  0x15   :  { %590 = vmatmul.msk.bf16.gmra.mxu1 %vm211_vm0, %v504_v12 }
  0x16   :  { %241 = vmatpush.bf16.msra.mxu0 %v615_v14 }
  0x17   :  { %674 = vmatpush.bf16.msra.mxu2 %v615_v14 }
  0x18   :  { %595 = vmatmul.msk.bf16.gmra.mxu3 %vm211_vm0, %v544_v29 }
  0x1a   :  { %242 = vmatpush.bf16.msra.mxu0 %v614_v16 }
  0x1b   :  { %675 = vmatpush.bf16.msra.mxu2 %v614_v16 }
  0x1e   :  { %243 = vmatpush.bf16.msra.mxu0 %v613_v17 }
  0x1f   :  { %676 = vmatpush.bf16.msra.mxu2 %v613_v17 }
  0x21   :  { %244 = vmatmul.bf16.vlgmr.msra.gmra.mxu0 %v492_v22 }
  0x22   :  { %264 = vmatmul.bf16.vlgmr.msra.gmra.mxu2 %v524_v23 }
  0x25   :  { %591 = vmatmul.msk.bf16.gmra.mxu1 %vm211_vm0, %v512_v27 }
  0x28   :  { %596 = vmatmul.msk.bf16.gmra.mxu3 %vm211_vm0, %v552_v41 }
  0x31   :  { %249 = vmatmul.bf16.gmra.mxu0 %v500_v34 }
  0x32   :  { %269 = vmatmul.bf16.gmra.mxu2 %v532_v35 }
  0x35   :  { %592 = vmatmul.msk.bf16.gmra.mxu1 %vm211_vm0, %v520_v39 }
  0x41   :  { %254 = vmatmul.bf16.gmra.mxu0 %v508_v46 }
  0x42   :  { %274 = vmatmul.bf16.gmra.mxu2 %v540_v47 }
  0x45   :  { %593 = vmatmul.msk.bf16.gmra.mxu1 %vm211_vm0, %v528_v50 }
  0x51   :  { %259 = vmatmul.bf16.gmra.mxu0 %v516_v55 }
  0x52   :  { %279 = vmatmul.bf16.gmra.mxu2 %v548_v56 }
  0x82   :  { %v294_v57 = vpop.f32.mrf.mxu1 }
  0x8a   :  { %v296_v58 = vpop.f32.mrf.mxu1 }
  0x8b   :  { %v319_v4 = vpop.f32.mrf.mxu3 }
  0x92   :  { %v299_v59 = vpop.f32.mrf.mxu1 }
  0x93   :  { %v321_v9 = vpop.f32.mrf.mxu3 }
  0x9a   :  { %v301_v60 = vpop.f32.mrf.mxu1 }
  0x9b   :  { %v324_v18 = vpop.f32.mrf.mxu3 }
  0x9e   :  { %v245_v61 = vpop.f32.mrf.mxu0 }
  0x9f   :  { %v295_v1 = vadd.f32 %v294_v57, %v245_v61 }
  0xa1   :  { %v438_v34 = vmul.f32 %v295_v1, %v295_v1 }
  0xa2   :  { %v304_v62 = vpop.f32.mrf.mxu1 }
  0xa3   :  { %v326_v27 = vpop.f32.mrf.mxu3 }
  0xa5   :  { %v265_v63 = vpop.f32.mrf.mxu2 }
  0xa6   :  { %v247_v0 = vpop.f32.mrf.mxu0 }
  0xa7   :  { %v297_v2 = vadd.f32 %v296_v58, %v247_v0 }
  0xa9   :  { %v625_v3 = vpack.c.bf16 %v297_v2, %v295_v1  ;;  %v439_v30 = vmul.f32 %v297_v2, %v297_v2  ;;  %v417_v35 = vadd.f32 %v297_v2, %v295_v1 }
  0xaa   :  { %v306_v5 = vpop.f32.mrf.mxu1 }
  0xab   :  { %626 = vst [vmem:[%s878_s2] sm:$0xff] %v625_v3   ;;  %v454_v41 = vadd.f32 %v439_v30, %v438_v34  ;;  %v329_v49 = vpop.f32.mrf.mxu3 }
  0xad   :  { %v267_v6 = vpop.f32.mrf.mxu2 }
  0xae   :  { %v250_v7 = vpop.f32.mrf.mxu0 }
  0xaf   :  { %v300_v12 = vadd.f32 %v299_v59, %v250_v7 }
  0xb1   :  { %v440_v36 = vmul.f32 %v300_v12, %v300_v12  ;;  %v418_v42 = vadd.f32 %v417_v35, %v300_v12 }
  0xb2   :  { %v309_v8 = vpop.f32.mrf.mxu1 }
  0xb3   :  { %v455_v45 = vadd.f32 %v454_v41, %v440_v36 }
  0xb5   :  { %v270_v10 = vpop.f32.mrf.mxu2 }
  0xb6   :  { %v252_v11 = vpop.f32.mrf.mxu0  ;;  %v840_v16 = vadd.f32 %v319_v4, %v270_v10  ;;  %v331_v4 = vpop.f32.mrf.mxu3 }
  0xb7   :  { %v302_v13 = vadd.f32 %v301_v60, %v252_v11 }
  0xb8   :  { %v448_v11 = vmul.f32 %v840_v16, %v840_v16 }
  0xb9   :  { %v630_v14 = vpack.c.bf16 %v302_v13, %v300_v12  ;;  %v441_v43 = vmul.f32 %v302_v13, %v302_v13  ;;  %v419_v46 = vadd.f32 %v418_v42, %v302_v13 }
  0xba   :  { %v311_v15 = vpop.f32.mrf.mxu1 }
  0xbb   :  { %662 = vst [vmem:[%s878_s2 + $0x8] sm:$0xff] %v630_v14   ;;  %v456_v50 = vadd.f32 %v455_v45, %v441_v43 }
  0xbd   :  { %v272_v17 = vpop.f32.mrf.mxu2 }
  0xbe   :  { %v255_v19 = vpop.f32.mrf.mxu0  ;;  %v842_v20 = vadd.f32 %v321_v9, %v272_v17 }
  0xbf   :  { %v305_v25 = vadd.f32 %v304_v62, %v255_v19 }
  0xc0   :  { %v650_v21 = vpack.c.bf16 %v842_v20, %v840_v16 }
  0xc1   :  { %v442_v47 = vmul.f32 %v305_v25, %v305_v25  ;;  %v420_v51 = vadd.f32 %v419_v46, %v305_v25 }
  0xc2   :  { %666 = vst [vmem:[%s878_s2 + $0x28] sm:$0xff] %v650_v21   ;;  %v314_v22 = vpop.f32.mrf.mxu1 }
  0xc3   :  { %v315_v31 = vadd.f32 %v314_v22, %v265_v63  ;;  %v457_v53 = vadd.f32 %v456_v50, %v442_v47 }
  0xc5   :  { %v275_v23 = vpop.f32.mrf.mxu2  ;;  %v446_v1 = vmul.f32 %v315_v31, %v315_v31 }
  0xc6   :  { %v257_v24 = vpop.f32.mrf.mxu0  ;;  %v325_v33 = vadd.f32 %v324_v18, %v275_v23 }
  0xc7   :  { %v307_v26 = vadd.f32 %v306_v5, %v257_v24 }
  0xc8   :  { %v450_v19 = vmul.f32 %v325_v33, %v325_v33 }
  0xc9   :  { %v635_v28 = vpack.c.bf16 %v307_v26, %v305_v25  ;;  %v443_v52 = vmul.f32 %v307_v26, %v307_v26  ;;  %v421_v54 = vadd.f32 %v420_v51, %v307_v26 }
  0xca   :  { %v316_v29 = vpop.f32.mrf.mxu1 }
  0xcb   :  { %663 = vst [vmem:[%s878_s2 + $0x10] sm:$0xff] %v635_v28   ;;  %v317_v32 = vadd.f32 %v316_v29, %v267_v6  ;;  %v458_v58 = vadd.f32 %v457_v53, %v443_v52 }
  0xcd   :  { %v645_v37 = vpack.c.bf16 %v317_v32, %v315_v31  ;;  %v277_v38 = vpop.f32.mrf.mxu2  ;;  %v447_v6 = vmul.f32 %v317_v32, %v317_v32 }
  0xce   :  { %v260_v39 = vpop.f32.mrf.mxu0  ;;  %v327_v40 = vadd.f32 %v326_v27, %v277_v38 }
  0xcf   :  { %665 = vst [vmem:[%s878_s2 + $0x20] sm:$0xff] %v645_v37   ;;  %v310_v48 = vadd.f32 %v309_v8, %v260_v39 }
  0xd0   :  { %v655_v44 = vpack.c.bf16 %v327_v40, %v325_v33  ;;  %v451_v23 = vmul.f32 %v327_v40, %v327_v40 }
  0xd1   :  { %v444_v55 = vmul.f32 %v310_v48, %v310_v48  ;;  %v422_v59 = vadd.f32 %v421_v54, %v310_v48 }
  0xd2   :  { %667 = vst [vmem:[%s878_s2 + $0x30] sm:$0xff] %v655_v44  }
  0xd3   :  { %v459_v61 = vadd.f32 %v458_v58, %v444_v55 }
  0xd5   :  { %v280_v56 = vpop.f32.mrf.mxu2 }
  0xd6   :  { %v262_v57 = vpop.f32.mrf.mxu0  ;;  %v330_v5 = vadd.f32 %v329_v49, %v280_v56 }
  0xd7   :  { %v312_v60 = vadd.f32 %v311_v15, %v262_v57  ;;  %v449_v15 = vmul.f32 %v842_v20, %v842_v20 }
  0xd9   :  { %v640_v62 = vpack.c.bf16 %v312_v60, %v310_v48  ;;  %v423_v63 = vadd.f32 %v422_v59, %v312_v60  ;;  %v445_v0 = vmul.f32 %v312_v60, %v312_v60 }
  0xdb   :  { %664 = vst [vmem:[%s878_s2 + $0x18] sm:$0xff] %v640_v62   ;;  %v424_v2 = vadd.f32 %v423_v63, %v315_v31  ;;  %v460_v3 = vadd.f32 %v459_v61, %v445_v0 }
  0xdd   :  { %v425_v7 = vadd.f32 %v424_v2, %v317_v32  ;;  %v461_v8 = vadd.f32 %v460_v3, %v446_v1  ;;  %v282_v9 = vpop.f32.mrf.mxu2 }
  0xde   :  { %v332_v10 = vadd.f32 %v331_v4, %v282_v9 }
  0xdf   :  { %v426_v12 = vadd.f32 %v425_v7, %v840_v16  ;;  %v462_v13 = vadd.f32 %v461_v8, %v447_v6  ;;  %v452_v16 = vmul.f32 %v330_v5, %v330_v5 }
  0xe0   :  { %v660_v14 = vpack.c.bf16 %v332_v10, %v330_v5  ;;  %v453_v30 = vmul.f32 %v332_v10, %v332_v10 }
  0xe1   :  { %v463_v17 = vadd.f32 %v462_v13, %v448_v11  ;;  %v427_v18 = vadd.f32 %v426_v12, %v842_v20 }
  0xe2   :  { %668 = vst [vmem:[%s878_s2 + $0x38] sm:$0xff] %v660_v14  }
  0xe3   :  { %v428_v21 = vadd.f32 %v427_v18, %v325_v33  ;;  %v464_v22 = vadd.f32 %v463_v17, %v449_v15 }
  0xe5   :  { %v429_v24 = vadd.f32 %v428_v21, %v327_v40  ;;  %v465_v25 = vadd.f32 %v464_v22, %v450_v19 }
  0xe7   :  { %v430_v26 = vadd.f32 %v429_v24, %v330_v5  ;;  %v466_v27 = vadd.f32 %v465_v25, %v451_v23 }
  0xe9   :  { %v467_v28 = vadd.f32 %v466_v27, %v452_v16  ;;  %v431_v29 = vadd.f32 %v430_v26, %v332_v10 }
  0xeb   :  { %v432_v31 = vrot.slane %v431_v29, 4  ;;  %v468_v32 = vadd.f32 %v467_v28, %v453_v30 }
  0xed   :  { %v433_v34 = vadd.f32 %v432_v31, %v431_v29  ;;  %v469_v20 = vrot.slane %v468_v32, 4 }
  0xef   :  { %v434_v35 = vrot.slane %v433_v34, 2  ;;  %v470_v36 = vadd.f32 %v469_v20, %v468_v32 }
  0xf1   :  { %v435_v37 = vadd.f32 %v434_v35, %v433_v34  ;;  %v471_v38 = vrot.slane %v470_v36, 2 }
  0xf3   :  { %v436_v39 = vrot.slane %v435_v37, 1  ;;  %v472_v33 = vadd.f32 %v471_v38, %v470_v36 }
  0xf5   :  { %v437_v41 = vadd.f32 %v436_v39, %v435_v37  ;;  %v473_v42 = vrot.slane %v472_v33, 1 }
  0xf7   :  { %v474_v40 = vadd.f32 %v473_v42, %v472_v33  ;;  %475 = vst [vmem:[%s879_s3] sm:$0xff] %v437_v41 }
  0xf9   :  { %476 = vst [vmem:[%s880_s4] sm:$0xff] %v474_v40 }

// kernel: generator_forward.26
= control target key start
LH: loop header
LB: loop body
LE: loop exit
PB: predicated region body
PF: predicated region fallthrough
CT: control target
= control target key end

     0   :  { %s336_s0 = inlined_call_operand.vmem [shape: bf16[128,128], index: 0, kind: input, shape index: {}]   ;;  %s337_s1 = inlined_call_operand.vmem [shape: f32[1,128], index: 1, kind: input, shape index: {}]   ;;  %s338_s2 = inlined_call_operand.vmem [shape: f32[1,128], index: 2, kind: input, shape index: {}]   ;;  %s339_s3 = inlined_call_operand.vmem [shape: bf16[128,128], index: 3, kind: output, shape index: {}]  }
   0x1   :  { %v139_v0 = vld [vmem:[%s336_s0] sm:$0xff]   ;;  %v210_v5 = vld [vmem:[%s336_s0 + $0x8] sm:$0xff]   ;;  %v211_v8 = vld [vmem:[%s336_s0 + $0x10] sm:$0xff]  }
   0x2   :  { %v252_v1 = vld [vmem:[%s337_s1] ss:$0 sm:$0xff]  ;;  %v140_v2 = vunpack.c.l.bf16 %v139_v0  ;;  %v141_v3 = vunpack.c.h.bf16 %v139_v0  ;;  %v144_v6 = vunpack.c.l.bf16 %v210_v5  ;;  %v145_v7 = vunpack.c.h.bf16 %v210_v5  ;;  %v212_v9 = vld [vmem:[%s336_s0 + $0x18] sm:$0xff]   ;;  %v214_v35 = vld [vmem:[%s336_s0 + $0x28] sm:$0xff]  }
   0x3   :  { %v257_v4 = vld [vmem:[%s338_s2] ss:$0 sm:$0xff]  ;;  %v148_v12 = vunpack.c.l.bf16 %v211_v8  ;;  %v149_v13 = vunpack.c.h.bf16 %v211_v8  ;;  %v152_v16 = vunpack.c.l.bf16 %v212_v9  ;;  %v153_v17 = vunpack.c.h.bf16 %v212_v9  ;;  %v215_v40 = vld [vmem:[%s336_s0 + $0x30] sm:$0xff]   ;;  %v216_v45 = vld [vmem:[%s336_s0 + $0x38] sm:$0xff]  }
   0x4   :  { %v50_v10 = vmul.f32 %v252_v1, %v140_v2  ;;  %v51_v11 = vmul.f32 %v252_v1, %v141_v3  ;;  %v52_v14 = vmul.f32 %v252_v1, %v144_v6  ;;  %v53_v15 = vmul.f32 %v252_v1, %v145_v7  ;;  %v213_v26 = vld [vmem:[%s336_s0 + $0x20] sm:$0xff]  }
   0x5   :  { %v54_v20 = vmul.f32 %v252_v1, %v148_v12  ;;  %v55_v21 = vmul.f32 %v252_v1, %v149_v13  ;;  %v56_v24 = vmul.f32 %v252_v1, %v152_v16  ;;  %v57_v25 = vmul.f32 %v252_v1, %v153_v17 }
   0x6   :  { %v70_v18 = vadd.f32 %v257_v4, %v50_v10  ;;  %v71_v19 = vadd.f32 %v257_v4, %v51_v11  ;;  %v72_v22 = vadd.f32 %v257_v4, %v52_v14  ;;  %v73_v23 = vadd.f32 %v257_v4, %v53_v15 }
   0x7   :  { %v74_v29 = vadd.f32 %v257_v4, %v54_v20  ;;  %v75_v30 = vadd.f32 %v257_v4, %v55_v21  ;;  %v76_v33 = vadd.f32 %v257_v4, %v56_v24  ;;  %v77_v34 = vadd.f32 %v257_v4, %v57_v25 }
   0x8   :  { %v86_v27 = vmax.f32 %v70_v18, 0.0  ;;  %v87_v28 = vmax.f32 %v71_v19, 0.0  ;;  %v88_v31 = vmax.f32 %v72_v22, 0.0  ;;  %v89_v32 = vmax.f32 %v73_v23, 0.0 }
   0x9   :  { %v90_v37 = vmax.f32 %v74_v29, 0.0  ;;  %v91_v38 = vmax.f32 %v75_v30, 0.0  ;;  %v156_v39 = vunpack.c.l.bf16 %v213_v26  ;;  %v92_v42 = vmax.f32 %v76_v33, 0.0 }
   0xa   :  { %v173_v36 = vpack.c.bf16 %v87_v28, %v86_v27  ;;  %v178_v41 = vpack.c.bf16 %v89_v32, %v88_v31  ;;  %v93_v43 = vmax.f32 %v77_v34, 0.0  ;;  %v157_v44 = vunpack.c.h.bf16 %v213_v26 }
   0xb   :  { %v183_v46 = vpack.c.bf16 %v91_v38, %v90_v37  ;;  %v58_v47 = vmul.f32 %v252_v1, %v156_v39  ;;  %v160_v48 = vunpack.c.l.bf16 %v214_v35  ;;  %v161_v49 = vunpack.c.h.bf16 %v214_v35 }
   0xc   :  { %174 = vst [vmem:[%s339_s3] sm:$0xff] %v173_v36   ;;  %v188_v50 = vpack.c.bf16 %v93_v43, %v92_v42  ;;  %v59_v51 = vmul.f32 %v252_v1, %v157_v44  ;;  %v164_v52 = vunpack.c.l.bf16 %v215_v40  ;;  %v165_v53 = vunpack.c.h.bf16 %v215_v40 }
   0xd   :  { %217 = vst [vmem:[%s339_s3 + $0x8] sm:$0xff] %v178_v41   ;;  %v78_v54 = vadd.f32 %v257_v4, %v58_v47  ;;  %v60_v55 = vmul.f32 %v252_v1, %v160_v48  ;;  %v61_v56 = vmul.f32 %v252_v1, %v161_v49  ;;  %v168_v57 = vunpack.c.l.bf16 %v216_v45 }
   0xe   :  { %218 = vst [vmem:[%s339_s3 + $0x10] sm:$0xff] %v183_v46   ;;  %v79_v58 = vadd.f32 %v257_v4, %v59_v51  ;;  %v62_v59 = vmul.f32 %v252_v1, %v164_v52  ;;  %v63_v60 = vmul.f32 %v252_v1, %v165_v53  ;;  %v169_v61 = vunpack.c.h.bf16 %v216_v45 }
   0xf   :  { %219 = vst [vmem:[%s339_s3 + $0x18] sm:$0xff] %v188_v50   ;;  %v94_v62 = vmax.f32 %v78_v54, 0.0  ;;  %v80_v63 = vadd.f32 %v257_v4, %v60_v55  ;;  %v81_v0 = vadd.f32 %v257_v4, %v61_v56  ;;  %v64_v2 = vmul.f32 %v252_v1, %v168_v57 }
  0x10   :  { %v95_v3 = vmax.f32 %v79_v58, 0.0  ;;  %v82_v5 = vadd.f32 %v257_v4, %v62_v59  ;;  %v83_v6 = vadd.f32 %v257_v4, %v63_v60  ;;  %v65_v7 = vmul.f32 %v252_v1, %v169_v61 }
  0x11   :  { %v96_v8 = vmax.f32 %v80_v63, 0.0  ;;  %v97_v9 = vmax.f32 %v81_v0, 0.0  ;;  %v84_v10 = vadd.f32 %v257_v4, %v64_v2 }
  0x12   :  { %v193_v11 = vpack.c.bf16 %v95_v3, %v94_v62  ;;  %v98_v12 = vmax.f32 %v82_v5, 0.0  ;;  %v99_v13 = vmax.f32 %v83_v6, 0.0  ;;  %v85_v14 = vadd.f32 %v257_v4, %v65_v7 }
  0x13   :  { %v198_v15 = vpack.c.bf16 %v97_v9, %v96_v8  ;;  %v100_v16 = vmax.f32 %v84_v10, 0.0 }
  0x14   :  { %220 = vst [vmem:[%s339_s3 + $0x20] sm:$0xff] %v193_v11   ;;  %v203_v17 = vpack.c.bf16 %v99_v13, %v98_v12  ;;  %v101_v18 = vmax.f32 %v85_v14, 0.0 }
  0x15   :  { %221 = vst [vmem:[%s339_s3 + $0x28] sm:$0xff] %v198_v15  }
  0x16   :  { %222 = vst [vmem:[%s339_s3 + $0x30] sm:$0xff] %v203_v17   ;;  %v208_v1 = vpack.c.bf16 %v101_v18, %v100_v16 }
  0x18   :  { %223 = vst [vmem:[%s339_s3 + $0x38] sm:$0xff] %v208_v1  }

// kernel: generator_forward.27
= control target key start
LH: loop header
LB: loop body
LE: loop exit
PB: predicated region body
PF: predicated region fallthrough
CT: control target
= control target key end

     0   :  { %s1067_s9 = smov 0   ;;  %s1069_s10 = smov 0   ;;  %s1187_s0 = inlined_call_operand.vmem [shape: bf16[512,72], index: 0, kind: input, shape index: {}]   ;;  %s1188_s1 = inlined_call_operand.vmem [shape: bf16[72,128], index: 1, kind: input, shape index: {}]   ;;  %s1189_s2 = inlined_call_operand.vmem [shape: f32[512,128], index: 2, kind: output, shape index: {}]  }
   0x1   :  { %s1071_s11 = smov 0  }
   0x2 LB: > { %s24_s12 = sadd.s32 1, %s1046_s10  ;;  %p802_p0 = scmp.ge.s32.totalorder %s1050_s11, 1  ;;  %s1050_s11 = sphi %s1071_s11, %s12_s11   ;;  %s1046_s10 = sphi %s1069_s10, %s1191_s10   ;;  %s1042_s9 = sphi %s1067_s9, %s1190_s9  }
   0x3   : > { %p26_p1 = scmp.ge.s32.totalorder %s24_s12, 2  ;;  %p141_p2 = scmp.lt.s32.totalorder %s1050_s11, 3 }
   0x5   : > { %s1193_s12 = smov (%p26_p1, %s24_s12), 0  ;;  %p142_p3 = pnand %p802_p0, %p141_p2 }
   0x6   : > { %s803_s15 = sshll.u32 (!%p142_p3), %s1042_s9, 5 }
   0x7   : > { %145 = sbr.rel (%p142_p3) target bundleno = 235 (0xeb), region = 28  ;;  %p172_p4 = scmp.lt.s32.totalorder (!%p142_p3), %s803_s15, 63 }
   0xc   : > { %v301_v0 = vld [vmem:[%s1188_s1 + $0x20] sm:$0xf]  ;;  %vm458_vm0 = vcmask 1043456   ;;  %v924_v4 = vld [vmem:[%s1188_s1 + $0x18] sm:$0xff]  ;;  %v923_v5 = vld [vmem:[%s1188_s1 + $0x10] sm:$0xff]  ;;  %s1195_s15 = smov (!%p172_p4, %s803_s15), 63 }
   0xd   : > { %v399_v1 = vunpack.c.l.b16 %v301_v0  ;;  %v922_v6 = vld [vmem:[%s1188_s1 + $0x8] sm:$0xff]  ;;  %s804_s22 = sshll.u32 %s1195_s15, 2  ;;  %v921_v7 = vld [vmem:[%s1188_s1] sm:$0xff]  ;;  %vm409_vm1 = vcmask 588800   ;;  %s806_s28 = sshll.u32 %s1195_s15, 3 }
   0xe   : > { %s1106_s27 = scalar_lea.vmem %s1187_s0, %s804_s22  ;;  %s1144_s3 = scalar_lea.vmem %s1189_s2, %s806_s28 }
   0xf   : > { %v404_v2 = vpack.c.b16 %v399_v1, %v399_v1  ;;  %v905_v8 = vld [vmem:[%s1106_s27] sm:$0xff]  ;;  %v906_v12 = vld [vmem:[%s1106_s27 + $0x8] sm:$0xff]  ;;  %v907_v16 = vld [vmem:[%s1106_s27 + $0x10] sm:$0xff] }
  0x10   : > { %v909_v9 = vld [vmem:[%s1106_s27 + $0x20] sm:$0xff]  ;;  %v910_v13 = vld [vmem:[%s1106_s27 + $0x28] sm:$0xff]  ;;  %v911_v17 = vld [vmem:[%s1106_s27 + $0x30] sm:$0xff] }
  0x11   : > { %v460_v3 = vsel %vm458_vm0, %v404_v2, 0  ;;  %v913_v10 = vld [vmem:[%s1106_s27 + $0x40] sm:$0xff]  ;;  %v914_v14 = vld [vmem:[%s1106_s27 + $0x48] sm:$0xff]  ;;  %v915_v18 = vld [vmem:[%s1106_s27 + $0x50] sm:$0xff] }
  0x12   : > { %465 = vmatpush.bf16.msra.mxu0 %v460_v3  ;;  %925 = vmatpush.bf16.msra.mxu1 %v460_v3  ;;  %v917_v11 = vld [vmem:[%s1106_s27 + $0x60] sm:$0xff]  ;;  %v918_v15 = vld [vmem:[%s1106_s27 + $0x68] sm:$0xff]  ;;  %v919_v19 = vld [vmem:[%s1106_s27 + $0x70] sm:$0xff] }
  0x13   : > { %926 = vmatpush.bf16.msra.mxu2 %v460_v3  ;;  %927 = vmatpush.bf16.msra.mxu3 %v460_v3  ;;  %v908_v20 = vld [vmem:[%s1106_s27 + $0x18] sm:$0xff] }
  0x14   : > { %v912_v21 = vld [vmem:[%s1106_s27 + $0x38] sm:$0xff] }
  0x15   : > { %v916_v22 = vld [vmem:[%s1106_s27 + $0x58] sm:$0xff] }
  0x16   : > { %466 = vmatpush.bf16.msra.mxu0 %v924_v4  ;;  %928 = vmatpush.bf16.msra.mxu1 %v924_v4  ;;  %v920_v23 = vld [vmem:[%s1106_s27 + $0x78] sm:$0xff] }
  0x17   : > { %929 = vmatpush.bf16.msra.mxu2 %v924_v4  ;;  %930 = vmatpush.bf16.msra.mxu3 %v924_v4 }
  0x1a   : > { %467 = vmatpush.bf16.msra.mxu0 %v923_v5  ;;  %931 = vmatpush.bf16.msra.mxu1 %v923_v5 }
  0x1b   : > { %932 = vmatpush.bf16.msra.mxu2 %v923_v5  ;;  %933 = vmatpush.bf16.msra.mxu3 %v923_v5 }
  0x1e   : > { %468 = vmatpush.bf16.msra.mxu0 %v922_v6  ;;  %934 = vmatpush.bf16.msra.mxu1 %v922_v6 }
  0x1f   : > { %935 = vmatpush.bf16.msra.mxu2 %v922_v6  ;;  %936 = vmatpush.bf16.msra.mxu3 %v922_v6 }
  0x22   : > { %469 = vmatpush.bf16.msra.mxu0 %v921_v7  ;;  %937 = vmatpush.bf16.msra.mxu1 %v921_v7 }
  0x23   : > { %938 = vmatpush.bf16.msra.mxu2 %v921_v7  ;;  %939 = vmatpush.bf16.msra.mxu3 %v921_v7 }
  0x25   : > { %887 = vmatmul.msk.bf16.vlgmr.msra.gmra.mxu0 %vm409_vm1, %v905_v8  ;;  %891 = vmatmul.msk.bf16.vlgmr.msra.gmra.mxu1 %vm409_vm1, %v909_v9 }
  0x26   : > { %895 = vmatmul.msk.bf16.vlgmr.msra.gmra.mxu2 %vm409_vm1, %v913_v10  ;;  %899 = vmatmul.msk.bf16.vlgmr.msra.gmra.mxu3 %vm409_vm1, %v917_v11 }
  0x35   : > { %888 = vmatmul.msk.bf16.gmra.mxu0 %vm409_vm1, %v906_v12  ;;  %892 = vmatmul.msk.bf16.gmra.mxu1 %vm409_vm1, %v910_v13 }
  0x36   : > { %896 = vmatmul.msk.bf16.gmra.mxu2 %vm409_vm1, %v914_v14  ;;  %900 = vmatmul.msk.bf16.gmra.mxu3 %vm409_vm1, %v918_v15 }
  0x45   : > { %889 = vmatmul.msk.bf16.gmra.mxu0 %vm409_vm1, %v907_v16  ;;  %893 = vmatmul.msk.bf16.gmra.mxu1 %vm409_vm1, %v911_v17 }
  0x46   : > { %897 = vmatmul.msk.bf16.gmra.mxu2 %vm409_vm1, %v915_v18  ;;  %901 = vmatmul.msk.bf16.gmra.mxu3 %vm409_vm1, %v919_v19 }
  0x55   : > { %890 = vmatmul.msk.bf16.gmra.mxu0 %vm409_vm1, %v908_v20  ;;  %894 = vmatmul.msk.bf16.gmra.mxu1 %vm409_vm1, %v912_v21 }
  0x56   : > { %898 = vmatmul.msk.bf16.gmra.mxu2 %vm409_vm1, %v916_v22  ;;  %902 = vmatmul.msk.bf16.gmra.mxu3 %vm409_vm1, %v920_v23 }
  0xa2   : > { %v471_v24 = vpop.f32.mrf.mxu0  ;;  %v491_v25 = vpop.f32.mrf.mxu1 }
  0xa3   : > { %964 = vtanh.f32 %v471_v24 }
  0xa4   : > { %966 = vtanh.f32 %v491_v25 }
  0xa9   : > { %v965_v26 = vpop.eup %964  ;;  %v511_v27 = vpop.f32.mrf.mxu2 }
  0xaa   : > { %v531_v28 = vpop.f32.mrf.mxu3  ;;  %v967_v29 = vpop.eup %966  ;;  %682 = vst [vmem:[%s1144_s3] sm:$0xff] %v965_v26  ;;  %968 = vtanh.f32 %v511_v27 }
  0xab   : > { %v473_v30 = vpop.f32.mrf.mxu0  ;;  %v493_v31 = vpop.f32.mrf.mxu1  ;;  %690 = vst [vmem:[%s1144_s3 + $0x40] sm:$0xff] %v967_v29  ;;  %970 = vtanh.f32 %v531_v28 }
  0xac   : > { %972 = vtanh.f32 %v473_v30 }
  0xad   : > { %974 = vtanh.f32 %v493_v31 }
  0xb0   : > { %v969_v32 = vpop.eup %968 }
  0xb1   : > { %v971_v33 = vpop.eup %970  ;;  %698 = vst [vmem:[%s1144_s3 + $0x80] sm:$0xff] %v969_v32  ;;  %v513_v34 = vpop.f32.mrf.mxu2 }
  0xb2   : > { %v533_v35 = vpop.f32.mrf.mxu3  ;;  %v973_v36 = vpop.eup %972  ;;  %706 = vst [vmem:[%s1144_s3 + $0xc0] sm:$0xff] %v971_v33  ;;  %976 = vtanh.f32 %v513_v34 }
  0xb3   : > { %v476_v37 = vpop.f32.mrf.mxu0  ;;  %v496_v38 = vpop.f32.mrf.mxu1  ;;  %683 = vst [vmem:[%s1144_s3 + $0x8] sm:$0xff] %v973_v36  ;;  %978 = vtanh.f32 %v533_v35 }
  0xb4   : > { %v975_v39 = vpop.eup %974  ;;  %980 = vtanh.f32 %v476_v37 }
  0xb5   : > { %691 = vst [vmem:[%s1144_s3 + $0x48] sm:$0xff] %v975_v39  ;;  %982 = vtanh.f32 %v496_v38 }
  0xb8   : > { %v977_v40 = vpop.eup %976 }
  0xb9   : > { %v979_v41 = vpop.eup %978  ;;  %699 = vst [vmem:[%s1144_s3 + $0x88] sm:$0xff] %v977_v40  ;;  %v516_v42 = vpop.f32.mrf.mxu2 }
  0xba   : > { %v536_v43 = vpop.f32.mrf.mxu3  ;;  %v981_v44 = vpop.eup %980  ;;  %707 = vst [vmem:[%s1144_s3 + $0xc8] sm:$0xff] %v979_v41  ;;  %984 = vtanh.f32 %v516_v42 }
  0xbb   : > { %v478_v45 = vpop.f32.mrf.mxu0  ;;  %v498_v46 = vpop.f32.mrf.mxu1  ;;  %684 = vst [vmem:[%s1144_s3 + $0x10] sm:$0xff] %v981_v44  ;;  %986 = vtanh.f32 %v536_v43 }
  0xbc   : > { %v983_v47 = vpop.eup %982  ;;  %988 = vtanh.f32 %v478_v45 }
  0xbd   : > { %692 = vst [vmem:[%s1144_s3 + $0x50] sm:$0xff] %v983_v47  ;;  %990 = vtanh.f32 %v498_v46 }
  0xc0   : > { %v985_v48 = vpop.eup %984 }
  0xc1   : > { %v987_v49 = vpop.eup %986  ;;  %700 = vst [vmem:[%s1144_s3 + $0x90] sm:$0xff] %v985_v48  ;;  %v518_v50 = vpop.f32.mrf.mxu2 }
  0xc2   : > { %v538_v51 = vpop.f32.mrf.mxu3  ;;  %v989_v52 = vpop.eup %988  ;;  %708 = vst [vmem:[%s1144_s3 + $0xd0] sm:$0xff] %v987_v49  ;;  %992 = vtanh.f32 %v518_v50 }
  0xc3   : > { %v481_v53 = vpop.f32.mrf.mxu0  ;;  %v501_v54 = vpop.f32.mrf.mxu1  ;;  %685 = vst [vmem:[%s1144_s3 + $0x18] sm:$0xff] %v989_v52  ;;  %994 = vtanh.f32 %v538_v51 }
  0xc4   : > { %v991_v55 = vpop.eup %990  ;;  %996 = vtanh.f32 %v481_v53 }
  0xc5   : > { %693 = vst [vmem:[%s1144_s3 + $0x58] sm:$0xff] %v991_v55  ;;  %998 = vtanh.f32 %v501_v54 }
  0xc8   : > { %v993_v56 = vpop.eup %992 }
  0xc9   : > { %v995_v57 = vpop.eup %994  ;;  %701 = vst [vmem:[%s1144_s3 + $0x98] sm:$0xff] %v993_v56  ;;  %v521_v58 = vpop.f32.mrf.mxu2 }
  0xca   : > { %v541_v59 = vpop.f32.mrf.mxu3  ;;  %v997_v60 = vpop.eup %996  ;;  %709 = vst [vmem:[%s1144_s3 + $0xd8] sm:$0xff] %v995_v57  ;;  %1000 = vtanh.f32 %v521_v58 }
  0xcb   : > { %v483_v61 = vpop.f32.mrf.mxu0  ;;  %v503_v62 = vpop.f32.mrf.mxu1  ;;  %686 = vst [vmem:[%s1144_s3 + $0x20] sm:$0xff] %v997_v60  ;;  %1002 = vtanh.f32 %v541_v59 }
  0xcc   : > { %v999_v63 = vpop.eup %998  ;;  %1004 = vtanh.f32 %v483_v61 }
  0xcd   : > { %694 = vst [vmem:[%s1144_s3 + $0x60] sm:$0xff] %v999_v63  ;;  %1006 = vtanh.f32 %v503_v62 }
  0xd0   : > { %v1001_v0 = vpop.eup %1000 }
  0xd1   : > { %v1003_v1 = vpop.eup %1002  ;;  %702 = vst [vmem:[%s1144_s3 + $0xa0] sm:$0xff] %v1001_v0  ;;  %v523_v2 = vpop.f32.mrf.mxu2 }
  0xd2   : > { %v543_v3 = vpop.f32.mrf.mxu3  ;;  %v1005_v4 = vpop.eup %1004  ;;  %710 = vst [vmem:[%s1144_s3 + $0xe0] sm:$0xff] %v1003_v1  ;;  %1008 = vtanh.f32 %v523_v2 }
  0xd3   : > { %v486_v5 = vpop.f32.mrf.mxu0  ;;  %v506_v6 = vpop.f32.mrf.mxu1  ;;  %687 = vst [vmem:[%s1144_s3 + $0x28] sm:$0xff] %v1005_v4  ;;  %1010 = vtanh.f32 %v543_v3 }
  0xd4   : > { %v1007_v7 = vpop.eup %1006  ;;  %1012 = vtanh.f32 %v486_v5 }
  0xd5   : > { %695 = vst [vmem:[%s1144_s3 + $0x68] sm:$0xff] %v1007_v7  ;;  %1014 = vtanh.f32 %v506_v6 }
  0xd8   : > { %v1009_v8 = vpop.eup %1008 }
  0xd9   : > { %v1011_v9 = vpop.eup %1010  ;;  %703 = vst [vmem:[%s1144_s3 + $0xa8] sm:$0xff] %v1009_v8  ;;  %v526_v10 = vpop.f32.mrf.mxu2 }
  0xda   : > { %v546_v11 = vpop.f32.mrf.mxu3  ;;  %v1013_v12 = vpop.eup %1012  ;;  %711 = vst [vmem:[%s1144_s3 + $0xe8] sm:$0xff] %v1011_v9  ;;  %1016 = vtanh.f32 %v526_v10 }
  0xdb   : > { %v488_v13 = vpop.f32.mrf.mxu0  ;;  %v508_v14 = vpop.f32.mrf.mxu1  ;;  %688 = vst [vmem:[%s1144_s3 + $0x30] sm:$0xff] %v1013_v12  ;;  %1018 = vtanh.f32 %v546_v11 }
  0xdc   : > { %v1015_v15 = vpop.eup %1014  ;;  %1020 = vtanh.f32 %v488_v13 }
  0xdd   : > { %696 = vst [vmem:[%s1144_s3 + $0x70] sm:$0xff] %v1015_v15  ;;  %1022 = vtanh.f32 %v508_v14 }
  0xe0   : > { %v1017_v16 = vpop.eup %1016 }
  0xe1   : > { %v1019_v17 = vpop.eup %1018  ;;  %704 = vst [vmem:[%s1144_s3 + $0xb0] sm:$0xff] %v1017_v16  ;;  %v528_v18 = vpop.f32.mrf.mxu2 }
  0xe2   : > { %v548_v19 = vpop.f32.mrf.mxu3  ;;  %v1021_v20 = vpop.eup %1020  ;;  %712 = vst [vmem:[%s1144_s3 + $0xf0] sm:$0xff] %v1019_v17  ;;  %1024 = vtanh.f32 %v528_v18 }
  0xe3   : > { %v1023_v21 = vpop.eup %1022  ;;  %689 = vst [vmem:[%s1144_s3 + $0x38] sm:$0xff] %v1021_v20  ;;  %1026 = vtanh.f32 %v548_v19 }
  0xe4   : > { %697 = vst [vmem:[%s1144_s3 + $0x78] sm:$0xff] %v1023_v21 }
  0xe8   : > { %v1025_v22 = vpop.eup %1024 }
  0xe9   : > { %v1027_v23 = vpop.eup %1026  ;;  %705 = vst [vmem:[%s1144_s3 + $0xb8] sm:$0xff] %v1025_v22 }
  0xea   : > { %713 = vst [vmem:[%s1144_s3 + $0xf8] sm:$0xff] %v1027_v23 }
  0xeb PF: > { %s12_s11 = sadd.s32 1, %s1050_s11   ;;  %s1190_s9 = smov %s1046_s10 }
  0xec   : > { %p9_p5 = scmp.ge.s32.totalorder %s12_s11, 4   ;;  %s1191_s10 = smov %s1193_s12 }
  0xee   :  { %11 = sbr.rel (!%p9_p5) target bundleno = 2 (0x2), region = 69 }

</bundles_post_ra>
